<compile_context>
chip_gen: v6e
topology: v6e:2x2x1
jax: 0.10.0
libtpu: 0.0.40
codegen_flags: <defaults>
</compile_context>

<pallas_src>
import jax
import jax.numpy as jnp
from jax.experimental import pallas as pl
from jax.experimental.pallas import tpu as pltpu

BN_EPS = 1e-5


# ----------------------------- Pallas kernels ------------------------------

def _fused_main_kernel(taps_ref, wd_ref, bd_ref, w1_ref, b1_ref, o_ref):
    # taps_ref: (1, 3, 9*Cin, HW)   three branches' im2col taps, K on sublanes
    # wd_ref  : (3, Cmid, 9*Cin)    BN-scale-folded dilated-conv weights (W^T)
    # bd_ref  : (3, Cmid, 1)        folded BN bias per branch
    # w1_ref  : (3, Cmid, Cmid)     1x1-conv weight split along its K (= concat)
    # b1_ref  : (Cmid, 1)           folded BN bias of the 1x1 conv
    # o_ref   : (1, Cmid, HW)
    cmid, hw = o_ref.shape[1], o_ref.shape[2]
    acc = jnp.zeros((cmid, hw), jnp.float32)
    for r in range(taps_ref.shape[1]):          # static unroll: 3 branches
        # dilated conv as ONE K=9*Cin matmul, lane dim = HW (256)
        y = jnp.dot(wd_ref[r], taps_ref[0, r], preferred_element_type=jnp.float32)
        y = jnp.maximum(y + bd_ref[r], 0.0)     # folded BN (eval) + ReLU
        # 1x1 conv contribution of this branch (replaces concat + big matmul)
        acc = acc + jnp.dot(w1_ref[r], y, preferred_element_type=jnp.float32)
    o_ref[0] = jnp.maximum(acc + b1_ref[...], 0.0)


def _resize_kernel(z_ref, a_ref, bt_ref, o_ref):
    # Bilinear resize, align_corners=True, for one batch element.
    # z_ref : (1, Cmid*H, W)   rows ordered (c, h), cols = w
    # a_ref : (OH, H)          row-interp matrix
    # bt_ref: (W, OW)          column-interp matrix (transposed)
    # o_ref : (1, Cmid, OH, OW)
    cmid = o_ref.shape[1]
    h_in = a_ref.shape[1]
    # column (w) interpolation for ALL channels/rows in one matmul
    t = jnp.dot(z_ref[0], bt_ref[...], preferred_element_type=jnp.float32)
    # row (h) interpolation per channel: lane-dense (OH,H)@(H,OW) matmuls
    for c in range(cmid):                       # static unroll (Cmid = 12)
        o_ref[0, c] = jnp.dot(a_ref[...], t[c * h_in:(c + 1) * h_in, :],
                              preferred_element_type=jnp.float32)


# ------------------------------- wrappers -----------------------------------

def _build_taps(x_nchw, rate):
    """ReplicationPad2d(rate) + im2col of the 3x3 dilated taps -> (N, 9*Cin, H*W)."""
    n, c, h, w = x_nchw.shape
    xp = jnp.pad(x_nchw, ((0, 0), (0, 0), (rate, rate), (rate, rate)), mode="edge")
    taps = [xp[:, :, ky * rate:ky * rate + h, kx * rate:kx * rate + w]
            for ky in range(3) for kx in range(3)]
    taps = jnp.stack(taps, axis=1)              # (N, 9, Cin, H, W)
    return taps.reshape(n, 9 * c, h * w)        # K index = tap*Cin + ci


def _interp_matrix(src, dst):
    """Interpolation matrix matching F.interpolate(bilinear, align_corners=True)."""
    if src == 1:
        return jnp.ones((dst, 1), jnp.float32)
    coords = jnp.arange(dst, dtype=jnp.float32) * (src - 1) / (dst - 1)
    i0 = jnp.clip(jnp.floor(coords).astype(jnp.int32), 0, src - 2)
    frac = coords - i0.astype(jnp.float32)
    return (jax.nn.one_hot(i0, src, dtype=jnp.float32) * (1.0 - frac)[:, None]
            + jax.nn.one_hot(i0 + 1, src, dtype=jnp.float32) * frac[:, None])


# ---------------------------- params / forward ------------------------------

def init_params(key, band_num):
    cin = band_num * 4
    cmid = band_num * 6
    ccat = cmid * 3

    def conv_w(k, kh, kw, ci, co):
        return 0.1 * jax.random.normal(k, (kh, kw, ci, co), jnp.float32)

    def bn(k, co):
        # eval-mode BN with synthetic gamma/beta/running stats, pre-folded
        k1, k2, k3, k4 = jax.random.split(k, 4)
        gamma = 1.0 + 0.1 * jax.random.normal(k1, (co,), jnp.float32)
        beta = 0.1 * jax.random.normal(k2, (co,), jnp.float32)
        mean = 0.1 * jax.random.normal(k3, (co,), jnp.float32)
        var = 1.0 + jnp.abs(jax.random.normal(k4, (co,), jnp.float32))
        scale = gamma / jnp.sqrt(var + BN_EPS)
        bias = beta - mean * scale
        return scale, bias

    ks = jax.random.split(key, 8)
    params = {}
    for idx, name in enumerate(("d2", "d3", "d4")):
        w = conv_w(ks[2 * idx], 3, 3, cin, cmid)         # (3, 3, Cin, Cmid)
        s, b = bn(ks[2 * idx + 1], cmid)
        params[name] = (w, s, b)
    w1 = conv_w(ks[6], 1, 1, ccat, cmid).reshape(ccat, cmid)  # (Ccat, Cmid)
    s1, b1 = bn(ks[7], cmid)
    params["conv1"] = (w1, s1, b1)
    return params


def dilate_net_forward(x_nchw, params):
    n, cin, h, w = x_nchw.shape
    cmid = params["d2"][0].shape[-1]
    hw = h * w
    out_h = out_w = 256
    rates = (3, 5, 7)

    # --- fold BN scale into conv weights; transpose to lane-dense (Cout, K) ---
    wd_list, bd_list = [], []
    for name in ("d2", "d3", "d4"):
        wk, s, b = params[name]                                   # (3,3,Cin,Cmid)
        wt = jnp.transpose(wk, (3, 0, 1, 2)).reshape(cmid, 9 * cin)
        wd_list.append(wt * s[:, None])
        bd_list.append(b[:, None])
    wd = jnp.stack(wd_list)                                       # (3, Cmid, 9*Cin)
    bd = jnp.stack(bd_list)                                       # (3, Cmid, 1)

    w1, s1, b1 = params["conv1"]
    w1t = w1.T * s1[:, None]                                      # (Cmid, Ccat) folded
    w1s = jnp.stack([w1t[:, r * cmid:(r + 1) * cmid] for r in range(3)])  # (3,Cmid,Cmid)
    b1c = b1[:, None]                                             # (Cmid, 1)

    # --- im2col taps for the three dilation rates (XLA glue, tiny) ---
    taps = jnp.stack([_build_taps(x_nchw, r) for r in rates], axis=1)  # (N,3,9*Cin,HW)

    # --- fused: 3x (dilated conv + BN + ReLU) + concat + 1x1 conv + BN + ReLU ---
    z = pl.pallas_call(
        _fused_main_kernel,
        out_shape=jax.ShapeDtypeStruct((n, cmid, hw), jnp.float32),
        grid=(n,),
        in_specs=[
            pl.BlockSpec((1, 3, 9 * cin, hw), lambda i: (i, 0, 0, 0)),
            pl.BlockSpec((3, cmid, 9 * cin), lambda i: (0, 0, 0)),
            pl.BlockSpec((3, cmid, 1), lambda i: (0, 0, 0)),
            pl.BlockSpec((3, cmid, cmid), lambda i: (0, 0, 0)),
            pl.BlockSpec((cmid, 1), lambda i: (0, 0)),
        ],
        out_specs=pl.BlockSpec((1, cmid, hw), lambda i: (i, 0, 0)),
        compiler_params=pltpu.CompilerParams(dimension_semantics=("parallel",)),
    )(taps, wd, bd, w1s, b1c)                                     # (N, Cmid, H*W)

    # --- bilinear resize to (256, 256), align_corners=True, batched per sample ---
    a_mat = _interp_matrix(h, out_h)                              # (256, H)
    bt_mat = _interp_matrix(w, out_w).T                           # (W, 256)
    z_rows = z.reshape(n, cmid * h, w)                            # cheap HBM reshape

    out = pl.pallas_call(
        _resize_kernel,
        out_shape=jax.ShapeDtypeStruct((n, cmid, out_h, out_w), jnp.float32),
        grid=(n,),
        in_specs=[
            pl.BlockSpec((1, cmid * h, w), lambda i: (i, 0, 0)),
            pl.BlockSpec((out_h, h), lambda i: (0, 0)),
            pl.BlockSpec((w, out_w), lambda i: (0, 0)),
        ],
        out_specs=pl.BlockSpec((1, cmid, out_h, out_w), lambda i: (i, 0, 0, 0)),
        compiler_params=pltpu.CompilerParams(dimension_semantics=("parallel",)),
    )(z_rows, a_mat, bt_mat)
    return out                                                    # (N, Cmid, 256, 256)


if __name__ == "__main__":
    band_num = 2
    n, h, w = 2, 16, 16
    key = jax.random.PRNGKey(0)
    kx, kp = jax.random.split(key)
    x = jax.random.normal(kx, (n, band_num * 4, h, w), jnp.float32)
    params = init_params(kp, band_num)

    fwd = jax.jit(dilate_net_forward)
    out = jax.block_until_ready(fwd(x, params))
    assert out.shape == (n, band_num * 6, 256, 256), out.shape
    assert out.dtype == jnp.float32
    assert bool(jnp.isfinite(out).all())
    print("KERNEL_OK")
</pallas_src>

<mosaic_0001>
module attributes {stable_mosaic.version = 11 : i64} {
  func.func @_fused_main_kernel(%arg0: i32, %arg1: memref<1x3x72x256xf32, #tpu.memory_space<vmem>>, %arg2: memref<3x12x72xf32, #tpu.memory_space<vmem>>, %arg3: memref<3x12x1xf32, #tpu.memory_space<vmem>>, %arg4: memref<3x12x12xf32, #tpu.memory_space<vmem>>, %arg5: memref<12x1xf32, #tpu.memory_space<vmem>>, %arg6: memref<1x12x256xf32, #tpu.memory_space<vmem>>) attributes {dimension_semantics = [#tpu.dimension_semantics<parallel>], iteration_bounds = array<i64: 2>, scalar_prefetch = 0 : i64, scratch_operands = 0 : i64, tpu.core_type = #tpu.core_type<tc>, window_params = [{transform_indices = @transform_0, window_bounds = array<i64: 1, 3, 72, 256>}, {pipeline_mode = #tpu.pipeline_mode<synchronous>, transform_indices = @transform_1, window_bounds = array<i64: 3, 12, 72>}, {pipeline_mode = #tpu.pipeline_mode<synchronous>, transform_indices = @transform_2, window_bounds = array<i64: 3, 12, 1>}, {pipeline_mode = #tpu.pipeline_mode<synchronous>, transform_indices = @transform_3, window_bounds = array<i64: 3, 12, 12>}, {pipeline_mode = #tpu.pipeline_mode<synchronous>, transform_indices = @transform_4, window_bounds = array<i64: 12, 1>}, {transform_indices = @transform_5, window_bounds = array<i64: 1, 12, 256>}]} {
    %cst = arith.constant 0.000000e+00 : f32
    %0 = vector.broadcast %cst : f32 to vector<12x256xf32>
    %c0 = arith.constant 0 : index
    %c0_0 = arith.constant 0 : index
    %c0_1 = arith.constant 0 : index
    %1 = vector.load %arg2[%c0, %c0_0, %c0_1] : memref<3x12x72xf32, #tpu.memory_space<vmem>>, vector<1x12x72xf32>
    %2 = vector.shape_cast %1 : vector<1x12x72xf32> to vector<12x72xf32>
    %c0_2 = arith.constant 0 : index
    %c0_3 = arith.constant 0 : index
    %c0_4 = arith.constant 0 : index
    %c0_5 = arith.constant 0 : index
    %3 = vector.load %arg1[%c0_2, %c0_3, %c0_4, %c0_5] : memref<1x3x72x256xf32, #tpu.memory_space<vmem>>, vector<1x1x72x256xf32>
    %4 = vector.shape_cast %3 : vector<1x1x72x256xf32> to vector<72x256xf32>
    %cst_6 = arith.constant dense<0.000000e+00> : vector<12x256xf32>
    %5 = tpu.matmul %2, %4, %cst_6 {dimension_numbers = #tpu.dot_dimension_numbers<[1], [0], [0], [1], [0, 0, 1, 1], [], []>} : vector<12x72xf32>, vector<72x256xf32>, vector<12x256xf32> -> vector<12x256xf32>
    %c0_7 = arith.constant 0 : index
    %c0_8 = arith.constant 0 : index
    %c0_9 = arith.constant 0 : index
    %6 = vector.load %arg3[%c0_7, %c0_8, %c0_9] : memref<3x12x1xf32, #tpu.memory_space<vmem>>, vector<1x12x1xf32>
    %7 = vector.shape_cast %6 : vector<1x12x1xf32> to vector<12x1xf32>
    %8 = vector.broadcast %7 : vector<12x1xf32> to vector<12x256xf32>
    %9 = arith.addf %5, %8 : vector<12x256xf32>
    %cst_10 = arith.constant 0.000000e+00 : f32
    %10 = vector.broadcast %cst_10 : f32 to vector<12x256xf32>
    %11 = arith.maximumf %9, %10 : vector<12x256xf32>
    %c0_11 = arith.constant 0 : index
    %c0_12 = arith.constant 0 : index
    %c0_13 = arith.constant 0 : index
    %12 = vector.load %arg4[%c0_11, %c0_12, %c0_13] : memref<3x12x12xf32, #tpu.memory_space<vmem>>, vector<1x12x12xf32>
    %13 = vector.shape_cast %12 : vector<1x12x12xf32> to vector<12x12xf32>
    %cst_14 = arith.constant dense<0.000000e+00> : vector<12x256xf32>
    %14 = tpu.matmul %13, %11, %cst_14 {dimension_numbers = #tpu.dot_dimension_numbers<[1], [0], [0], [1], [0, 0, 1, 1], [], []>} : vector<12x12xf32>, vector<12x256xf32>, vector<12x256xf32> -> vector<12x256xf32>
    %15 = arith.addf %0, %14 : vector<12x256xf32>
    %c1 = arith.constant 1 : index
    %c0_15 = arith.constant 0 : index
    %c0_16 = arith.constant 0 : index
    %16 = vector.load %arg2[%c1, %c0_15, %c0_16] : memref<3x12x72xf32, #tpu.memory_space<vmem>>, vector<1x12x72xf32>
    %17 = vector.shape_cast %16 : vector<1x12x72xf32> to vector<12x72xf32>
    %c0_17 = arith.constant 0 : index
    %c1_18 = arith.constant 1 : index
    %c0_19 = arith.constant 0 : index
    %c0_20 = arith.constant 0 : index
    %18 = vector.load %arg1[%c0_17, %c1_18, %c0_19, %c0_20] : memref<1x3x72x256xf32, #tpu.memory_space<vmem>>, vector<1x1x72x256xf32>
    %19 = vector.shape_cast %18 : vector<1x1x72x256xf32> to vector<72x256xf32>
    %cst_21 = arith.constant dense<0.000000e+00> : vector<12x256xf32>
    %20 = tpu.matmul %17, %19, %cst_21 {dimension_numbers = #tpu.dot_dimension_numbers<[1], [0], [0], [1], [0, 0, 1, 1], [], []>} : vector<12x72xf32>, vector<72x256xf32>, vector<12x256xf32> -> vector<12x256xf32>
    %c1_22 = arith.constant 1 : index
    %c0_23 = arith.constant 0 : index
    %c0_24 = arith.constant 0 : index
    %21 = vector.load %arg3[%c1_22, %c0_23, %c0_24] : memref<3x12x1xf32, #tpu.memory_space<vmem>>, vector<1x12x1xf32>
    %22 = vector.shape_cast %21 : vector<1x12x1xf32> to vector<12x1xf32>
    %23 = vector.broadcast %22 : vector<12x1xf32> to vector<12x256xf32>
    %24 = arith.addf %20, %23 : vector<12x256xf32>
    %cst_25 = arith.constant 0.000000e+00 : f32
    %25 = vector.broadcast %cst_25 : f32 to vector<12x256xf32>
    %26 = arith.maximumf %24, %25 : vector<12x256xf32>
    %c1_26 = arith.constant 1 : index
    %c0_27 = arith.constant 0 : index
    %c0_28 = arith.constant 0 : index
    %27 = vector.load %arg4[%c1_26, %c0_27, %c0_28] : memref<3x12x12xf32, #tpu.memory_space<vmem>>, vector<1x12x12xf32>
    %28 = vector.shape_cast %27 : vector<1x12x12xf32> to vector<12x12xf32>
    %cst_29 = arith.constant dense<0.000000e+00> : vector<12x256xf32>
    %29 = tpu.matmul %28, %26, %cst_29 {dimension_numbers = #tpu.dot_dimension_numbers<[1], [0], [0], [1], [0, 0, 1, 1], [], []>} : vector<12x12xf32>, vector<12x256xf32>, vector<12x256xf32> -> vector<12x256xf32>
    %30 = arith.addf %15, %29 : vector<12x256xf32>
    %c2 = arith.constant 2 : index
    %c0_30 = arith.constant 0 : index
    %c0_31 = arith.constant 0 : index
    %31 = vector.load %arg2[%c2, %c0_30, %c0_31] : memref<3x12x72xf32, #tpu.memory_space<vmem>>, vector<1x12x72xf32>
    %32 = vector.shape_cast %31 : vector<1x12x72xf32> to vector<12x72xf32>
    %c0_32 = arith.constant 0 : index
    %c2_33 = arith.constant 2 : index
    %c0_34 = arith.constant 0 : index
    %c0_35 = arith.constant 0 : index
    %33 = vector.load %arg1[%c0_32, %c2_33, %c0_34, %c0_35] : memref<1x3x72x256xf32, #tpu.memory_space<vmem>>, vector<1x1x72x256xf32>
    %34 = vector.shape_cast %33 : vector<1x1x72x256xf32> to vector<72x256xf32>
    %cst_36 = arith.constant dense<0.000000e+00> : vector<12x256xf32>
    %35 = tpu.matmul %32, %34, %cst_36 {dimension_numbers = #tpu.dot_dimension_numbers<[1], [0], [0], [1], [0, 0, 1, 1], [], []>} : vector<12x72xf32>, vector<72x256xf32>, vector<12x256xf32> -> vector<12x256xf32>
    %c2_37 = arith.constant 2 : index
    %c0_38 = arith.constant 0 : index
    %c0_39 = arith.constant 0 : index
    %36 = vector.load %arg3[%c2_37, %c0_38, %c0_39] : memref<3x12x1xf32, #tpu.memory_space<vmem>>, vector<1x12x1xf32>
    %37 = vector.shape_cast %36 : vector<1x12x1xf32> to vector<12x1xf32>
    %38 = vector.broadcast %37 : vector<12x1xf32> to vector<12x256xf32>
    %39 = arith.addf %35, %38 : vector<12x256xf32>
    %cst_40 = arith.constant 0.000000e+00 : f32
    %40 = vector.broadcast %cst_40 : f32 to vector<12x256xf32>
    %41 = arith.maximumf %39, %40 : vector<12x256xf32>
    %c2_41 = arith.constant 2 : index
    %c0_42 = arith.constant 0 : index
    %c0_43 = arith.constant 0 : index
    %42 = vector.load %arg4[%c2_41, %c0_42, %c0_43] : memref<3x12x12xf32, #tpu.memory_space<vmem>>, vector<1x12x12xf32>
    %43 = vector.shape_cast %42 : vector<1x12x12xf32> to vector<12x12xf32>
    %cst_44 = arith.constant dense<0.000000e+00> : vector<12x256xf32>
    %44 = tpu.matmul %43, %41, %cst_44 {dimension_numbers = #tpu.dot_dimension_numbers<[1], [0], [0], [1], [0, 0, 1, 1], [], []>} : vector<12x12xf32>, vector<12x256xf32>, vector<12x256xf32> -> vector<12x256xf32>
    %45 = arith.addf %30, %44 : vector<12x256xf32>
    %c0_45 = arith.constant 0 : index
    %c0_46 = arith.constant 0 : index
    %46 = vector.load %arg5[%c0_45, %c0_46] : memref<12x1xf32, #tpu.memory_space<vmem>>, vector<12x1xf32>
    %47 = vector.broadcast %46 : vector<12x1xf32> to vector<12x256xf32>
    %48 = arith.addf %45, %47 : vector<12x256xf32>
    %cst_47 = arith.constant 0.000000e+00 : f32
    %49 = vector.broadcast %cst_47 : f32 to vector<12x256xf32>
    %50 = arith.maximumf %48, %49 : vector<12x256xf32>
    %c0_48 = arith.constant 0 : index
    %c0_49 = arith.constant 0 : index
    %c0_50 = arith.constant 0 : index
    %51 = vector.load %arg6[%c0_48, %c0_49, %c0_50] : memref<1x12x256xf32, #tpu.memory_space<vmem>>, vector<1x12x256xf32>
    %52 = vector.shape_cast %51 : vector<1x12x256xf32> to vector<12x256xf32>
    %53 = vector.shape_cast %50 : vector<12x256xf32> to vector<1x12x256xf32>
    tpu.vector_store %arg6[%c0_48, %c0_49, %c0_50], %53 {strides = array<i32>} : memref<1x12x256xf32, #tpu.memory_space<vmem>>, vector<1x12x256xf32>,
    return
  }
  func.func @transform_0(%arg0: i32) -> (i32, i32, i32, i32) {
    %c0_i32 = arith.constant 0 : i32
    %c0_i32_0 = arith.constant 0 : i32
    %c0_i32_1 = arith.constant 0 : i32
    %c0_i32_2 = arith.constant 0 : i32
    return %arg0, %c0_i32, %c0_i32_0, %c0_i32_1 : i32, i32, i32, i32
  }
  func.func @transform_1(%arg0: i32) -> (i32, i32, i32) {
    %c0_i32 = arith.constant 0 : i32
    %c0_i32_0 = arith.constant 0 : i32
    %c0_i32_1 = arith.constant 0 : i32
    %c0_i32_2 = arith.constant 0 : i32
    return %c0_i32, %c0_i32_0, %c0_i32_1 : i32, i32, i32
  }
  func.func @transform_2(%arg0: i32) -> (i32, i32, i32) {
    %c0_i32 = arith.constant 0 : i32
    %c0_i32_0 = arith.constant 0 : i32
    %c0_i32_1 = arith.constant 0 : i32
    %c0_i32_2 = arith.constant 0 : i32
    return %c0_i32, %c0_i32_0, %c0_i32_1 : i32, i32, i32
  }
  func.func @transform_3(%arg0: i32) -> (i32, i32, i32) {
    %c0_i32 = arith.constant 0 : i32
    %c0_i32_0 = arith.constant 0 : i32
    %c0_i32_1 = arith.constant 0 : i32
    %c0_i32_2 = arith.constant 0 : i32
    return %c0_i32, %c0_i32_0, %c0_i32_1 : i32, i32, i32
  }
  func.func @transform_4(%arg0: i32) -> (i32, i32) {
    %c0_i32 = arith.constant 0 : i32
    %c0_i32_0 = arith.constant 0 : i32
    %c0_i32_1 = arith.constant 0 : i32
    return %c0_i32, %c0_i32_0 : i32, i32
  }
  func.func @transform_5(%arg0: i32) -> (i32, i32, i32) {
    %c0_i32 = arith.constant 0 : i32
    %c0_i32_0 = arith.constant 0 : i32
    %c0_i32_1 = arith.constant 0 : i32
    return %arg0, %c0_i32, %c0_i32_0 : i32, i32, i32
  }
}

module attributes {stable_mosaic.version = 11 : i64} {
  func.func @_resize_kernel(%arg0: i32, %arg1: memref<1x192x16xf32, #tpu.memory_space<vmem>>, %arg2: memref<256x16xf32, #tpu.memory_space<vmem>>, %arg3: memref<16x256xf32, #tpu.memory_space<vmem>>, %arg4: memref<1x12x256x256xf32, #tpu.memory_space<vmem>>) attributes {dimension_semantics = [#tpu.dimension_semantics<parallel>], iteration_bounds = array<i64: 2>, scalar_prefetch = 0 : i64, scratch_operands = 0 : i64, tpu.core_type = #tpu.core_type<tc>, window_params = [{transform_indices = @transform_0, window_bounds = array<i64: 1, 192, 16>}, {pipeline_mode = #tpu.pipeline_mode<synchronous>, transform_indices = @transform_1, window_bounds = array<i64: 256, 16>}, {pipeline_mode = #tpu.pipeline_mode<synchronous>, transform_indices = @transform_2, window_bounds = array<i64: 16, 256>}, {transform_indices = @transform_3, window_bounds = array<i64: 1, 12, 256, 256>}]} {
    %c0 = arith.constant 0 : index
    %c0_0 = arith.constant 0 : index
    %c0_1 = arith.constant 0 : index
    %0 = vector.load %arg1[%c0, %c0_0, %c0_1] : memref<1x192x16xf32, #tpu.memory_space<vmem>>, vector<1x192x16xf32>
    %1 = vector.shape_cast %0 : vector<1x192x16xf32> to vector<192x16xf32>
    %c0_2 = arith.constant 0 : index
    %c0_3 = arith.constant 0 : index
    %2 = vector.load %arg3[%c0_2, %c0_3] : memref<16x256xf32, #tpu.memory_space<vmem>>, vector<16x256xf32>
    %cst = arith.constant dense<0.000000e+00> : vector<192x256xf32>
    %3 = tpu.matmul %1, %2, %cst {dimension_numbers = #tpu.dot_dimension_numbers<[1], [0], [0], [1], [0, 0, 1, 1], [], []>} : vector<192x16xf32>, vector<16x256xf32>, vector<192x256xf32> -> vector<192x256xf32>
    %c0_4 = arith.constant 0 : index
    %c0_5 = arith.constant 0 : index
    %4 = vector.load %arg2[%c0_4, %c0_5] : memref<256x16xf32, #tpu.memory_space<vmem>>, vector<256x16xf32>
    %5 = vector.extract_strided_slice %3 {offsets = [0, 0], sizes = [16, 256], strides = [1, 1]} : vector<192x256xf32> to vector<16x256xf32>
    %cst_6 = arith.constant dense<0.000000e+00> : vector<256x256xf32>
    %6 = tpu.matmul %4, %5, %cst_6 {dimension_numbers = #tpu.dot_dimension_numbers<[1], [0], [0], [1], [0, 0, 1, 1], [], []>} : vector<256x16xf32>, vector<16x256xf32>, vector<256x256xf32> -> vector<256x256xf32>
    %c0_7 = arith.constant 0 : index
    %c0_8 = arith.constant 0 : index
    %c0_9 = arith.constant 0 : index
    %c0_10 = arith.constant 0 : index
    %7 = vector.load %arg4[%c0_7, %c0_8, %c0_9, %c0_10] : memref<1x12x256x256xf32, #tpu.memory_space<vmem>>, vector<1x1x256x256xf32>
    %8 = vector.shape_cast %7 : vector<1x1x256x256xf32> to vector<256x256xf32>
    %9 = vector.shape_cast %6 : vector<256x256xf32> to vector<1x1x256x256xf32>
    tpu.vector_store %arg4[%c0_7, %c0_8, %c0_9, %c0_10], %9 {strides = array<i32>} : memref<1x12x256x256xf32, #tpu.memory_space<vmem>>, vector<1x1x256x256xf32>,
    %c0_11 = arith.constant 0 : index
    %c0_12 = arith.constant 0 : index
    %10 = vector.load %arg2[%c0_11, %c0_12] : memref<256x16xf32, #tpu.memory_space<vmem>>, vector<256x16xf32>
    %11 = vector.extract_strided_slice %3 {offsets = [16, 0], sizes = [16, 256], strides = [1, 1]} : vector<192x256xf32> to vector<16x256xf32>
    %cst_13 = arith.constant dense<0.000000e+00> : vector<256x256xf32>
    %12 = tpu.matmul %10, %11, %cst_13 {dimension_numbers = #tpu.dot_dimension_numbers<[1], [0], [0], [1], [0, 0, 1, 1], [], []>} : vector<256x16xf32>, vector<16x256xf32>, vector<256x256xf32> -> vector<256x256xf32>
    %c0_14 = arith.constant 0 : index
    %c1 = arith.constant 1 : index
    %c0_15 = arith.constant 0 : index
    %c0_16 = arith.constant 0 : index
    %13 = vector.load %arg4[%c0_14, %c1, %c0_15, %c0_16] : memref<1x12x256x256xf32, #tpu.memory_space<vmem>>, vector<1x1x256x256xf32>
    %14 = vector.shape_cast %13 : vector<1x1x256x256xf32> to vector<256x256xf32>
    %15 = vector.shape_cast %12 : vector<256x256xf32> to vector<1x1x256x256xf32>
    tpu.vector_store %arg4[%c0_14, %c1, %c0_15, %c0_16], %15 {strides = array<i32>} : memref<1x12x256x256xf32, #tpu.memory_space<vmem>>, vector<1x1x256x256xf32>,
    %c0_17 = arith.constant 0 : index
    %c0_18 = arith.constant 0 : index
    %16 = vector.load %arg2[%c0_17, %c0_18] : memref<256x16xf32, #tpu.memory_space<vmem>>, vector<256x16xf32>
    %17 = vector.extract_strided_slice %3 {offsets = [32, 0], sizes = [16, 256], strides = [1, 1]} : vector<192x256xf32> to vector<16x256xf32>
    %cst_19 = arith.constant dense<0.000000e+00> : vector<256x256xf32>
    %18 = tpu.matmul %16, %17, %cst_19 {dimension_numbers = #tpu.dot_dimension_numbers<[1], [0], [0], [1], [0, 0, 1, 1], [], []>} : vector<256x16xf32>, vector<16x256xf32>, vector<256x256xf32> -> vector<256x256xf32>
    %c0_20 = arith.constant 0 : index
    %c2 = arith.constant 2 : index
    %c0_21 = arith.constant 0 : index
    %c0_22 = arith.constant 0 : index
    %19 = vector.load %arg4[%c0_20, %c2, %c0_21, %c0_22] : memref<1x12x256x256xf32, #tpu.memory_space<vmem>>, vector<1x1x256x256xf32>
    %20 = vector.shape_cast %19 : vector<1x1x256x256xf32> to vector<256x256xf32>
    %21 = vector.shape_cast %18 : vector<256x256xf32> to vector<1x1x256x256xf32>
    tpu.vector_store %arg4[%c0_20, %c2, %c0_21, %c0_22], %21 {strides = array<i32>} : memref<1x12x256x256xf32, #tpu.memory_space<vmem>>, vector<1x1x256x256xf32>,
    %c0_23 = arith.constant 0 : index
    %c0_24 = arith.constant 0 : index
    %22 = vector.load %arg2[%c0_23, %c0_24] : memref<256x16xf32, #tpu.memory_space<vmem>>, vector<256x16xf32>
    %23 = vector.extract_strided_slice %3 {offsets = [48, 0], sizes = [16, 256], strides = [1, 1]} : vector<192x256xf32> to vector<16x256xf32>
    %cst_25 = arith.constant dense<0.000000e+00> : vector<256x256xf32>
    %24 = tpu.matmul %22, %23, %cst_25 {dimension_numbers = #tpu.dot_dimension_numbers<[1], [0], [0], [1], [0, 0, 1, 1], [], []>} : vector<256x16xf32>, vector<16x256xf32>, vector<256x256xf32> -> vector<256x256xf32>
    %c0_26 = arith.constant 0 : index
    %c3 = arith.constant 3 : index
    %c0_27 = arith.constant 0 : index
    %c0_28 = arith.constant 0 : index
    %25 = vector.load %arg4[%c0_26, %c3, %c0_27, %c0_28] : memref<1x12x256x256xf32, #tpu.memory_space<vmem>>, vector<1x1x256x256xf32>
    %26 = vector.shape_cast %25 : vector<1x1x256x256xf32> to vector<256x256xf32>
    %27 = vector.shape_cast %24 : vector<256x256xf32> to vector<1x1x256x256xf32>
    tpu.vector_store %arg4[%c0_26, %c3, %c0_27, %c0_28], %27 {strides = array<i32>} : memref<1x12x256x256xf32, #tpu.memory_space<vmem>>, vector<1x1x256x256xf32>,
    %c0_29 = arith.constant 0 : index
    %c0_30 = arith.constant 0 : index
    %28 = vector.load %arg2[%c0_29, %c0_30] : memref<256x16xf32, #tpu.memory_space<vmem>>, vector<256x16xf32>
    %29 = vector.extract_strided_slice %3 {offsets = [64, 0], sizes = [16, 256], strides = [1, 1]} : vector<192x256xf32> to vector<16x256xf32>
    %cst_31 = arith.constant dense<0.000000e+00> : vector<256x256xf32>
    %30 = tpu.matmul %28, %29, %cst_31 {dimension_numbers = #tpu.dot_dimension_numbers<[1], [0], [0], [1], [0, 0, 1, 1], [], []>} : vector<256x16xf32>, vector<16x256xf32>, vector<256x256xf32> -> vector<256x256xf32>
    %c0_32 = arith.constant 0 : index
    %c4 = arith.constant 4 : index
    %c0_33 = arith.constant 0 : index
    %c0_34 = arith.constant 0 : index
    %31 = vector.load %arg4[%c0_32, %c4, %c0_33, %c0_34] : memref<1x12x256x256xf32, #tpu.memory_space<vmem>>, vector<1x1x256x256xf32>
    %32 = vector.shape_cast %31 : vector<1x1x256x256xf32> to vector<256x256xf32>
    %33 = vector.shape_cast %30 : vector<256x256xf32> to vector<1x1x256x256xf32>
    tpu.vector_store %arg4[%c0_32, %c4, %c0_33, %c0_34], %33 {strides = array<i32>} : memref<1x12x256x256xf32, #tpu.memory_space<vmem>>, vector<1x1x256x256xf32>,
    %c0_35 = arith.constant 0 : index
    %c0_36 = arith.constant 0 : index
    %34 = vector.load %arg2[%c0_35, %c0_36] : memref<256x16xf32, #tpu.memory_space<vmem>>, vector<256x16xf32>
    %35 = vector.extract_strided_slice %3 {offsets = [80, 0], sizes = [16, 256], strides = [1, 1]} : vector<192x256xf32> to vector<16x256xf32>
    %cst_37 = arith.constant dense<0.000000e+00> : vector<256x256xf32>
    %36 = tpu.matmul %34, %35, %cst_37 {dimension_numbers = #tpu.dot_dimension_numbers<[1], [0], [0], [1], [0, 0, 1, 1], [], []>} : vector<256x16xf32>, vector<16x256xf32>, vector<256x256xf32> -> vector<256x256xf32>
    %c0_38 = arith.constant 0 : index
    %c5 = arith.constant 5 : index
    %c0_39 = arith.constant 0 : index
    %c0_40 = arith.constant 0 : index
    %37 = vector.load %arg4[%c0_38, %c5, %c0_39, %c0_40] : memref<1x12x256x256xf32, #tpu.memory_space<vmem>>, vector<1x1x256x256xf32>
    %38 = vector.shape_cast %37 : vector<1x1x256x256xf32> to vector<256x256xf32>
    %39 = vector.shape_cast %36 : vector<256x256xf32> to vector<1x1x256x256xf32>
    tpu.vector_store %arg4[%c0_38, %c5, %c0_39, %c0_40], %39 {strides = array<i32>} : memref<1x12x256x256xf32, #tpu.memory_space<vmem>>, vector<1x1x256x256xf32>,
    %c0_41 = arith.constant 0 : index
    %c0_42 = arith.constant 0 : index
    %40 = vector.load %arg2[%c0_41, %c0_42] : memref<256x16xf32, #tpu.memory_space<vmem>>, vector<256x16xf32>
    %41 = vector.extract_strided_slice %3 {offsets = [96, 0], sizes = [16, 256], strides = [1, 1]} : vector<192x256xf32> to vector<16x256xf32>
    %cst_43 = arith.constant dense<0.000000e+00> : vector<256x256xf32>
    %42 = tpu.matmul %40, %41, %cst_43 {dimension_numbers = #tpu.dot_dimension_numbers<[1], [0], [0], [1], [0, 0, 1, 1], [], []>} : vector<256x16xf32>, vector<16x256xf32>, vector<256x256xf32> -> vector<256x256xf32>
    %c0_44 = arith.constant 0 : index
    %c6 = arith.constant 6 : index
    %c0_45 = arith.constant 0 : index
    %c0_46 = arith.constant 0 : index
    %43 = vector.load %arg4[%c0_44, %c6, %c0_45, %c0_46] : memref<1x12x256x256xf32, #tpu.memory_space<vmem>>, vector<1x1x256x256xf32>
    %44 = vector.shape_cast %43 : vector<1x1x256x256xf32> to vector<256x256xf32>
    %45 = vector.shape_cast %42 : vector<256x256xf32> to vector<1x1x256x256xf32>
    tpu.vector_store %arg4[%c0_44, %c6, %c0_45, %c0_46], %45 {strides = array<i32>} : memref<1x12x256x256xf32, #tpu.memory_space<vmem>>, vector<1x1x256x256xf32>,
    %c0_47 = arith.constant 0 : index
    %c0_48 = arith.constant 0 : index
    %46 = vector.load %arg2[%c0_47, %c0_48] : memref<256x16xf32, #tpu.memory_space<vmem>>, vector<256x16xf32>
    %47 = vector.extract_strided_slice %3 {offsets = [112, 0], sizes = [16, 256], strides = [1, 1]} : vector<192x256xf32> to vector<16x256xf32>
    %cst_49 = arith.constant dense<0.000000e+00> : vector<256x256xf32>
    %48 = tpu.matmul %46, %47, %cst_49 {dimension_numbers = #tpu.dot_dimension_numbers<[1], [0], [0], [1], [0, 0, 1, 1], [], []>} : vector<256x16xf32>, vector<16x256xf32>, vector<256x256xf32> -> vector<256x256xf32>
    %c0_50 = arith.constant 0 : index
    %c7 = arith.constant 7 : index
    %c0_51 = arith.constant 0 : index
    %c0_52 = arith.constant 0 : index
    %49 = vector.load %arg4[%c0_50, %c7, %c0_51, %c0_52] : memref<1x12x256x256xf32, #tpu.memory_space<vmem>>, vector<1x1x256x256xf32>
    %50 = vector.shape_cast %49 : vector<1x1x256x256xf32> to vector<256x256xf32>
    %51 = vector.shape_cast %48 : vector<256x256xf32> to vector<1x1x256x256xf32>
    tpu.vector_store %arg4[%c0_50, %c7, %c0_51, %c0_52], %51 {strides = array<i32>} : memref<1x12x256x256xf32, #tpu.memory_space<vmem>>, vector<1x1x256x256xf32>,
    %c0_53 = arith.constant 0 : index
    %c0_54 = arith.constant 0 : index
    %52 = vector.load %arg2[%c0_53, %c0_54] : memref<256x16xf32, #tpu.memory_space<vmem>>, vector<256x16xf32>
    %53 = vector.extract_strided_slice %3 {offsets = [128, 0], sizes = [16, 256], strides = [1, 1]} : vector<192x256xf32> to vector<16x256xf32>
    %cst_55 = arith.constant dense<0.000000e+00> : vector<256x256xf32>
    %54 = tpu.matmul %52, %53, %cst_55 {dimension_numbers = #tpu.dot_dimension_numbers<[1], [0], [0], [1], [0, 0, 1, 1], [], []>} : vector<256x16xf32>, vector<16x256xf32>, vector<256x256xf32> -> vector<256x256xf32>
    %c0_56 = arith.constant 0 : index
    %c8 = arith.constant 8 : index
    %c0_57 = arith.constant 0 : index
    %c0_58 = arith.constant 0 : index
    %55 = vector.load %arg4[%c0_56, %c8, %c0_57, %c0_58] : memref<1x12x256x256xf32, #tpu.memory_space<vmem>>, vector<1x1x256x256xf32>
    %56 = vector.shape_cast %55 : vector<1x1x256x256xf32> to vector<256x256xf32>
    %57 = vector.shape_cast %54 : vector<256x256xf32> to vector<1x1x256x256xf32>
    tpu.vector_store %arg4[%c0_56, %c8, %c0_57, %c0_58], %57 {strides = array<i32>} : memref<1x12x256x256xf32, #tpu.memory_space<vmem>>, vector<1x1x256x256xf32>,
    %c0_59 = arith.constant 0 : index
    %c0_60 = arith.constant 0 : index
    %58 = vector.load %arg2[%c0_59, %c0_60] : memref<256x16xf32, #tpu.memory_space<vmem>>, vector<256x16xf32>
    %59 = vector.extract_strided_slice %3 {offsets = [144, 0], sizes = [16, 256], strides = [1, 1]} : vector<192x256xf32> to vector<16x256xf32>
    %cst_61 = arith.constant dense<0.000000e+00> : vector<256x256xf32>
    %60 = tpu.matmul %58, %59, %cst_61 {dimension_numbers = #tpu.dot_dimension_numbers<[1], [0], [0], [1], [0, 0, 1, 1], [], []>} : vector<256x16xf32>, vector<16x256xf32>, vector<256x256xf32> -> vector<256x256xf32>
    %c0_62 = arith.constant 0 : index
    %c9 = arith.constant 9 : index
    %c0_63 = arith.constant 0 : index
    %c0_64 = arith.constant 0 : index
    %61 = vector.load %arg4[%c0_62, %c9, %c0_63, %c0_64] : memref<1x12x256x256xf32, #tpu.memory_space<vmem>>, vector<1x1x256x256xf32>
    %62 = vector.shape_cast %61 : vector<1x1x256x256xf32> to vector<256x256xf32>
    %63 = vector.shape_cast %60 : vector<256x256xf32> to vector<1x1x256x256xf32>
    tpu.vector_store %arg4[%c0_62, %c9, %c0_63, %c0_64], %63 {strides = array<i32>} : memref<1x12x256x256xf32, #tpu.memory_space<vmem>>, vector<1x1x256x256xf32>,
    %c0_65 = arith.constant 0 : index
    %c0_66 = arith.constant 0 : index
    %64 = vector.load %arg2[%c0_65, %c0_66] : memref<256x16xf32, #tpu.memory_space<vmem>>, vector<256x16xf32>
    %65 = vector.extract_strided_slice %3 {offsets = [160, 0], sizes = [16, 256], strides = [1, 1]} : vector<192x256xf32> to vector<16x256xf32>
    %cst_67 = arith.constant dense<0.000000e+00> : vector<256x256xf32>
    %66 = tpu.matmul %64, %65, %cst_67 {dimension_numbers = #tpu.dot_dimension_numbers<[1], [0], [0], [1], [0, 0, 1, 1], [], []>} : vector<256x16xf32>, vector<16x256xf32>, vector<256x256xf32> -> vector<256x256xf32>
    %c0_68 = arith.constant 0 : index
    %c10 = arith.constant 10 : index
    %c0_69 = arith.constant 0 : index
    %c0_70 = arith.constant 0 : index
    %67 = vector.load %arg4[%c0_68, %c10, %c0_69, %c0_70] : memref<1x12x256x256xf32, #tpu.memory_space<vmem>>, vector<1x1x256x256xf32>
    %68 = vector.shape_cast %67 : vector<1x1x256x256xf32> to vector<256x256xf32>
    %69 = vector.shape_cast %66 : vector<256x256xf32> to vector<1x1x256x256xf32>
    tpu.vector_store %arg4[%c0_68, %c10, %c0_69, %c0_70], %69 {strides = array<i32>} : memref<1x12x256x256xf32, #tpu.memory_space<vmem>>, vector<1x1x256x256xf32>,
    %c0_71 = arith.constant 0 : index
    %c0_72 = arith.constant 0 : index
    %70 = vector.load %arg2[%c0_71, %c0_72] : memref<256x16xf32, #tpu.memory_space<vmem>>, vector<256x16xf32>
    %71 = vector.extract_strided_slice %3 {offsets = [176, 0], sizes = [16, 256], strides = [1, 1]} : vector<192x256xf32> to vector<16x256xf32>
    %cst_73 = arith.constant dense<0.000000e+00> : vector<256x256xf32>
    %72 = tpu.matmul %70, %71, %cst_73 {dimension_numbers = #tpu.dot_dimension_numbers<[1], [0], [0], [1], [0, 0, 1, 1], [], []>} : vector<256x16xf32>, vector<16x256xf32>, vector<256x256xf32> -> vector<256x256xf32>
    %c0_74 = arith.constant 0 : index
    %c11 = arith.constant 11 : index
    %c0_75 = arith.constant 0 : index
    %c0_76 = arith.constant 0 : index
    %73 = vector.load %arg4[%c0_74, %c11, %c0_75, %c0_76] : memref<1x12x256x256xf32, #tpu.memory_space<vmem>>, vector<1x1x256x256xf32>
    %74 = vector.shape_cast %73 : vector<1x1x256x256xf32> to vector<256x256xf32>
    %75 = vector.shape_cast %72 : vector<256x256xf32> to vector<1x1x256x256xf32>
    tpu.vector_store %arg4[%c0_74, %c11, %c0_75, %c0_76], %75 {strides = array<i32>} : memref<1x12x256x256xf32, #tpu.memory_space<vmem>>, vector<1x1x256x256xf32>,
    return
  }
  func.func @transform_0(%arg0: i32) -> (i32, i32, i32) {
    %c0_i32 = arith.constant 0 : i32
    %c0_i32_0 = arith.constant 0 : i32
    %c0_i32_1 = arith.constant 0 : i32
    return %arg0, %c0_i32, %c0_i32_0 : i32, i32, i32
  }
  func.func @transform_1(%arg0: i32) -> (i32, i32) {
    %c0_i32 = arith.constant 0 : i32
    %c0_i32_0 = arith.constant 0 : i32
    %c0_i32_1 = arith.constant 0 : i32
    return %c0_i32, %c0_i32_0 : i32, i32
  }
  func.func @transform_2(%arg0: i32) -> (i32, i32) {
    %c0_i32 = arith.constant 0 : i32
    %c0_i32_0 = arith.constant 0 : i32
    %c0_i32_1 = arith.constant 0 : i32
    return %c0_i32, %c0_i32_0 : i32, i32
  }
  func.func @transform_3(%arg0: i32) -> (i32, i32, i32, i32) {
    %c0_i32 = arith.constant 0 : i32
    %c0_i32_0 = arith.constant 0 : i32
    %c0_i32_1 = arith.constant 0 : i32
    %c0_i32_2 = arith.constant 0 : i32
    return %arg0, %c0_i32, %c0_i32_0, %c0_i32_1 : i32, i32, i32, i32
  }
}

</mosaic_0001>

<bundles_post_ra>
// kernel: dilate_net_forward.2
= control target key start
LH: loop header
LB: loop body
LE: loop exit
PB: predicated region body
PF: predicated region fallthrough
CT: control target
= control target key end

     0   :  { %s1083_s18 = smov 0   ;;  %s1252_s0 = inlined_call_operand.vmem [shape: f32[2,3,72,256], index: 0, kind: input, shape index: {}]   ;;  %s1253_s1 = inlined_call_operand.vmem [shape: f32[3,12,72], index: 1, kind: input, shape index: {}]   ;;  %s1254_s2 = inlined_call_operand.vmem [shape: f32[3,12,1], index: 2, kind: input, shape index: {}]   ;;  %s1255_s3 = inlined_call_operand.vmem [shape: f32[3,12,12], index: 3, kind: input, shape index: {}]   ;;  %s1256_s4 = inlined_call_operand.vmem [shape: f32[12,1], index: 4, kind: input, shape index: {}]   ;;  %s1257_s5 = inlined_call_operand.vmem [shape: f32[2,12,256], index: 5, kind: output, shape index: {}]  }
   0x1 LB: > { %s949_s19 = sadd.s32 4294967295, %s1049_s18   ;;  %p953_p0 = scmp.ge.s32.totalorder %s1049_s18, 1  ;;  %s1049_s18 = sphi %s1083_s18, %s15_s18  }
   0x2   : > { %p187_p1 = scmp.lt.s32.totalorder %s1049_s18, 3 }
   0x4   : > { %p188_p2 = pnand %p953_p0, %p187_p1 }
   0x5   : > { %p215_p3 = scmp.lt.s32.totalorder (!%p188_p2), %s949_s19, 1 }
   0x6   : > { %191 = sbr.rel (%p188_p2) target bundleno = 462 (0x1ce), region = 40 }
   0xb   : > { %v1051_v0 = vmov 0.0   ;;  %s1259_s19 = smov (!%p215_p3, %s949_s19), 1  ;;  %v980_v1 = vld [vmem:[%s1254_s2 + $0x18] sm:$0xf]  ;;  %v246_v2 = vld [vmem:[%s1254_s2 + $0x8] sm:$0xf] }
   0xc   : > { %328 = vmatprep.mubr.f32.mxu0 %v1051_v0  ;;  %452 = vmatprep.mubr.f32.mxu1 %v1051_v0  ;;  %v1052_v3 = vmov 0   ;;  %s1030_s24 = smul.u32 432, %s1259_s19  ;;  %v225_v40 = vld [vmem:[%s1253_s1] sm:$0xff]  ;;  %vm257_vm0 = vcmask 588800   ;;  %v959_v41 = vld [vmem:[%s1253_s1 + $0x10] sm:$0xff]  ;;  %vm479_vm1 = vcmask 1043456  }
   0xd   : > { %1041 = vset.pattern.permute.xlu0 %v1052_v3  ;;  %1042 = vset.pattern.permute.xlu1 %v1052_v3  ;;  %v979_v45 = vld [vmem:[%s1254_s2 + $0x10] sm:$0xff]  ;;  %v960_v47 = vld [vmem:[%s1253_s1 + $0x18] sm:$0xf]  ;;  %v226_v49 = vld [vmem:[%s1253_s1 + $0x8] sm:$0xf]  ;;  %vm472_vm2 = vcmask 97280  }
   0xe   : > { %379 = vperm.xlu0 %1041, %v980_v1   ;;  %254 = vperm.xlu1 %1042, %v246_v2   ;;  %s1105_s27 = scalar_lea.vmem %s1252_s0, %s1030_s24  ;;  %v245_v52 = vld [vmem:[%s1254_s2] sm:$0xff]  ;;  %v1014_v54 = vld [vmem:[%s1254_s2 + $0x28] sm:$0xf]  ;;  %s1025_s16 = sshll.u32 %s1259_s19, 5 }
   0xf   : > { %v244_v4 = vld [vmem:[%s1105_s27 + $0x88] sm:$0xff]  ;;  %v978_v5 = vld [vmem:[%s1105_s27 + $0x118] sm:$0xff]  ;;  %v243_v6 = vld [vmem:[%s1105_s27 + $0x80] sm:$0xff]  ;;  %s224_s21 = scalar_lea.vmem %s1257_s5, %s1025_s16 }
  0x10   : > { %278 = vmatprep.subr.mxu0 %v244_v4  ;;  %402 = vmatprep.subr.mxu1 %v978_v5  ;;  %v977_v7 = vld [vmem:[%s1105_s27 + $0x110] sm:$0xff]  ;;  %v242_v8 = vld [vmem:[%s1105_s27 + $0x78] sm:$0xff]  ;;  %v976_v9 = vld [vmem:[%s1105_s27 + $0x108] sm:$0xff] }
  0x11   : > { %279 = vmatpush1.msra.mxu0 %v243_v6  ;;  %403 = vmatpush1.msra.mxu1 %v977_v7  ;;  %v241_v10 = vld [vmem:[%s1105_s27 + $0x70] sm:$0xff]  ;;  %v975_v11 = vld [vmem:[%s1105_s27 + $0x100] sm:$0xff]  ;;  %v240_v12 = vld [vmem:[%s1105_s27 + $0x68] sm:$0xff] }
  0x12   : > { %280 = vmatprep.subr.mxu0 %v242_v8  ;;  %404 = vmatprep.subr.mxu1 %v976_v9  ;;  %v974_v13 = vld [vmem:[%s1105_s27 + $0xf8] sm:$0xff]  ;;  %v239_v14 = vld [vmem:[%s1105_s27 + $0x60] sm:$0xff]  ;;  %v973_v15 = vld [vmem:[%s1105_s27 + $0xf0] sm:$0xff] }
  0x13   : > { %281 = vmatpush1.msra.mxu0 %v241_v10  ;;  %405 = vmatpush1.msra.mxu1 %v975_v11  ;;  %v238_v16 = vld [vmem:[%s1105_s27 + $0x58] sm:$0xff]  ;;  %v972_v17 = vld [vmem:[%s1105_s27 + $0xe8] sm:$0xff]  ;;  %v237_v18 = vld [vmem:[%s1105_s27 + $0x50] sm:$0xff] }
  0x14   : > { %282 = vmatprep.subr.mxu0 %v240_v12  ;;  %406 = vmatprep.subr.mxu1 %v974_v13  ;;  %v971_v19 = vld [vmem:[%s1105_s27 + $0xe0] sm:$0xff]  ;;  %v236_v20 = vld [vmem:[%s1105_s27 + $0x48] sm:$0xff]  ;;  %v970_v21 = vld [vmem:[%s1105_s27 + $0xd8] sm:$0xff] }
  0x15   : > { %283 = vmatpush1.msra.mxu0 %v239_v14  ;;  %407 = vmatpush1.msra.mxu1 %v973_v15  ;;  %v235_v22 = vld [vmem:[%s1105_s27 + $0x40] sm:$0xff]  ;;  %v969_v23 = vld [vmem:[%s1105_s27 + $0xd0] sm:$0xff]  ;;  %v234_v24 = vld [vmem:[%s1105_s27 + $0x38] sm:$0xff] }
  0x16   : > { %284 = vmatprep.subr.mxu0 %v238_v16  ;;  %408 = vmatprep.subr.mxu1 %v972_v17  ;;  %v968_v25 = vld [vmem:[%s1105_s27 + $0xc8] sm:$0xff]  ;;  %v233_v26 = vld [vmem:[%s1105_s27 + $0x30] sm:$0xff]  ;;  %v967_v27 = vld [vmem:[%s1105_s27 + $0xc0] sm:$0xff] }
  0x17   : > { %285 = vmatpush1.msra.mxu0 %v237_v18  ;;  %409 = vmatpush1.msra.mxu1 %v971_v19  ;;  %v232_v28 = vld [vmem:[%s1105_s27 + $0x28] sm:$0xff]  ;;  %v966_v29 = vld [vmem:[%s1105_s27 + $0xb8] sm:$0xff]  ;;  %v231_v30 = vld [vmem:[%s1105_s27 + $0x20] sm:$0xff] }
  0x18   : > { %286 = vmatprep.subr.mxu0 %v236_v20  ;;  %410 = vmatprep.subr.mxu1 %v970_v21  ;;  %v965_v31 = vld [vmem:[%s1105_s27 + $0xb0] sm:$0xff]  ;;  %v230_v32 = vld [vmem:[%s1105_s27 + $0x18] sm:$0xff]  ;;  %v964_v33 = vld [vmem:[%s1105_s27 + $0xa8] sm:$0xff] }
  0x19   : > { %287 = vmatpush1.msra.mxu0 %v235_v22  ;;  %411 = vmatpush1.msra.mxu1 %v969_v23  ;;  %v229_v34 = vld [vmem:[%s1105_s27 + $0x10] sm:$0xff]  ;;  %v963_v35 = vld [vmem:[%s1105_s27 + $0xa0] sm:$0xff]  ;;  %v228_v36 = vld [vmem:[%s1105_s27 + $0x8] sm:$0xff] }
  0x1a   : > { %288 = vmatprep.subr.mxu0 %v234_v24  ;;  %412 = vmatprep.subr.mxu1 %v968_v25  ;;  %v962_v37 = vld [vmem:[%s1105_s27 + $0x98] sm:$0xff]  ;;  %v227_v38 = vld [vmem:[%s1105_s27] sm:$0xff]  ;;  %v961_v39 = vld [vmem:[%s1105_s27 + $0x90] sm:$0xff] }
  0x1b   : > { %289 = vmatpush1.msra.mxu0 %v233_v26  ;;  %413 = vmatpush1.msra.mxu1 %v967_v27  ;;  %v1012_v42 = vld [vmem:[%s1105_s27 + $0x1a8] sm:$0xff]  ;;  %v1011_v43 = vld [vmem:[%s1105_s27 + $0x1a0] sm:$0xff]  ;;  %v1010_v44 = vld [vmem:[%s1105_s27 + $0x198] sm:$0xff] }
  0x1c   : > { %290 = vmatprep.subr.mxu0 %v232_v28  ;;  %414 = vmatprep.subr.mxu1 %v966_v29  ;;  %v1009_v46 = vld [vmem:[%s1105_s27 + $0x190] sm:$0xff]  ;;  %v1008_v48 = vld [vmem:[%s1105_s27 + $0x188] sm:$0xff]  ;;  %v1007_v50 = vld [vmem:[%s1105_s27 + $0x180] sm:$0xff] }
  0x1d   : > { %291 = vmatpush1.msra.mxu0 %v231_v30  ;;  %415 = vmatpush1.msra.mxu1 %v965_v31  ;;  %v1006_v51 = vld [vmem:[%s1105_s27 + $0x178] sm:$0xff]  ;;  %v1005_v53 = vld [vmem:[%s1105_s27 + $0x170] sm:$0xff]  ;;  %v1004_v55 = vld [vmem:[%s1105_s27 + $0x168] sm:$0xff] }
  0x1e   : > { %292 = vmatprep.subr.mxu0 %v230_v32  ;;  %416 = vmatprep.subr.mxu1 %v964_v33  ;;  %v1003_v56 = vld [vmem:[%s1105_s27 + $0x160] sm:$0xff]  ;;  %v1002_v57 = vld [vmem:[%s1105_s27 + $0x158] sm:$0xff]  ;;  %v1001_v59 = vld [vmem:[%s1105_s27 + $0x150] sm:$0xff] }
  0x1f   : > { %293 = vmatpush1.msra.mxu0 %v229_v34  ;;  %417 = vmatpush1.msra.mxu1 %v963_v35  ;;  %v1013_v58 = vld [vmem:[%s1254_s2 + $0x20] sm:$0xff]  ;;  %v1000_v61 = vld [vmem:[%s1105_s27 + $0x148] sm:$0xff]  ;;  %v998_v63 = vld [vmem:[%s1105_s27 + $0x138] sm:$0xff] }
  0x20   : > { %294 = vmatprep.subr.mxu0 %v228_v36  ;;  %418 = vmatprep.subr.mxu1 %v962_v37  ;;  %v870_v60 = vld [vmem:[%s1256_s4] sm:$0xff]  ;;  %v871_v1 = vld [vmem:[%s1256_s4 + $0x8] sm:$0xf]  ;;  %v997_v2 = vld [vmem:[%s1105_s27 + $0x130] sm:$0xff] }
  0x21   : > { %295 = vmatpush1.msra.mxu0 %v227_v38  ;;  %419 = vmatpush1.msra.mxu1 %v961_v39  ;;  %v999_v62 = vld [vmem:[%s1105_s27 + $0x140] sm:$0xff]  ;;  %v996_v3 = vld [vmem:[%s1105_s27 + $0x128] sm:$0xff]  ;;  %v983_v33 = vld [vmem:[%s1255_s3 + $0x10] sm:$0xff] }
  0x22   : > { %957 = vmatmul.mubr.msk.f32.vlgmr.msra.gmra.mxu0 %vm257_vm0, %v225_v40  ;;  %981 = vmatmul.mubr.msk.f32.vlgmr.msra.gmra.mxu1 %vm257_vm0, %v959_v41  ;;  %v995_v4 = vld [vmem:[%s1105_s27 + $0x120] sm:$0xff]  ;;  %v994_v6 = vld [vmem:[%s1253_s1 + $0x28] sm:$0xf]  ;;  %v984_v36 = vld [vmem:[%s1255_s3 + $0x18] sm:$0xf] }
  0x23   : > { %707 = vmatprep.subr.mxu0 %v1012_v42  ;;  %458 = vmatprep.mubr.f32.mxu1 %v1051_v0  ;;  %v993_v5 = vld [vmem:[%s1253_s1 + $0x20] sm:$0xff]  ;;  %v346_v42 = vld [vmem:[%s1255_s3 + $0x8] sm:$0xf] }
  0x24   : > { %708 = vmatpush1.msra.mxu0 %v1011_v43  ;;  %334 = vmatprep.mubr.f32.mxu0 %v1051_v0  ;;  %v345_v38 = vld [vmem:[%s1255_s3] sm:$0xff] }
  0x25   : > { %709 = vmatprep.subr.mxu0 %v1010_v44  ;;  %374 = vperm.xlu0 %1041, %v979_v45  }
  0x26   : > { %710 = vmatpush1.msra.mxu0 %v1009_v46  ;;  %982 = vmatmul.mubr.msk.f32.gmra.mxu1 %vm257_vm0, %v960_v47 }
  0x27   : > { %711 = vmatprep.subr.mxu0 %v1008_v48  ;;  %958 = vmatmul.mubr.msk.f32.gmra.mxu0 %vm257_vm0, %v226_v49 }
  0x28   : > { %712 = vmatpush1.msra.mxu0 %v1007_v50  ;;  %757 = vmatprep.mubr.f32.mxu0 %v1051_v0 }
  0x29   : > { %713 = vmatprep.subr.mxu0 %v1006_v51  ;;  %249 = vperm.xlu1 %1042, %v245_v52  }
  0x2a   : > { %714 = vmatpush1.msra.mxu0 %v1005_v53  ;;  %684 = vperm.xlu0 %1041, %v1014_v54   ;;  %v1017_v53 = vld [vmem:[%s1255_s3 + $0x20] sm:$0xff]  ;;  %v1018_v54 = vld [vmem:[%s1255_s3 + $0x28] sm:$0xf] }
  0x2b   : > { %715 = vmatprep.subr.mxu0 %v1004_v55  ;;  %550 = vmatprep.mubr.f32.mxu1 %v1051_v0 }
  0x2c   : > { %716 = vmatpush1.msra.mxu0 %v1003_v56 }
  0x2d   : > { %717 = vmatprep.subr.mxu0 %v1002_v57  ;;  %679 = vperm.xlu1 %1042, %v1013_v58  }
  0x2e   : > { %718 = vmatpush1.msra.mxu0 %v1001_v59  ;;  %874 = vperm.xlu0 %1041, %v870_v60  }
  0x2f   : > { %719 = vmatprep.subr.mxu0 %v1000_v61 }
  0x30   : > { %720 = vmatpush1.msra.mxu0 %v999_v62 }
  0x31   : > { %721 = vmatprep.subr.mxu0 %v998_v63  ;;  %879 = vperm.xlu1 %1042, %v871_v1  }
  0x32   : > { %722 = vmatpush1.msra.mxu0 %v997_v2 }
  0x33   : > { %723 = vmatprep.subr.mxu0 %v996_v3 }
  0x34   : > { %724 = vmatpush1.msra.mxu0 %v995_v4 }
  0x35   : > { %1015 = vmatmul.mubr.msk.f32.vlgmr.msra.gmra.mxu0 %vm257_vm0, %v993_v5 }
  0x36   : > { %763 = vmatprep.mubr.f32.mxu0 %v1051_v0 }
  0x39   : > { %1016 = vmatmul.mubr.msk.f32.gmra.mxu0 %vm257_vm0, %v994_v6 }
  0x3a   : > { %853 = vmatprep.mubr.f32.mxu0 %v1051_v0 }
  0x89   : > { %v380_v7 = vpop.permute.xlu0 %379  ;;  %v255_v10 = vpop.permute.xlu1 %254 }
  0xa0   : > { %v375_v16 = vpop.permute.xlu0 %374 }
  0xa4   : > { %v250_v22 = vpop.permute.xlu1 %249 }
  0xa5   : > { %v685_v41 = vpop.permute.xlu0 %684 }
  0xa8   : > { %v680_v43 = vpop.permute.xlu1 %679 }
  0xa9   : > { %v875_v3 = vpop.permute.xlu0 %874 }
  0xac   : > { %v880_v4 = vpop.permute.xlu1 %879 }
  0xe2   : > { %v330_v8 = vpop.f32.mrf.mxu0  ;;  %v454_v9 = vpop.f32.mrf.mxu1 }
  0xe3   : > { %v455_v21 = vadd.f32 %v454_v9, %v375_v16  ;;  %v331_v31 = vadd.f32 %v330_v8, %v250_v22 }
  0xe4   : > { %v456_v11 = vpop.f32.mrf.mxu1  ;;  %v332_v12 = vpop.f32.mrf.mxu0 }
  0xe5   : > { %v457_v18 = vadd.f32 %v456_v11, %v375_v16  ;;  %v333_v27 = vadd.f32 %v332_v12, %v250_v22  ;;  %v465_v30 = vmax.f32 %v455_v21, 0.0  ;;  %v341_v35 = vmax.f32 %v331_v31, 0.0 }
  0xe6   : > { %v460_v13 = vpop.f32.mrf.mxu1 }
  0xe7   : > { %v461_v14 = vadd.f32 %v460_v13, %v380_v7  ;;  %v336_v15 = vpop.f32.mrf.mxu0  ;;  %v466_v28 = vmax.f32 %v457_v18, 0.0  ;;  %v342_v34 = vmax.f32 %v333_v27, 0.0 }
  0xe8   : > { %v462_v17 = vpop.f32.mrf.mxu1  ;;  %v337_v24 = vadd.f32 %v336_v15, %v255_v10 }
  0xe9   : > { %v463_v19 = vadd.f32 %v462_v17, %v380_v7  ;;  %v338_v20 = vpop.f32.mrf.mxu0  ;;  %v467_v23 = vmax.f32 %v461_v14, 0.0 }
  0xea   : > { %v339_v25 = vadd.f32 %v338_v20, %v255_v10  ;;  %v343_v32 = vmax.f32 %v337_v24, 0.0 }
  0xeb   : > { %v468_v26 = vmax.f32 %v463_v19, 0.0 }
  0xec   : > { %v344_v29 = vmax.f32 %v339_v25, 0.0 }
  0xed   : > { %985 = vmatprep.subr.msk.mxu1 %vm479_vm1, %v468_v26 }
  0xee   : > { %986 = vmatpush1.msk.msra.mxu1 %vm479_vm1, %v467_v23 }
  0xef   : > { %516 = vmatprep.subr.mxu1 %v466_v28 }
  0xf0   : > { %517 = vmatpush1.msra.mxu1 %v465_v30 }
  0xf1   : > { %987 = vmatmul.mubr.msk.f32.vlgmr.msra.gmra.mxu1 %vm472_vm2, %v983_v33  ;;  %989 = vmatprep.subr.msk.mxu1 %vm479_vm1, %v344_v29 }
  0xf2   : > { %990 = vmatpush1.msk.msra.mxu1 %vm479_vm1, %v343_v32  ;;  %556 = vmatprep.mubr.f32.mxu1 %v1051_v0 }
  0xf3   : > { %605 = vmatprep.subr.mxu1 %v342_v34 }
  0xf4   : > { %606 = vmatpush1.msra.mxu1 %v341_v35 }
  0xf5   : > { %v759_v37 = vpop.f32.mrf.mxu0  ;;  %988 = vmatmul.mubr.msk.f32.gmra.mxu1 %vm472_vm2, %v984_v36 }
  0xf6   : > { %639 = vmatprep.mubr.f32.mxu1 %v1051_v0  ;;  %v760_v48 = vadd.f32 %v759_v37, %v680_v43 }
  0xf7   : > { %v761_v39 = vpop.f32.mrf.mxu0 }
  0xf8   : > { %v762_v46 = vadd.f32 %v761_v39, %v680_v43  ;;  %v770_v52 = vmax.f32 %v760_v48, 0.0 }
  0xf9   : > { %v765_v40 = vpop.f32.mrf.mxu0  ;;  %991 = vmatmul.mubr.msk.f32.vlgmr.msra.gmra.mxu1 %vm472_vm2, %v345_v38 }
  0xfa   : > { %645 = vmatprep.mubr.f32.mxu1 %v1051_v0  ;;  %v766_v44 = vadd.f32 %v765_v40, %v685_v41  ;;  %v771_v51 = vmax.f32 %v762_v46, 0.0 }
  0xfb   : > { %v767_v45 = vpop.f32.mrf.mxu0 }
  0xfc   : > { %v768_v47 = vadd.f32 %v767_v45, %v685_v41  ;;  %v772_v50 = vmax.f32 %v766_v44, 0.0 }
  0xfd   : > { %992 = vmatmul.mubr.msk.f32.gmra.mxu1 %vm472_vm2, %v346_v42 }
  0xfe   : > { %v773_v49 = vmax.f32 %v768_v47, 0.0  ;;  %859 = vmatprep.mubr.f32.mxu1 %v1051_v0 }
 0x100   : > { %1019 = vmatprep.subr.msk.mxu0 %vm479_vm1, %v773_v49  ;;  %1026 = vmatprep.subr.msk.mxu1 %vm479_vm1, %v773_v49 }
 0x101   : > { %1020 = vmatpush1.msk.msra.mxu0 %vm479_vm1, %v772_v50  ;;  %1028 = vmatpush1.msk.msra.mxu1 %vm479_vm1, %v772_v50 }
 0x102   : > { %819 = vmatprep.subr.mxu0 %v771_v51  ;;  %1027 = vmatprep.subr.mxu1 %v771_v51 }
 0x103   : > { %820 = vmatpush1.msra.mxu0 %v770_v52  ;;  %1029 = vmatpush1.msra.mxu1 %v770_v52 }
 0x104   : > { %1021 = vmatmul.mubr.msk.f32.vlgmr.msra.gmra.mxu0 %vm472_vm2, %v1017_v53  ;;  %1022 = vmatmul.mubr.msk.f32.vlgmr.msra.gmra.mxu1 %vm472_vm2, %v1018_v54 }
 0x1b1   : > { %v552_v0 = vpop.f32.mrf.mxu1 }
 0x1b3   : > { %v554_v55 = vpop.f32.mrf.mxu1 }
 0x1b5   : > { %v558_v56 = vpop.f32.mrf.mxu1 }
 0x1b7   : > { %v560_v57 = vpop.f32.mrf.mxu1 }
 0x1b9   : > { %v641_v58 = vpop.f32.mrf.mxu1 }
 0x1ba   : > { %v642_v62 = vadd.f32 %v641_v58, %v552_v0 }
 0x1bb   : > { %v643_v59 = vpop.f32.mrf.mxu1 }
 0x1bc   : > { %v644_v5 = vadd.f32 %v643_v59, %v554_v55 }
 0x1bd   : > { %v647_v60 = vpop.f32.mrf.mxu1 }
 0x1be   : > { %v648_v63 = vadd.f32 %v647_v60, %v558_v56 }
 0x1bf   : > { %v649_v61 = vpop.f32.mrf.mxu1 }
 0x1c0   : > { %v650_v6 = vadd.f32 %v649_v61, %v560_v57 }
 0x1c4   : > { %v855_v1 = vpop.f32.mrf.mxu0  ;;  %v861_v2 = vpop.f32.mrf.mxu1 }
 0x1c5   : > { %v866_v7 = vadd.f32 %v855_v1, %v642_v62  ;;  %v868_v8 = vadd.f32 %v861_v2, %v648_v63 }
 0x1c6   : > { %v857_v9 = vpop.f32.mrf.mxu0  ;;  %v863_v10 = vpop.f32.mrf.mxu1 }
 0x1c7   : > { %v882_v11 = vadd.f32 %v875_v3, %v866_v7  ;;  %v884_v12 = vadd.f32 %v880_v4, %v868_v8  ;;  %v867_v13 = vadd.f32 %v857_v9, %v644_v5  ;;  %v869_v14 = vadd.f32 %v863_v10, %v650_v6 }
 0x1c9   : > { %v886_v15 = vmax.f32 %v882_v11, 0.0  ;;  %v888_v16 = vmax.f32 %v884_v12, 0.0  ;;  %v883_v17 = vadd.f32 %v875_v3, %v867_v13  ;;  %v885_v18 = vadd.f32 %v880_v4, %v869_v14 }
 0x1cb   : > { %890 = vst [vmem:[%s224_s21] sm:$0xff] %v886_v15  ;;  %892 = vst [vmem:[%s224_s21 + $0x10] sm:$0xf] %v888_v16  ;;  %v887_v19 = vmax.f32 %v883_v17, 0.0  ;;  %v889_v20 = vmax.f32 %v885_v18, 0.0 }
 0x1cd   : > { %891 = vst [vmem:[%s224_s21 + $0x8] sm:$0xff] %v887_v19  ;;  %893 = vst [vmem:[%s224_s21 + $0x18] sm:$0xf] %v889_v20 }
 0x1ce PF: > { %s15_s18 = sadd.s32 1, %s1049_s18  }
 0x1cf   : > { %p12_p4 = scmp.ge.s32.totalorder %s15_s18, 4  }
 0x1d1   :  { %14 = sbr.rel (!%p12_p4) target bundleno = 1 (0x1), region = 78 }

// kernel: dilate_net_forward.3
= control target key start
LH: loop header
LB: loop body
LE: loop exit
PB: predicated region body
PF: predicated region fallthrough
CT: control target
= control target key end

     0   :  { %8 = vsyncpa [#allocation3], 0  ;;  %s9885_s0 = inlined_call_operand.vmem [shape: f32[2,192,16], index: 0, kind: input, shape index: {}]   ;;  %s9886_s1 = inlined_call_operand.vmem [shape: f32[256,16], index: 1, kind: input, shape index: {}]   ;;  %s9887_s2 = inlined_call_operand.vmem [shape: f32[16,256], index: 2, kind: input, shape index: {}]   ;;  %s9888_s3 = inlined_call_operand.hbm [shape: f32[2,12,256,256], index: 3, kind: output, shape index: {}]  }
   0x1   :  { %10 = vsyncpa [#allocation3 + $0x1], 0  ;;  %s7209_s12 = smov 0   ;;  %s7211_s13 = smov 0  }
   0x2   :  { %s7213_s14 = smov 0   ;;  %s7215_s15 = smov 0  }
   0x3 LB: > { %s7230_s16 = sadd.s32 4294967295, %s7183_s15   ;;  %s5954_s17 = sadd.s32 4294967294, %s7183_s15   ;;  %s7183_s15 = sphi %s7215_s15, %s9894_s15   ;;  %s7179_s14 = sphi %s7213_s14, %s9893_s14   ;;  %s7175_s13 = sphi %s7211_s13, %s9892_s13   ;;  %s7171_s12 = sphi %s7209_s12, %s9891_s12  }
   0x4   : > { %s7234_s18 = sadd.s32 1, %s7183_s15   ;;  %s91_s19 = sadd.s32 1, %s7179_s14 }
   0x5   : > { %s88_s20 = ssub.s32 %s7183_s15, %s7234_s18  ;;  %p101_p0 = scmp.ne.s32.totalorder %s7179_s14, %s7175_s13 }
   0x6   : > { %p89_p1 = scmp.eq.s32.totalorder %s88_s20, 0  ;;  %p102_p2 = scmp.eq.s32.totalorder %s7230_s16, 1 }
   0x7   : > { %p107_p3 = scmp.ne.s32.totalorder %s7175_s13, %s7171_s12  ;;  %p108_p4 = scmp.eq.s32.totalorder %s5954_s17, 1 }
   0x8   : > { %s7245_s21 = scalar_select %p89_p1, %s7179_s14, %s91_s19  }
   0x9   : > { %p7247_p5 = por %p102_p2, %p101_p0  ;;  %p7251_p6 = por %p108_p4, %p107_p3 }
   0xa   : > { %p5957_p7 = scmp.ge.s32.totalorder %s7183_s15, 1  ;;  %p140_p8 = scmp.lt.s32.totalorder %s7183_s15, 3 }
   0xc   : > { %p141_p9 = pnand %p5957_p7, %p140_p8 }
   0xd   : > { %p164_p10 = scmp.lt.s32.totalorder (!%p141_p9), %s7230_s16, 1  ;;  %s161_s29 = sand.u32 (!%p141_p9), 1, %s7175_s13  }
   0xe   : > { %144 = sbr.rel (%p141_p9) target bundleno = 1209 (0x4b9), region = 32  ;;  %s7186_s19 = smov (!%p141_p9), [#allocation2]  }
   0xf   : > { %s7078_s30 = smul.u32 (!%p141_p9), 6144, %s161_s29  ;;  %s7127_s20 = sshll.u32 (!%p141_p9), %s7186_s19, 4  ;;  %s7128_s20 = int_to_ptr.vmem [resolvable:$false] %s7127_s20 }
  0x10   : > { %s7080_s7 = smul.u32 (!%p141_p9), 98304, %s7230_s16  ;;  %s7129_s24 = scalar_lea.vmem (!%p141_p9), %s7128_s20, 196608 }
  0x11   : > { %s7863_s4 = scalar_lea.vmem (!%p141_p9), [#allocation2], %s7078_s30 }
  0x12   : > { %s5892_s8 = sshll.u32 (!%p141_p9), %s7863_s4, 4  ;;  %s9837_s11 = scalar_lea.hbm (!%p141_p9), %s9888_s3, %s7080_s7  ;;  %s9840_s8 = int_to_ptr.vmem [resolvable:$true] %s5892_s8 }
  0x13   : > { %v196_v0 = vld [vmem:[%s9887_s2 + $0x18] sm:$0xff]  ;;  %v195_v1 = vld [vmem:[%s9887_s2 + $0x10] sm:$0xff]  ;;  %v194_v2 = vld [vmem:[%s9887_s2 + $0x8] sm:$0xff]  ;;  %v7185_v4 = vmov 0.0   ;;  %s165_s5 = scalar_select %p164_p10, %s7230_s16, 1  ;;  %vm197_vm0 = vcmask 130048  }
  0x14   : > { %298 = vmatprep.subr.mxu0 %v196_v0  ;;  %v193_v3 = vld [vmem:[%s9887_s2] sm:$0xff]  ;;  %334 = vmatprep.mubr.f32.mxu0 %v7185_v4  ;;  %v7361_v37 = vld [vmem:[%s9886_s1 + $0x8] sm:$0xff]  ;;  %v7369_v39 = vld [vmem:[%s9886_s1 + $0x10] sm:$0xff]  ;;  %s9845_s16 = scalar_lea.sflag [#allocation3], %s161_s29  ;;  %s7123_s17 = scalar_lea.vmem %s9840_s8, 98304 }
  0x15   : > { %299 = vmatpush1.msra.mxu0 %v195_v1  ;;  %7074 = vmatprep.subr.mxu1 %v196_v0  ;;  %s7079_s6 = smul.u32 192, %s165_s5  ;;  %v7353_v34 = vld [vmem:[%s9886_s1] sm:$0xff]  ;;  %v7380_v42 = vld [vmem:[%s9886_s1 + $0x18] sm:$0xff]  ;;  %v7402_v48 = vld [vmem:[%s9886_s1 + $0x28] sm:$0xff]  ;;  %p7124_p11 = scmp.ne.s32.totalorder %s9840_s8, %s7123_s17 }
  0x16   : > { %300 = vmatprep.subr.mxu0 %v194_v2  ;;  %7076 = vmatpush1.msra.mxu1 %v195_v1  ;;  %v7391_v45 = vld [vmem:[%s9886_s1 + $0x20] sm:$0xff]  ;;  %v7413_v51 = vld [vmem:[%s9886_s1 + $0x30] sm:$0xff]  ;;  %v7428_v54 = vld [vmem:[%s9886_s1 + $0x38] sm:$0xff]  ;;  %p7130_p0 = scmp.lt.s32.totalorder %s9840_s8, %s7128_s20  ;;  %p7131_p1 = scmp.lt.s32.totalorder %s7129_s24, %s7123_s17 }
  0x17   : > { %301 = vmatpush1.msra.mxu0 %v193_v3  ;;  %7075 = vmatprep.subr.mxu1 %v194_v2  ;;  %s7276_s9 = scalar_lea.vmem %s9885_s0, %s7079_s6  ;;  %v7441_v57 = vld [vmem:[%s9886_s1 + $0x40] sm:$0xff]  ;;  %v7456_v60 = vld [vmem:[%s9886_s1 + $0x48] sm:$0xff]  ;;  %v7469_v63 = vld [vmem:[%s9886_s1 + $0x50] sm:$0xff]  ;;  %p7125_p12 = pnand %p7124_p11, %p7247_p5 }
  0x18   : > { %7077 = vmatpush1.msra.mxu1 %v193_v3  ;;  %406 = vmatprep.mubr.f32.mxu1 %v7185_v4  ;;  %v169_v5 = vld [vmem:[%s7276_s9] sm:$0xff]  ;;  %v170_v6 = vld [vmem:[%s7276_s9 + $0x8] sm:$0xff]  ;;  %v171_v9 = vld [vmem:[%s7276_s9 + $0x10] sm:$0xff]  ;;  %p7132_p2 = por %p7131_p1, %p7130_p0 }
  0x19   : > { %5959 = vmatmul.mubr.msk.f32.vlgmr.msra.gmra.mxu0 %vm197_vm0, %v169_v5  ;;  %v181_v7 = vld [vmem:[%s7276_s9 + $0x60] sm:$0xff]  ;;  %v182_v8 = vld [vmem:[%s7276_s9 + $0x68] sm:$0xff]  ;;  %v183_v10 = vld [vmem:[%s7276_s9 + $0x70] sm:$0xff]  ;;  %p7126_p13 = pneg %p7125_p12 }
  0x1a   : > { %340 = vmatprep.mubr.f32.mxu0 %v7185_v4  ;;  %5971 = vmatmul.mubr.msk.f32.vlgmr.msra.gmra.mxu1 %vm197_vm0, %v181_v7  ;;  %v172_v11 = vld [vmem:[%s7276_s9 + $0x18] sm:$0xff]  ;;  %v173_v13 = vld [vmem:[%s7276_s9 + $0x20] sm:$0xff]  ;;  %v174_v15 = vld [vmem:[%s7276_s9 + $0x28] sm:$0xff] }
  0x1b   : > { %412 = vmatprep.mubr.f32.mxu1 %v7185_v4  ;;  %v184_v12 = vld [vmem:[%s7276_s9 + $0x78] sm:$0xff]  ;;  %v185_v14 = vld [vmem:[%s7276_s9 + $0x80] sm:$0xff]  ;;  %v186_v16 = vld [vmem:[%s7276_s9 + $0x88] sm:$0xff]  ;;  %p7133_p3 = pnand %p7132_p2, %p7126_p13 }
  0x1c   : > { %v175_v17 = vld [vmem:[%s7276_s9 + $0x30] sm:$0xff]  ;;  %v176_v19 = vld [vmem:[%s7276_s9 + $0x38] sm:$0xff]  ;;  %v177_v21 = vld [vmem:[%s7276_s9 + $0x40] sm:$0xff] }
  0x1d   : > { %5960 = vmatmul.mubr.msk.f32.gmra.mxu0 %vm197_vm0, %v170_v6  ;;  %v187_v18 = vld [vmem:[%s7276_s9 + $0x90] sm:$0xff]  ;;  %v188_v20 = vld [vmem:[%s7276_s9 + $0x98] sm:$0xff]  ;;  %v189_v22 = vld [vmem:[%s7276_s9 + $0xa0] sm:$0xff] }
  0x1e   : > { %346 = vmatprep.mubr.f32.mxu0 %v7185_v4  ;;  %5972 = vmatmul.mubr.msk.f32.gmra.mxu1 %vm197_vm0, %v182_v8  ;;  %v178_v23 = vld [vmem:[%s7276_s9 + $0x48] sm:$0xff]  ;;  %v179_v25 = vld [vmem:[%s7276_s9 + $0x50] sm:$0xff]  ;;  %v180_v26 = vld [vmem:[%s7276_s9 + $0x58] sm:$0xff] }
  0x1f   : > { %418 = vmatprep.mubr.f32.mxu1 %v7185_v4  ;;  %v190_v24 = vld [vmem:[%s7276_s9 + $0xa8] sm:$0xff]  ;;  %v191_v27 = vld [vmem:[%s7276_s9 + $0xb0] sm:$0xff]  ;;  %v192_v28 = vld [vmem:[%s7276_s9 + $0xb8] sm:$0xff] }
  0x20   : > { %v7480_v0 = vld [vmem:[%s9886_s1 + $0x58] sm:$0xff]  ;;  %v7491_v1 = vld [vmem:[%s9886_s1 + $0x60] sm:$0xff]  ;;  %v7502_v2 = vld [vmem:[%s9886_s1 + $0x68] sm:$0xff] }
  0x21   : > { %5961 = vmatmul.mubr.msk.f32.gmra.mxu0 %vm197_vm0, %v171_v9  ;;  %v7513_v3 = vld [vmem:[%s9886_s1 + $0x70] sm:$0xff]  ;;  %v7524_v5 = vld [vmem:[%s9886_s1 + $0x78] sm:$0xff]  ;;  %v7535_v6 = vld [vmem:[%s9886_s1 + $0x80] sm:$0xff] }
  0x22   : > { %352 = vmatprep.mubr.f32.mxu0 %v7185_v4  ;;  %5973 = vmatmul.mubr.msk.f32.gmra.mxu1 %vm197_vm0, %v183_v10  ;;  %v7546_v7 = vld [vmem:[%s9886_s1 + $0x88] sm:$0xff]  ;;  %v7557_v8 = vld [vmem:[%s9886_s1 + $0x90] sm:$0xff]  ;;  %v7568_v9 = vld [vmem:[%s9886_s1 + $0x98] sm:$0xff] }
  0x23   : > { %424 = vmatprep.mubr.f32.mxu1 %v7185_v4  ;;  %v7579_v10 = vld [vmem:[%s9886_s1 + $0xa0] sm:$0xff] }
  0x25   : > { %5962 = vmatmul.mubr.msk.f32.gmra.mxu0 %vm197_vm0, %v172_v11  ;;  %v7590_v11 = vld [vmem:[%s9886_s1 + $0xa8] sm:$0xff] }
  0x26   : > { %358 = vmatprep.mubr.f32.mxu0 %v7185_v4  ;;  %5974 = vmatmul.mubr.msk.f32.gmra.mxu1 %vm197_vm0, %v184_v12  ;;  %v7601_v12 = vld [vmem:[%s9886_s1 + $0xb0] sm:$0xff] }
  0x27   : > { %430 = vmatprep.mubr.f32.mxu1 %v7185_v4 }
  0x29   : > { %5963 = vmatmul.mubr.msk.f32.gmra.mxu0 %vm197_vm0, %v173_v13  ;;  %v7612_v13 = vld [vmem:[%s9886_s1 + $0xb8] sm:$0xff] }
  0x2a   : > { %364 = vmatprep.mubr.f32.mxu0 %v7185_v4  ;;  %5975 = vmatmul.mubr.msk.f32.gmra.mxu1 %vm197_vm0, %v185_v14  ;;  %v7623_v14 = vld [vmem:[%s9886_s1 + $0xc0] sm:$0xff] }
  0x2b   : > { %436 = vmatprep.mubr.f32.mxu1 %v7185_v4 }
  0x2d   : > { %5964 = vmatmul.mubr.msk.f32.gmra.mxu0 %vm197_vm0, %v174_v15 }
  0x2e   : > { %370 = vmatprep.mubr.f32.mxu0 %v7185_v4  ;;  %5976 = vmatmul.mubr.msk.f32.gmra.mxu1 %vm197_vm0, %v186_v16  ;;  %v7636_v16 = vld [vmem:[%s9886_s1 + $0xc8] sm:$0xff] }
  0x2f   : > { %442 = vmatprep.mubr.f32.mxu1 %v7185_v4 }
  0x31   : > { %5965 = vmatmul.mubr.msk.f32.gmra.mxu0 %vm197_vm0, %v175_v17 }
  0x32   : > { %376 = vmatprep.mubr.f32.mxu0 %v7185_v4  ;;  %5977 = vmatmul.mubr.msk.f32.gmra.mxu1 %vm197_vm0, %v187_v18  ;;  %v7649_v18 = vld [vmem:[%s9886_s1 + $0xd0] sm:$0xff] }
  0x33   : > { %448 = vmatprep.mubr.f32.mxu1 %v7185_v4 }
  0x35   : > { %5966 = vmatmul.mubr.msk.f32.gmra.mxu0 %vm197_vm0, %v176_v19 }
  0x36   : > { %382 = vmatprep.mubr.f32.mxu0 %v7185_v4  ;;  %5978 = vmatmul.mubr.msk.f32.gmra.mxu1 %vm197_vm0, %v188_v20  ;;  %v7662_v20 = vld [vmem:[%s9886_s1 + $0xd8] sm:$0xff] }
  0x37   : > { %454 = vmatprep.mubr.f32.mxu1 %v7185_v4 }
  0x39   : > { %5967 = vmatmul.mubr.msk.f32.gmra.mxu0 %vm197_vm0, %v177_v21 }
  0x3a   : > { %388 = vmatprep.mubr.f32.mxu0 %v7185_v4  ;;  %5979 = vmatmul.mubr.msk.f32.gmra.mxu1 %vm197_vm0, %v189_v22  ;;  %v7673_v22 = vld [vmem:[%s9886_s1 + $0xe0] sm:$0xff] }
  0x3b   : > { %460 = vmatprep.mubr.f32.mxu1 %v7185_v4 }
  0x3d   : > { %5968 = vmatmul.mubr.msk.f32.gmra.mxu0 %vm197_vm0, %v178_v23 }
  0x3e   : > { %394 = vmatprep.mubr.f32.mxu0 %v7185_v4  ;;  %5980 = vmatmul.mubr.msk.f32.gmra.mxu1 %vm197_vm0, %v190_v24  ;;  %v7686_v24 = vld [vmem:[%s9886_s1 + $0xe8] sm:$0xff] }
  0x3f   : > { %466 = vmatprep.mubr.f32.mxu1 %v7185_v4 }
  0x41   : > { %5969 = vmatmul.mubr.msk.f32.gmra.mxu0 %vm197_vm0, %v179_v25 }
  0x42   : > { %400 = vmatprep.mubr.f32.mxu0 %v7185_v4  ;;  %5981 = vmatmul.mubr.msk.f32.gmra.mxu1 %vm197_vm0, %v191_v27 }
  0x43   : > { %472 = vmatprep.mubr.f32.mxu1 %v7185_v4 }
  0x45   : > { %5970 = vmatmul.mubr.msk.f32.gmra.mxu0 %vm197_vm0, %v180_v26  ;;  %v7699_v26 = vld [vmem:[%s9886_s1 + $0xf0] sm:$0xff] }
  0x46   : > { %1120 = vmatprep.mubr.f32.mxu0 %v7185_v4  ;;  %5982 = vmatmul.mubr.msk.f32.gmra.mxu1 %vm197_vm0, %v192_v28  ;;  %v7712_v28 = vld [vmem:[%s9886_s1 + $0xf8] sm:$0xff] }
  0x47   : > { %671 = vmatprep.mubr.f32.mxu1 %v7185_v4 }
  0xd9   : > { %v336_v29 = vpop.f32.mrf.mxu0 }
  0xda   : > { %v7629_v15 = vpop.f32.mrf.mxu1 }
  0xdb   : > { %v338_v30 = vpop.f32.mrf.mxu0 }
  0xdc   : > { %v7642_v17 = vpop.f32.mrf.mxu1 }
  0xdd   : > { %v342_v31 = vpop.f32.mrf.mxu0 }
  0xde   : > { %v7655_v19 = vpop.f32.mrf.mxu1 }
  0xdf   : > { %v344_v32 = vpop.f32.mrf.mxu0 }
  0xe0   : > { %635 = vmatprep.subr.mxu1 %v344_v32  ;;  %v416_v21 = vpop.f32.mrf.mxu1 }
  0xe1   : > { %v348_v33 = vpop.f32.mrf.mxu0  ;;  %636 = vmatpush1.msra.mxu1 %v342_v31 }
  0xe2   : > { %637 = vmatprep.subr.mxu1 %v338_v30  ;;  %v7679_v23 = vpop.f32.mrf.mxu1 }
  0xe3   : > { %v350_v35 = vpop.f32.mrf.mxu0  ;;  %638 = vmatpush1.msra.mxu1 %v336_v29 }
  0xe4   : > { %5983 = vmatmul.mubr.msk.f32.vlgmr.msra.gmra.mxu1 %vm197_vm0, %v7353_v34  ;;  %v7692_v25 = vpop.f32.mrf.mxu1 }
  0xe5   : > { %v354_v36 = vpop.f32.mrf.mxu0  ;;  %677 = vmatprep.mubr.f32.mxu1 %v7185_v4 }
  0xe6   : > { %v7705_v27 = vpop.f32.mrf.mxu1 }
  0xe7   : > { %v356_v38 = vpop.f32.mrf.mxu0 }
  0xe8   : > { %5984 = vmatmul.mubr.msk.f32.gmra.mxu1 %vm197_vm0, %v7361_v37  ;;  %1084 = vmatprep.subr.mxu0 %v356_v38  ;;  %v428_v29 = vpop.f32.mrf.mxu1 }
  0xe9   : > { %1085 = vmatpush1.msra.mxu0 %v354_v36  ;;  %683 = vmatprep.mubr.f32.mxu1 %v7185_v4  ;;  %v360_v40 = vpop.f32.mrf.mxu0 }
  0xea   : > { %1086 = vmatprep.subr.mxu0 %v350_v35  ;;  %v7724_v30 = vpop.f32.mrf.mxu1 }
  0xeb   : > { %1087 = vmatpush1.msra.mxu0 %v348_v33  ;;  %v362_v41 = vpop.f32.mrf.mxu0 }
  0xec   : > { %5985 = vmatmul.mubr.msk.f32.gmra.mxu1 %vm197_vm0, %v7369_v39  ;;  %6015 = vmatmul.mubr.msk.f32.vlgmr.msra.gmra.mxu0 %vm197_vm0, %v7353_v34  ;;  %v7734_v31 = vpop.f32.mrf.mxu1 }
  0xed   : > { %689 = vmatprep.mubr.f32.mxu1 %v7185_v4  ;;  %1126 = vmatprep.mubr.f32.mxu0 %v7185_v4  ;;  %v366_v43 = vpop.f32.mrf.mxu0 }
  0xee   : > { %v7743_v32 = vpop.f32.mrf.mxu1 }
  0xef   : > { %v368_v44 = vpop.f32.mrf.mxu0 }
  0xf0   : > { %5986 = vmatmul.mubr.msk.f32.gmra.mxu1 %vm197_vm0, %v7380_v42  ;;  %6016 = vmatmul.mubr.msk.f32.gmra.mxu0 %vm197_vm0, %v7361_v37  ;;  %v7753_v33 = vpop.f32.mrf.mxu1 }
  0xf1   : > { %695 = vmatprep.mubr.f32.mxu1 %v7185_v4  ;;  %1132 = vmatprep.mubr.f32.mxu0 %v7185_v4  ;;  %v372_v46 = vpop.f32.mrf.mxu0 }
  0xf2   : > { %1534 = vmatprep.subr.mxu1 %v368_v44  ;;  %v7762_v35 = vpop.f32.mrf.mxu1 }
  0xf3   : > { %1535 = vmatpush1.msra.mxu1 %v366_v43  ;;  %v374_v47 = vpop.f32.mrf.mxu0 }
  0xf4   : > { %5987 = vmatmul.mubr.msk.f32.gmra.mxu1 %vm197_vm0, %v7391_v45  ;;  %6017 = vmatmul.mubr.msk.f32.gmra.mxu0 %vm197_vm0, %v7369_v39  ;;  %v7770_v36 = vpop.f32.mrf.mxu1 }
  0xf5   : > { %701 = vmatprep.mubr.f32.mxu1 %v7185_v4  ;;  %1138 = vmatprep.mubr.f32.mxu0 %v7185_v4  ;;  %v378_v49 = vpop.f32.mrf.mxu0 }
  0xf6   : > { %1536 = vmatprep.subr.mxu1 %v362_v41 }
  0xf7   : > { %1537 = vmatpush1.msra.mxu1 %v360_v40  ;;  %v380_v50 = vpop.f32.mrf.mxu0 }
  0xf8   : > { %5988 = vmatmul.mubr.msk.f32.gmra.mxu1 %vm197_vm0, %v7402_v48  ;;  %6018 = vmatmul.mubr.msk.f32.gmra.mxu0 %vm197_vm0, %v7380_v42 }
  0xf9   : > { %707 = vmatprep.mubr.f32.mxu1 %v7185_v4  ;;  %1144 = vmatprep.mubr.f32.mxu0 %v7185_v4  ;;  %v7415_v52 = vpop.f32.mrf.mxu0 }
  0xfa   : > { %1984 = vmatprep.subr.mxu0 %v380_v50 }
  0xfb   : > { %1985 = vmatpush1.msra.mxu0 %v378_v49  ;;  %v7417_v53 = vpop.f32.mrf.mxu0 }
  0xfc   : > { %5989 = vmatmul.mubr.msk.f32.gmra.mxu1 %vm197_vm0, %v7413_v51  ;;  %6019 = vmatmul.mubr.msk.f32.gmra.mxu0 %vm197_vm0, %v7391_v45 }
  0xfd   : > { %713 = vmatprep.mubr.f32.mxu1 %v7185_v4  ;;  %1150 = vmatprep.mubr.f32.mxu0 %v7185_v4  ;;  %v7430_v55 = vpop.f32.mrf.mxu0 }
  0xfe   : > { %1986 = vmatprep.subr.mxu0 %v374_v47 }
  0xff   : > { %1987 = vmatpush1.msra.mxu0 %v372_v46  ;;  %v392_v56 = vpop.f32.mrf.mxu0 }
 0x100   : > { %5990 = vmatmul.mubr.msk.f32.gmra.mxu1 %vm197_vm0, %v7428_v54  ;;  %6020 = vmatmul.mubr.msk.f32.gmra.mxu0 %vm197_vm0, %v7402_v48 }
 0x101   : > { %719 = vmatprep.mubr.f32.mxu1 %v7185_v4  ;;  %1156 = vmatprep.mubr.f32.mxu0 %v7185_v4  ;;  %v7443_v58 = vpop.f32.mrf.mxu0 }
 0x102   : > { %2434 = vmatprep.subr.mxu1 %v392_v56 }
 0x103   : > { %v7445_v59 = vpop.f32.mrf.mxu0 }
 0x104   : > { %5991 = vmatmul.mubr.msk.f32.gmra.mxu1 %vm197_vm0, %v7441_v57  ;;  %6021 = vmatmul.mubr.msk.f32.gmra.mxu0 %vm197_vm0, %v7413_v51 }
 0x105   : > { %725 = vmatprep.mubr.f32.mxu1 %v7185_v4  ;;  %1162 = vmatprep.mubr.f32.mxu0 %v7185_v4  ;;  %v7458_v61 = vpop.f32.mrf.mxu0 }
 0x107   : > { %v404_v62 = vpop.f32.mrf.mxu0 }
 0x108   : > { %5992 = vmatmul.mubr.msk.f32.gmra.mxu1 %vm197_vm0, %v7456_v60  ;;  %6022 = vmatmul.mubr.msk.f32.gmra.mxu0 %vm197_vm0, %v7428_v54 }
 0x109   : > { %731 = vmatprep.mubr.f32.mxu1 %v7185_v4  ;;  %1168 = vmatprep.mubr.f32.mxu0 %v7185_v4 }
 0x10a   : > { %2884 = vmatprep.subr.mxu0 %v404_v62 }
 0x10c   : > { %5993 = vmatmul.mubr.msk.f32.gmra.mxu1 %vm197_vm0, %v7469_v63  ;;  %6023 = vmatmul.mubr.msk.f32.gmra.mxu0 %vm197_vm0, %v7441_v57 }
 0x10d   : > { %737 = vmatprep.mubr.f32.mxu1 %v7185_v4  ;;  %1174 = vmatprep.mubr.f32.mxu0 %v7185_v4 }
 0x110   : > { %5994 = vmatmul.mubr.msk.f32.gmra.mxu1 %vm197_vm0, %v7480_v0  ;;  %6024 = vmatmul.mubr.msk.f32.gmra.mxu0 %vm197_vm0, %v7456_v60 }
 0x111   : > { %743 = vmatprep.mubr.f32.mxu1 %v7185_v4  ;;  %1180 = vmatprep.mubr.f32.mxu0 %v7185_v4 }
 0x114   : > { %5995 = vmatmul.mubr.msk.f32.gmra.mxu1 %vm197_vm0, %v7491_v1  ;;  %6025 = vmatmul.mubr.msk.f32.gmra.mxu0 %vm197_vm0, %v7469_v63 }
 0x115   : > { %749 = vmatprep.mubr.f32.mxu1 %v7185_v4  ;;  %1186 = vmatprep.mubr.f32.mxu0 %v7185_v4 }
 0x118   : > { %5996 = vmatmul.mubr.msk.f32.gmra.mxu1 %vm197_vm0, %v7502_v2  ;;  %6026 = vmatmul.mubr.msk.f32.gmra.mxu0 %vm197_vm0, %v7480_v0 }
 0x119   : > { %755 = vmatprep.mubr.f32.mxu1 %v7185_v4  ;;  %1192 = vmatprep.mubr.f32.mxu0 %v7185_v4 }
 0x11c   : > { %5997 = vmatmul.mubr.msk.f32.gmra.mxu1 %vm197_vm0, %v7513_v3  ;;  %6027 = vmatmul.mubr.msk.f32.gmra.mxu0 %vm197_vm0, %v7491_v1 }
 0x11d   : > { %761 = vmatprep.mubr.f32.mxu1 %v7185_v4  ;;  %1198 = vmatprep.mubr.f32.mxu0 %v7185_v4 }
 0x120   : > { %5998 = vmatmul.mubr.msk.f32.gmra.mxu1 %vm197_vm0, %v7524_v5  ;;  %6028 = vmatmul.mubr.msk.f32.gmra.mxu0 %vm197_vm0, %v7502_v2 }
 0x121   : > { %767 = vmatprep.mubr.f32.mxu1 %v7185_v4  ;;  %1204 = vmatprep.mubr.f32.mxu0 %v7185_v4 }
 0x124   : > { %5999 = vmatmul.mubr.msk.f32.gmra.mxu1 %vm197_vm0, %v7535_v6  ;;  %6029 = vmatmul.mubr.msk.f32.gmra.mxu0 %vm197_vm0, %v7513_v3 }
 0x125   : > { %773 = vmatprep.mubr.f32.mxu1 %v7185_v4  ;;  %1210 = vmatprep.mubr.f32.mxu0 %v7185_v4 }
 0x128   : > { %6000 = vmatmul.mubr.msk.f32.gmra.mxu1 %vm197_vm0, %v7546_v7  ;;  %6030 = vmatmul.mubr.msk.f32.gmra.mxu0 %vm197_vm0, %v7524_v5 }
 0x129   : > { %779 = vmatprep.mubr.f32.mxu1 %v7185_v4  ;;  %1216 = vmatprep.mubr.f32.mxu0 %v7185_v4 }
 0x12c   : > { %6001 = vmatmul.mubr.msk.f32.gmra.mxu1 %vm197_vm0, %v7557_v8  ;;  %6031 = vmatmul.mubr.msk.f32.gmra.mxu0 %vm197_vm0, %v7535_v6 }
 0x12d   : > { %785 = vmatprep.mubr.f32.mxu1 %v7185_v4  ;;  %1222 = vmatprep.mubr.f32.mxu0 %v7185_v4 }
 0x130   : > { %6002 = vmatmul.mubr.msk.f32.gmra.mxu1 %vm197_vm0, %v7568_v9  ;;  %6032 = vmatmul.mubr.msk.f32.gmra.mxu0 %vm197_vm0, %v7546_v7 }
 0x131   : > { %791 = vmatprep.mubr.f32.mxu1 %v7185_v4  ;;  %1228 = vmatprep.mubr.f32.mxu0 %v7185_v4 }
 0x134   : > { %6003 = vmatmul.mubr.msk.f32.gmra.mxu1 %vm197_vm0, %v7579_v10  ;;  %6033 = vmatmul.mubr.msk.f32.gmra.mxu0 %vm197_vm0, %v7557_v8 }
 0x135   : > { %797 = vmatprep.mubr.f32.mxu1 %v7185_v4  ;;  %1234 = vmatprep.mubr.f32.mxu0 %v7185_v4 }
 0x138   : > { %6004 = vmatmul.mubr.msk.f32.gmra.mxu1 %vm197_vm0, %v7590_v11  ;;  %6034 = vmatmul.mubr.msk.f32.gmra.mxu0 %vm197_vm0, %v7568_v9 }
 0x139   : > { %803 = vmatprep.mubr.f32.mxu1 %v7185_v4  ;;  %1240 = vmatprep.mubr.f32.mxu0 %v7185_v4 }
 0x13c   : > { %6005 = vmatmul.mubr.msk.f32.gmra.mxu1 %vm197_vm0, %v7601_v12  ;;  %6035 = vmatmul.mubr.msk.f32.gmra.mxu0 %vm197_vm0, %v7579_v10 }
 0x13d   : > { %809 = vmatprep.mubr.f32.mxu1 %v7185_v4  ;;  %1246 = vmatprep.mubr.f32.mxu0 %v7185_v4 }
 0x140   : > { %6006 = vmatmul.mubr.msk.f32.gmra.mxu1 %vm197_vm0, %v7612_v13  ;;  %6036 = vmatmul.mubr.msk.f32.gmra.mxu0 %vm197_vm0, %v7590_v11 }
 0x141   : > { %815 = vmatprep.mubr.f32.mxu1 %v7185_v4  ;;  %1252 = vmatprep.mubr.f32.mxu0 %v7185_v4 }
 0x144   : > { %6007 = vmatmul.mubr.msk.f32.gmra.mxu1 %vm197_vm0, %v7623_v14  ;;  %6037 = vmatmul.mubr.msk.f32.gmra.mxu0 %vm197_vm0, %v7601_v12 }
 0x145   : > { %821 = vmatprep.mubr.f32.mxu1 %v7185_v4  ;;  %1258 = vmatprep.mubr.f32.mxu0 %v7185_v4 }
 0x148   : > { %6008 = vmatmul.mubr.msk.f32.gmra.mxu1 %vm197_vm0, %v7636_v16  ;;  %6038 = vmatmul.mubr.msk.f32.gmra.mxu0 %vm197_vm0, %v7612_v13 }
 0x149   : > { %827 = vmatprep.mubr.f32.mxu1 %v7185_v4  ;;  %1264 = vmatprep.mubr.f32.mxu0 %v7185_v4 }
 0x14c   : > { %6009 = vmatmul.mubr.msk.f32.gmra.mxu1 %vm197_vm0, %v7649_v18  ;;  %6039 = vmatmul.mubr.msk.f32.gmra.mxu0 %vm197_vm0, %v7623_v14 }
 0x14d   : > { %833 = vmatprep.mubr.f32.mxu1 %v7185_v4  ;;  %1270 = vmatprep.mubr.f32.mxu0 %v7185_v4 }
 0x150   : > { %6010 = vmatmul.mubr.msk.f32.gmra.mxu1 %vm197_vm0, %v7662_v20  ;;  %6040 = vmatmul.mubr.msk.f32.gmra.mxu0 %vm197_vm0, %v7636_v16 }
 0x151   : > { %839 = vmatprep.mubr.f32.mxu1 %v7185_v4  ;;  %1276 = vmatprep.mubr.f32.mxu0 %v7185_v4 }
 0x154   : > { %6011 = vmatmul.mubr.msk.f32.gmra.mxu1 %vm197_vm0, %v7673_v22  ;;  %6041 = vmatmul.mubr.msk.f32.gmra.mxu0 %vm197_vm0, %v7649_v18 }
 0x155   : > { %845 = vmatprep.mubr.f32.mxu1 %v7185_v4  ;;  %1282 = vmatprep.mubr.f32.mxu0 %v7185_v4 }
 0x158   : > { %6012 = vmatmul.mubr.msk.f32.gmra.mxu1 %vm197_vm0, %v7686_v24  ;;  %6042 = vmatmul.mubr.msk.f32.gmra.mxu0 %vm197_vm0, %v7662_v20 }
 0x159   : > { %851 = vmatprep.mubr.f32.mxu1 %v7185_v4  ;;  %1288 = vmatprep.mubr.f32.mxu0 %v7185_v4 }
 0x15c   : > { %6013 = vmatmul.mubr.msk.f32.gmra.mxu1 %vm197_vm0, %v7699_v26  ;;  %6043 = vmatmul.mubr.msk.f32.gmra.mxu0 %vm197_vm0, %v7673_v22 }
 0x15d   : > { %857 = vmatprep.mubr.f32.mxu1 %v7185_v4  ;;  %1294 = vmatprep.mubr.f32.mxu0 %v7185_v4 }
 0x160   : > { %6014 = vmatmul.mubr.msk.f32.gmra.mxu1 %vm197_vm0, %v7712_v28  ;;  %6044 = vmatmul.mubr.msk.f32.gmra.mxu0 %vm197_vm0, %v7686_v24 }
 0x161   : > { %1300 = vmatprep.mubr.f32.mxu0 %v7185_v4  ;;  %1570 = vmatprep.mubr.f32.mxu1 %v7185_v4 }
 0x164   : > { %6045 = vmatmul.mubr.msk.f32.gmra.mxu0 %vm197_vm0, %v7699_v26  ;;  %6111 = vmatmul.mubr.msk.f32.vlgmr.msra.gmra.mxu1 %vm197_vm0, %v7353_v34 }
 0x165   : > { %1306 = vmatprep.mubr.f32.mxu0 %v7185_v4  ;;  %1576 = vmatprep.mubr.f32.mxu1 %v7185_v4 }
 0x166   : > { %2435 = vmatpush1.msra.mxu1 %v7430_v55 }
 0x167   : > { %2436 = vmatprep.subr.mxu1 %v7417_v53 }
 0x168   : > { %6046 = vmatmul.mubr.msk.f32.gmra.mxu0 %vm197_vm0, %v7712_v28  ;;  %6112 = vmatmul.mubr.msk.f32.gmra.mxu1 %vm197_vm0, %v7361_v37 }
 0x169   : > { %1582 = vmatprep.mubr.f32.mxu1 %v7185_v4  ;;  %2020 = vmatprep.mubr.f32.mxu0 %v7185_v4 }
 0x16a   : > { %2437 = vmatpush1.msra.mxu1 %v7415_v52 }
 0x16b   : > { %3334 = vmatprep.subr.mxu1 %v416_v21 }
 0x16c   : > { %6113 = vmatmul.mubr.msk.f32.gmra.mxu1 %vm197_vm0, %v7369_v39  ;;  %6207 = vmatmul.mubr.msk.f32.vlgmr.msra.gmra.mxu0 %vm197_vm0, %v7353_v34 }
 0x16d   : > { %1588 = vmatprep.mubr.f32.mxu1 %v7185_v4  ;;  %2026 = vmatprep.mubr.f32.mxu0 %v7185_v4 }
 0x16e   : > { %2885 = vmatpush1.msra.mxu0 %v7458_v61 }
 0x16f   : > { %2886 = vmatprep.subr.mxu0 %v7445_v59 }
 0x170   : > { %6114 = vmatmul.mubr.msk.f32.gmra.mxu1 %vm197_vm0, %v7380_v42  ;;  %6208 = vmatmul.mubr.msk.f32.gmra.mxu0 %vm197_vm0, %v7361_v37  ;;  %v7778_v37 = vpop.f32.mrf.mxu1 }
 0x171   : > { %1594 = vmatprep.mubr.f32.mxu1 %v7185_v4  ;;  %2032 = vmatprep.mubr.f32.mxu0 %v7185_v4 }
 0x172   : > { %2887 = vmatpush1.msra.mxu0 %v7443_v58  ;;  %v7786_v38 = vpop.f32.mrf.mxu1 }
 0x173   : > { %3784 = vmatprep.subr.mxu0 %v428_v29 }
 0x174   : > { %6115 = vmatmul.mubr.msk.f32.gmra.mxu1 %vm197_vm0, %v7391_v45  ;;  %6209 = vmatmul.mubr.msk.f32.gmra.mxu0 %vm197_vm0, %v7369_v39  ;;  %v7794_v39 = vpop.f32.mrf.mxu1 }
 0x175   : > { %1600 = vmatprep.mubr.f32.mxu1 %v7185_v4  ;;  %2038 = vmatprep.mubr.f32.mxu0 %v7185_v4 }
 0x176   : > { %v7802_v40 = vpop.f32.mrf.mxu1 }
 0x178   : > { %6116 = vmatmul.mubr.msk.f32.gmra.mxu1 %vm197_vm0, %v7402_v48  ;;  %6210 = vmatmul.mubr.msk.f32.gmra.mxu0 %vm197_vm0, %v7380_v42  ;;  %v7810_v41 = vpop.f32.mrf.mxu1 }
 0x179   : > { %1606 = vmatprep.mubr.f32.mxu1 %v7185_v4  ;;  %2044 = vmatprep.mubr.f32.mxu0 %v7185_v4 }
 0x17a   : > { %v7818_v42 = vpop.f32.mrf.mxu1 }
 0x17c   : > { %6117 = vmatmul.mubr.msk.f32.gmra.mxu1 %vm197_vm0, %v7413_v51  ;;  %6211 = vmatmul.mubr.msk.f32.gmra.mxu0 %vm197_vm0, %v7391_v45  ;;  %v7826_v43 = vpop.f32.mrf.mxu1 }
 0x17d   : > { %1612 = vmatprep.mubr.f32.mxu1 %v7185_v4  ;;  %2050 = vmatprep.mubr.f32.mxu0 %v7185_v4 }
 0x17e   : > { %v7834_v44 = vpop.f32.mrf.mxu1 }
 0x180   : > { %6118 = vmatmul.mubr.msk.f32.gmra.mxu1 %vm197_vm0, %v7428_v54  ;;  %6212 = vmatmul.mubr.msk.f32.gmra.mxu0 %vm197_vm0, %v7402_v48  ;;  %v7843_v45 = vpop.f32.mrf.mxu1 }
 0x181   : > { %1618 = vmatprep.mubr.f32.mxu1 %v7185_v4  ;;  %2056 = vmatprep.mubr.f32.mxu0 %v7185_v4 }
 0x182   : > { %v7853_v46 = vpop.f32.mrf.mxu1 }
 0x184   : > { %6119 = vmatmul.mubr.msk.f32.gmra.mxu1 %vm197_vm0, %v7441_v57  ;;  %6213 = vmatmul.mubr.msk.f32.gmra.mxu0 %vm197_vm0, %v7413_v51 }
 0x185   : > { %1624 = vmatprep.mubr.f32.mxu1 %v7185_v4  ;;  %2062 = vmatprep.mubr.f32.mxu0 %v7185_v4 }
 0x188   : > { %6120 = vmatmul.mubr.msk.f32.gmra.mxu1 %vm197_vm0, %v7456_v60  ;;  %6214 = vmatmul.mubr.msk.f32.gmra.mxu0 %vm197_vm0, %v7428_v54 }
 0x189   : > { %1630 = vmatprep.mubr.f32.mxu1 %v7185_v4  ;;  %2068 = vmatprep.mubr.f32.mxu0 %v7185_v4 }
 0x18c   : > { %6121 = vmatmul.mubr.msk.f32.gmra.mxu1 %vm197_vm0, %v7469_v63  ;;  %6215 = vmatmul.mubr.msk.f32.gmra.mxu0 %vm197_vm0, %v7441_v57 }
 0x18d   : > { %1636 = vmatprep.mubr.f32.mxu1 %v7185_v4  ;;  %2074 = vmatprep.mubr.f32.mxu0 %v7185_v4 }
 0x190   : > { %6122 = vmatmul.mubr.msk.f32.gmra.mxu1 %vm197_vm0, %v7480_v0  ;;  %6216 = vmatmul.mubr.msk.f32.gmra.mxu0 %vm197_vm0, %v7456_v60 }
 0x191   : > { %1642 = vmatprep.mubr.f32.mxu1 %v7185_v4  ;;  %2080 = vmatprep.mubr.f32.mxu0 %v7185_v4 }
 0x194   : > { %6123 = vmatmul.mubr.msk.f32.gmra.mxu1 %vm197_vm0, %v7491_v1  ;;  %6217 = vmatmul.mubr.msk.f32.gmra.mxu0 %vm197_vm0, %v7469_v63 }
 0x195   : > { %1648 = vmatprep.mubr.f32.mxu1 %v7185_v4  ;;  %2086 = vmatprep.mubr.f32.mxu0 %v7185_v4 }
 0x198   : > { %6124 = vmatmul.mubr.msk.f32.gmra.mxu1 %vm197_vm0, %v7502_v2  ;;  %6218 = vmatmul.mubr.msk.f32.gmra.mxu0 %vm197_vm0, %v7480_v0 }
 0x199   : > { %1654 = vmatprep.mubr.f32.mxu1 %v7185_v4  ;;  %2092 = vmatprep.mubr.f32.mxu0 %v7185_v4 }
 0x19c   : > { %6125 = vmatmul.mubr.msk.f32.gmra.mxu1 %vm197_vm0, %v7513_v3  ;;  %6219 = vmatmul.mubr.msk.f32.gmra.mxu0 %vm197_vm0, %v7491_v1 }
 0x19d   : > { %1660 = vmatprep.mubr.f32.mxu1 %v7185_v4  ;;  %2098 = vmatprep.mubr.f32.mxu0 %v7185_v4 }
 0x1a0   : > { %6126 = vmatmul.mubr.msk.f32.gmra.mxu1 %vm197_vm0, %v7524_v5  ;;  %6220 = vmatmul.mubr.msk.f32.gmra.mxu0 %vm197_vm0, %v7502_v2 }
 0x1a1   : > { %1666 = vmatprep.mubr.f32.mxu1 %v7185_v4  ;;  %2104 = vmatprep.mubr.f32.mxu0 %v7185_v4 }
 0x1a4   : > { %6127 = vmatmul.mubr.msk.f32.gmra.mxu1 %vm197_vm0, %v7535_v6  ;;  %6221 = vmatmul.mubr.msk.f32.gmra.mxu0 %vm197_vm0, %v7513_v3  ;;  %v673_v47 = vpop.f32.mrf.mxu1 }
 0x1a5   : > { %1672 = vmatprep.mubr.f32.mxu1 %v7185_v4  ;;  %2110 = vmatprep.mubr.f32.mxu0 %v7185_v4  ;;  %864 = vst [vmem:[%s7863_s4] sm:$0xff] %v673_v47 }
 0x1a6   : > { %v675_v48 = vpop.f32.mrf.mxu1 }
 0x1a7   : > { %865 = vst [vmem:[%s7863_s4 + $0x8] sm:$0xff] %v675_v48 }
 0x1a8   : > { %6128 = vmatmul.mubr.msk.f32.gmra.mxu1 %vm197_vm0, %v7546_v7  ;;  %6222 = vmatmul.mubr.msk.f32.gmra.mxu0 %vm197_vm0, %v7524_v5  ;;  %v679_v49 = vpop.f32.mrf.mxu1 }
 0x1a9   : > { %1678 = vmatprep.mubr.f32.mxu1 %v7185_v4  ;;  %2116 = vmatprep.mubr.f32.mxu0 %v7185_v4  ;;  %866 = vst [vmem:[%s7863_s4 + $0x10] sm:$0xff] %v679_v49 }
 0x1aa   : > { %v681_v50 = vpop.f32.mrf.mxu1 }
 0x1ab   : > { %867 = vst [vmem:[%s7863_s4 + $0x18] sm:$0xff] %v681_v50 }
 0x1ac   : > { %6129 = vmatmul.mubr.msk.f32.gmra.mxu1 %vm197_vm0, %v7557_v8  ;;  %6223 = vmatmul.mubr.msk.f32.gmra.mxu0 %vm197_vm0, %v7535_v6  ;;  %v685_v51 = vpop.f32.mrf.mxu1  ;;  %v1122_v52 = vpop.f32.mrf.mxu0 }
 0x1ad   : > { %1684 = vmatprep.mubr.f32.mxu1 %v7185_v4  ;;  %2122 = vmatprep.mubr.f32.mxu0 %v7185_v4  ;;  %868 = vst [vmem:[%s7863_s4 + $0x20] sm:$0xff] %v685_v51  ;;  %6047 = vst [vmem:[%s7863_s4 + $0x200] sm:$0xff] %v1122_v52 }
 0x1ae   : > { %v687_v53 = vpop.f32.mrf.mxu1  ;;  %v1124_v54 = vpop.f32.mrf.mxu0 }
 0x1af   : > { %869 = vst [vmem:[%s7863_s4 + $0x28] sm:$0xff] %v687_v53  ;;  %6048 = vst [vmem:[%s7863_s4 + $0x208] sm:$0xff] %v1124_v54 }
 0x1b0   : > { %6130 = vmatmul.mubr.msk.f32.gmra.mxu1 %vm197_vm0, %v7568_v9  ;;  %6224 = vmatmul.mubr.msk.f32.gmra.mxu0 %vm197_vm0, %v7546_v7  ;;  %v691_v55 = vpop.f32.mrf.mxu1  ;;  %v1128_v56 = vpop.f32.mrf.mxu0 }
 0x1b1   : > { %1690 = vmatprep.mubr.f32.mxu1 %v7185_v4  ;;  %2128 = vmatprep.mubr.f32.mxu0 %v7185_v4  ;;  %870 = vst [vmem:[%s7863_s4 + $0x30] sm:$0xff] %v691_v55  ;;  %6049 = vst [vmem:[%s7863_s4 + $0x210] sm:$0xff] %v1128_v56 }
 0x1b2   : > { %v693_v57 = vpop.f32.mrf.mxu1  ;;  %v1130_v58 = vpop.f32.mrf.mxu0 }
 0x1b3   : > { %871 = vst [vmem:[%s7863_s4 + $0x38] sm:$0xff] %v693_v57  ;;  %6050 = vst [vmem:[%s7863_s4 + $0x218] sm:$0xff] %v1130_v58 }
 0x1b4   : > { %6131 = vmatmul.mubr.msk.f32.gmra.mxu1 %vm197_vm0, %v7579_v10  ;;  %6225 = vmatmul.mubr.msk.f32.gmra.mxu0 %vm197_vm0, %v7557_v8  ;;  %v697_v59 = vpop.f32.mrf.mxu1  ;;  %v1134_v60 = vpop.f32.mrf.mxu0 }
 0x1b5   : > { %1696 = vmatprep.mubr.f32.mxu1 %v7185_v4  ;;  %2134 = vmatprep.mubr.f32.mxu0 %v7185_v4  ;;  %872 = vst [vmem:[%s7863_s4 + $0x40] sm:$0xff] %v697_v59  ;;  %6051 = vst [vmem:[%s7863_s4 + $0x220] sm:$0xff] %v1134_v60 }
 0x1b6   : > { %v699_v61 = vpop.f32.mrf.mxu1  ;;  %v1136_v62 = vpop.f32.mrf.mxu0 }
 0x1b7   : > { %873 = vst [vmem:[%s7863_s4 + $0x48] sm:$0xff] %v699_v61  ;;  %6052 = vst [vmem:[%s7863_s4 + $0x228] sm:$0xff] %v1136_v62 }
 0x1b8   : > { %6132 = vmatmul.mubr.msk.f32.gmra.mxu1 %vm197_vm0, %v7590_v11  ;;  %6226 = vmatmul.mubr.msk.f32.gmra.mxu0 %vm197_vm0, %v7568_v9  ;;  %v703_v63 = vpop.f32.mrf.mxu1  ;;  %v1140_v0 = vpop.f32.mrf.mxu0 }
 0x1b9   : > { %1702 = vmatprep.mubr.f32.mxu1 %v7185_v4  ;;  %2140 = vmatprep.mubr.f32.mxu0 %v7185_v4  ;;  %874 = vst [vmem:[%s7863_s4 + $0x50] sm:$0xff] %v703_v63  ;;  %6053 = vst [vmem:[%s7863_s4 + $0x230] sm:$0xff] %v1140_v0 }
 0x1ba   : > { %v705_v1 = vpop.f32.mrf.mxu1  ;;  %v1142_v2 = vpop.f32.mrf.mxu0 }
 0x1bb   : > { %875 = vst [vmem:[%s7863_s4 + $0x58] sm:$0xff] %v705_v1  ;;  %6054 = vst [vmem:[%s7863_s4 + $0x238] sm:$0xff] %v1142_v2 }
 0x1bc   : > { %6133 = vmatmul.mubr.msk.f32.gmra.mxu1 %vm197_vm0, %v7601_v12  ;;  %6227 = vmatmul.mubr.msk.f32.gmra.mxu0 %vm197_vm0, %v7579_v10  ;;  %v709_v3 = vpop.f32.mrf.mxu1  ;;  %v1146_v5 = vpop.f32.mrf.mxu0 }
 0x1bd   : > { %1708 = vmatprep.mubr.f32.mxu1 %v7185_v4  ;;  %2146 = vmatprep.mubr.f32.mxu0 %v7185_v4  ;;  %876 = vst [vmem:[%s7863_s4 + $0x60] sm:$0xff] %v709_v3  ;;  %6055 = vst [vmem:[%s7863_s4 + $0x240] sm:$0xff] %v1146_v5 }
 0x1be   : > { %v711_v6 = vpop.f32.mrf.mxu1  ;;  %v1148_v7 = vpop.f32.mrf.mxu0 }
 0x1bf   : > { %877 = vst [vmem:[%s7863_s4 + $0x68] sm:$0xff] %v711_v6  ;;  %6056 = vst [vmem:[%s7863_s4 + $0x248] sm:$0xff] %v1148_v7 }
 0x1c0   : > { %6134 = vmatmul.mubr.msk.f32.gmra.mxu1 %vm197_vm0, %v7612_v13  ;;  %6228 = vmatmul.mubr.msk.f32.gmra.mxu0 %vm197_vm0, %v7590_v11  ;;  %v715_v8 = vpop.f32.mrf.mxu1  ;;  %v1152_v9 = vpop.f32.mrf.mxu0 }
 0x1c1   : > { %1714 = vmatprep.mubr.f32.mxu1 %v7185_v4  ;;  %2152 = vmatprep.mubr.f32.mxu0 %v7185_v4  ;;  %878 = vst [vmem:[%s7863_s4 + $0x70] sm:$0xff] %v715_v8  ;;  %6057 = vst [vmem:[%s7863_s4 + $0x250] sm:$0xff] %v1152_v9 }
 0x1c2   : > { %v717_v10 = vpop.f32.mrf.mxu1  ;;  %v1154_v21 = vpop.f32.mrf.mxu0 }
 0x1c3   : > { %879 = vst [vmem:[%s7863_s4 + $0x78] sm:$0xff] %v717_v10  ;;  %6058 = vst [vmem:[%s7863_s4 + $0x258] sm:$0xff] %v1154_v21 }
 0x1c4   : > { %6135 = vmatmul.mubr.msk.f32.gmra.mxu1 %vm197_vm0, %v7623_v14  ;;  %6229 = vmatmul.mubr.msk.f32.gmra.mxu0 %vm197_vm0, %v7601_v12  ;;  %v721_v11 = vpop.f32.mrf.mxu1  ;;  %v1158_v29 = vpop.f32.mrf.mxu0 }
 0x1c5   : > { %1720 = vmatprep.mubr.f32.mxu1 %v7185_v4  ;;  %2158 = vmatprep.mubr.f32.mxu0 %v7185_v4  ;;  %880 = vst [vmem:[%s7863_s4 + $0x80] sm:$0xff] %v721_v11  ;;  %6059 = vst [vmem:[%s7863_s4 + $0x260] sm:$0xff] %v1158_v29  ;;  %v8066_v11 = vld [vmem:[%s9886_s1 + $0x18] sm:$0xff] }
 0x1c6   : > { %v723_v47 = vpop.f32.mrf.mxu1  ;;  %v1160_v48 = vpop.f32.mrf.mxu0 }
 0x1c7   : > { %881 = vst [vmem:[%s7863_s4 + $0x88] sm:$0xff] %v723_v47  ;;  %6060 = vst [vmem:[%s7863_s4 + $0x268] sm:$0xff] %v1160_v48 }
 0x1c8   : > { %6136 = vmatmul.mubr.msk.f32.gmra.mxu1 %vm197_vm0, %v7636_v16  ;;  %6230 = vmatmul.mubr.msk.f32.gmra.mxu0 %vm197_vm0, %v7612_v13  ;;  %v727_v12 = vpop.f32.mrf.mxu1  ;;  %v1164_v49 = vpop.f32.mrf.mxu0 }
 0x1c9   : > { %1726 = vmatprep.mubr.f32.mxu1 %v7185_v4  ;;  %2164 = vmatprep.mubr.f32.mxu0 %v7185_v4  ;;  %882 = vst [vmem:[%s7863_s4 + $0x90] sm:$0xff] %v727_v12  ;;  %6061 = vst [vmem:[%s7863_s4 + $0x270] sm:$0xff] %v1164_v49 }
 0x1ca   : > { %v729_v50 = vpop.f32.mrf.mxu1  ;;  %v1166_v51 = vpop.f32.mrf.mxu0 }
 0x1cb   : > { %883 = vst [vmem:[%s7863_s4 + $0x98] sm:$0xff] %v729_v50  ;;  %6062 = vst [vmem:[%s7863_s4 + $0x278] sm:$0xff] %v1166_v51  ;;  %v8099_v50 = vld [vmem:[%s9886_s1 + $0x28] sm:$0xff] }
 0x1cc   : > { %6137 = vmatmul.mubr.msk.f32.gmra.mxu1 %vm197_vm0, %v7649_v18  ;;  %6231 = vmatmul.mubr.msk.f32.gmra.mxu0 %vm197_vm0, %v7623_v14  ;;  %v733_v13 = vpop.f32.mrf.mxu1  ;;  %v1170_v52 = vpop.f32.mrf.mxu0 }
 0x1cd   : > { %1732 = vmatprep.mubr.f32.mxu1 %v7185_v4  ;;  %2170 = vmatprep.mubr.f32.mxu0 %v7185_v4  ;;  %884 = vst [vmem:[%s7863_s4 + $0xa0] sm:$0xff] %v733_v13  ;;  %6063 = vst [vmem:[%s7863_s4 + $0x280] sm:$0xff] %v1170_v52 }
 0x1ce   : > { %v735_v53 = vpop.f32.mrf.mxu1  ;;  %v1172_v54 = vpop.f32.mrf.mxu0 }
 0x1cf   : > { %885 = vst [vmem:[%s7863_s4 + $0xa8] sm:$0xff] %v735_v53  ;;  %6064 = vst [vmem:[%s7863_s4 + $0x288] sm:$0xff] %v1172_v54  ;;  %v8114_v54 = vld [vmem:[%s9886_s1 + $0x30] sm:$0xff] }
 0x1d0   : > { %6138 = vmatmul.mubr.msk.f32.gmra.mxu1 %vm197_vm0, %v7662_v20  ;;  %6232 = vmatmul.mubr.msk.f32.gmra.mxu0 %vm197_vm0, %v7636_v16  ;;  %v739_v14 = vpop.f32.mrf.mxu1  ;;  %v1176_v55 = vpop.f32.mrf.mxu0 }
 0x1d1   : > { %1738 = vmatprep.mubr.f32.mxu1 %v7185_v4  ;;  %2176 = vmatprep.mubr.f32.mxu0 %v7185_v4  ;;  %886 = vst [vmem:[%s7863_s4 + $0xb0] sm:$0xff] %v739_v14  ;;  %6065 = vst [vmem:[%s7863_s4 + $0x290] sm:$0xff] %v1176_v55 }
 0x1d2   : > { %v741_v56 = vpop.f32.mrf.mxu1  ;;  %v1178_v57 = vpop.f32.mrf.mxu0 }
 0x1d3   : > { %887 = vst [vmem:[%s7863_s4 + $0xb8] sm:$0xff] %v741_v56  ;;  %6066 = vst [vmem:[%s7863_s4 + $0x298] sm:$0xff] %v1178_v57 }
 0x1d4   : > { %6139 = vmatmul.mubr.msk.f32.gmra.mxu1 %vm197_vm0, %v7673_v22  ;;  %6233 = vmatmul.mubr.msk.f32.gmra.mxu0 %vm197_vm0, %v7649_v18  ;;  %v745_v16 = vpop.f32.mrf.mxu1  ;;  %v1182_v58 = vpop.f32.mrf.mxu0 }
 0x1d5   : > { %1744 = vmatprep.mubr.f32.mxu1 %v7185_v4  ;;  %2182 = vmatprep.mubr.f32.mxu0 %v7185_v4  ;;  %888 = vst [vmem:[%s7863_s4 + $0xc0] sm:$0xff] %v745_v16  ;;  %6067 = vst [vmem:[%s7863_s4 + $0x2a0] sm:$0xff] %v1182_v58  ;;  %v8129_v16 = vld [vmem:[%s9886_s1 + $0x38] sm:$0xff] }
 0x1d6   : > { %v747_v59 = vpop.f32.mrf.mxu1  ;;  %v1184_v60 = vpop.f32.mrf.mxu0 }
 0x1d7   : > { %889 = vst [vmem:[%s7863_s4 + $0xc8] sm:$0xff] %v747_v59  ;;  %6068 = vst [vmem:[%s7863_s4 + $0x2a8] sm:$0xff] %v1184_v60 }
 0x1d8   : > { %6140 = vmatmul.mubr.msk.f32.gmra.mxu1 %vm197_vm0, %v7686_v24  ;;  %6234 = vmatmul.mubr.msk.f32.gmra.mxu0 %vm197_vm0, %v7662_v20  ;;  %v751_v18 = vpop.f32.mrf.mxu1  ;;  %v1188_v61 = vpop.f32.mrf.mxu0 }
 0x1d9   : > { %1750 = vmatprep.mubr.f32.mxu1 %v7185_v4  ;;  %2188 = vmatprep.mubr.f32.mxu0 %v7185_v4  ;;  %890 = vst [vmem:[%s7863_s4 + $0xd0] sm:$0xff] %v751_v18  ;;  %6069 = vst [vmem:[%s7863_s4 + $0x2b0] sm:$0xff] %v1188_v61  ;;  %v8144_v61 = vld [vmem:[%s9886_s1 + $0x40] sm:$0xff] }
 0x1da   : > { %v753_v62 = vpop.f32.mrf.mxu1  ;;  %v1190_v63 = vpop.f32.mrf.mxu0 }
 0x1db   : > { %891 = vst [vmem:[%s7863_s4 + $0xd8] sm:$0xff] %v753_v62  ;;  %6070 = vst [vmem:[%s7863_s4 + $0x2b8] sm:$0xff] %v1190_v63 }
 0x1dc   : > { %6141 = vmatmul.mubr.msk.f32.gmra.mxu1 %vm197_vm0, %v7699_v26  ;;  %6235 = vmatmul.mubr.msk.f32.gmra.mxu0 %vm197_vm0, %v7673_v22  ;;  %v757_v20 = vpop.f32.mrf.mxu1  ;;  %v1194_v0 = vpop.f32.mrf.mxu0 }
 0x1dd   : > { %1756 = vmatprep.mubr.f32.mxu1 %v7185_v4  ;;  %2194 = vmatprep.mubr.f32.mxu0 %v7185_v4  ;;  %892 = vst [vmem:[%s7863_s4 + $0xe0] sm:$0xff] %v757_v20  ;;  %6071 = vst [vmem:[%s7863_s4 + $0x2c0] sm:$0xff] %v1194_v0 }
 0x1de   : > { %v759_v1 = vpop.f32.mrf.mxu1  ;;  %v1196_v2 = vpop.f32.mrf.mxu0 }
 0x1df   : > { %893 = vst [vmem:[%s7863_s4 + $0xe8] sm:$0xff] %v759_v1  ;;  %6072 = vst [vmem:[%s7863_s4 + $0x2c8] sm:$0xff] %v1196_v2  ;;  %v8159_v1 = vld [vmem:[%s9886_s1 + $0x48] sm:$0xff] }
 0x1e0   : > { %6142 = vmatmul.mubr.msk.f32.gmra.mxu1 %vm197_vm0, %v7712_v28  ;;  %6236 = vmatmul.mubr.msk.f32.gmra.mxu0 %vm197_vm0, %v7686_v24  ;;  %v763_v22 = vpop.f32.mrf.mxu1  ;;  %v1200_v3 = vpop.f32.mrf.mxu0 }
 0x1e1   : > { %2200 = vmatprep.mubr.f32.mxu0 %v7185_v4  ;;  %2470 = vmatprep.mubr.f32.mxu1 %v7185_v4  ;;  %894 = vst [vmem:[%s7863_s4 + $0xf0] sm:$0xff] %v763_v22  ;;  %6073 = vst [vmem:[%s7863_s4 + $0x2d0] sm:$0xff] %v1200_v3 }
 0x1e2   : > { %v765_v5 = vpop.f32.mrf.mxu1  ;;  %v1202_v6 = vpop.f32.mrf.mxu0 }
 0x1e3   : > { %895 = vst [vmem:[%s7863_s4 + $0xf8] sm:$0xff] %v765_v5  ;;  %6074 = vst [vmem:[%s7863_s4 + $0x2d8] sm:$0xff] %v1202_v6  ;;  %v8174_v6 = vld [vmem:[%s9886_s1 + $0x50] sm:$0xff] }
 0x1e4   : > { %6237 = vmatmul.mubr.msk.f32.gmra.mxu0 %vm197_vm0, %v7699_v26  ;;  %6303 = vmatmul.mubr.msk.f32.vlgmr.msra.gmra.mxu1 %vm197_vm0, %v7353_v34  ;;  %v769_v24 = vpop.f32.mrf.mxu1  ;;  %v1206_v7 = vpop.f32.mrf.mxu0  ;;  %v8028_v26 = vld [vmem:[%s9886_s1 + $0x8] sm:$0xff] }
 0x1e5   : > { %3335 = vmatpush1.msra.mxu1 %v7655_v19  ;;  %2206 = vmatprep.mubr.f32.mxu0 %v7185_v4  ;;  %896 = vst [vmem:[%s7863_s4 + $0x100] sm:$0xff] %v769_v24  ;;  %6075 = vst [vmem:[%s7863_s4 + $0x2e0] sm:$0xff] %v1206_v7 }
 0x1e6   : > { %3336 = vmatprep.subr.mxu1 %v7642_v17  ;;  %2476 = vmatprep.mubr.f32.mxu1 %v7185_v4  ;;  %v771_v34 = vpop.f32.mrf.mxu1  ;;  %v1208_v8 = vpop.f32.mrf.mxu0 }
 0x1e7   : > { %3337 = vmatpush1.msra.mxu1 %v7629_v15  ;;  %897 = vst [vmem:[%s7863_s4 + $0x108] sm:$0xff] %v771_v34  ;;  %6076 = vst [vmem:[%s7863_s4 + $0x2e8] sm:$0xff] %v1208_v8  ;;  %v8042_v15 = vld [vmem:[%s9886_s1] sm:$0xff] }
 0x1e8   : > { %4234 = vmatprep.subr.mxu1 %v7753_v33  ;;  %6238 = vmatmul.mubr.msk.f32.gmra.mxu0 %vm197_vm0, %v7712_v28  ;;  %v775_v17 = vpop.f32.mrf.mxu1  ;;  %v1212_v19 = vpop.f32.mrf.mxu0  ;;  %v8050_v28 = vld [vmem:[%s9886_s1 + $0x10] sm:$0xff] }
 0x1e9   : > { %6304 = vmatmul.mubr.msk.f32.gmra.mxu1 %vm197_vm0, %v8028_v26  ;;  %2920 = vmatprep.mubr.f32.mxu0 %v7185_v4  ;;  %898 = vst [vmem:[%s7863_s4 + $0x110] sm:$0xff] %v775_v17  ;;  %6077 = vst [vmem:[%s7863_s4 + $0x2f0] sm:$0xff] %v1212_v19  ;;  %v8189_v17 = vld [vmem:[%s9886_s1 + $0x58] sm:$0xff] }
 0x1ea   : > { %2482 = vmatprep.mubr.f32.mxu1 %v7185_v4  ;;  %v777_v33 = vpop.f32.mrf.mxu1  ;;  %v1214_v9 = vpop.f32.mrf.mxu0 }
 0x1eb   : > { %899 = vst [vmem:[%s7863_s4 + $0x118] sm:$0xff] %v777_v33  ;;  %6078 = vst [vmem:[%s7863_s4 + $0x2f8] sm:$0xff] %v1214_v9 }
 0x1ec   : > { %6399 = vmatmul.mubr.msk.f32.vlgmr.msra.gmra.mxu0 %vm197_vm0, %v8042_v15  ;;  %v781_v10 = vpop.f32.mrf.mxu1  ;;  %v1218_v21 = vpop.f32.mrf.mxu0 }
 0x1ed   : > { %6305 = vmatmul.mubr.msk.f32.gmra.mxu1 %vm197_vm0, %v8050_v28  ;;  %3785 = vmatpush1.msra.mxu0 %v7705_v27  ;;  %900 = vst [vmem:[%s7863_s4 + $0x120] sm:$0xff] %v781_v10  ;;  %6079 = vst [vmem:[%s7863_s4 + $0x300] sm:$0xff] %v1218_v21  ;;  %v8204_v21 = vld [vmem:[%s9886_s1 + $0x60] sm:$0xff] }
 0x1ee   : > { %3786 = vmatprep.subr.mxu0 %v7692_v25  ;;  %2488 = vmatprep.mubr.f32.mxu1 %v7185_v4  ;;  %v783_v29 = vpop.f32.mrf.mxu1  ;;  %v1220_v47 = vpop.f32.mrf.mxu0 }
 0x1ef   : > { %3787 = vmatpush1.msra.mxu0 %v7679_v23  ;;  %2926 = vmatprep.mubr.f32.mxu0 %v7185_v4  ;;  %901 = vst [vmem:[%s7863_s4 + $0x128] sm:$0xff] %v783_v29  ;;  %6080 = vst [vmem:[%s7863_s4 + $0x308] sm:$0xff] %v1220_v47  ;;  %v8084_v23 = vld [vmem:[%s9886_s1 + $0x20] sm:$0xff] }
 0x1f0   : > { %4684 = vmatprep.subr.mxu0 %v7786_v38  ;;  %6400 = vmatmul.mubr.msk.f32.gmra.mxu0 %vm197_vm0, %v8028_v26  ;;  %v787_v25 = vpop.f32.mrf.mxu1  ;;  %v1224_v27 = vpop.f32.mrf.mxu0 }
 0x1f1   : > { %6306 = vmatmul.mubr.msk.f32.gmra.mxu1 %vm197_vm0, %v8066_v11  ;;  %2932 = vmatprep.mubr.f32.mxu0 %v7185_v4  ;;  %902 = vst [vmem:[%s7863_s4 + $0x130] sm:$0xff] %v787_v25  ;;  %6081 = vst [vmem:[%s7863_s4 + $0x310] sm:$0xff] %v1224_v27 }
 0x1f2   : > { %2494 = vmatprep.mubr.f32.mxu1 %v7185_v4  ;;  %v789_v38 = vpop.f32.mrf.mxu1  ;;  %v1226_v48 = vpop.f32.mrf.mxu0 }
 0x1f3   : > { %903 = vst [vmem:[%s7863_s4 + $0x138] sm:$0xff] %v789_v38  ;;  %6082 = vst [vmem:[%s7863_s4 + $0x318] sm:$0xff] %v1226_v48  ;;  %v8219_v38 = vld [vmem:[%s9886_s1 + $0x68] sm:$0xff] }
 0x1f4   : > { %6401 = vmatmul.mubr.msk.f32.gmra.mxu0 %vm197_vm0, %v8050_v28  ;;  %v793_v12 = vpop.f32.mrf.mxu1  ;;  %v1230_v49 = vpop.f32.mrf.mxu0 }
 0x1f5   : > { %6307 = vmatmul.mubr.msk.f32.gmra.mxu1 %vm197_vm0, %v8084_v23  ;;  %2938 = vmatprep.mubr.f32.mxu0 %v7185_v4  ;;  %904 = vst [vmem:[%s7863_s4 + $0x140] sm:$0xff] %v793_v12  ;;  %6083 = vst [vmem:[%s7863_s4 + $0x320] sm:$0xff] %v1230_v49 }
 0x1f6   : > { %2500 = vmatprep.mubr.f32.mxu1 %v7185_v4  ;;  %v795_v51 = vpop.f32.mrf.mxu1  ;;  %v1232_v13 = vpop.f32.mrf.mxu0 }
 0x1f7   : > { %905 = vst [vmem:[%s7863_s4 + $0x148] sm:$0xff] %v795_v51  ;;  %6084 = vst [vmem:[%s7863_s4 + $0x328] sm:$0xff] %v1232_v13  ;;  %v8234_v13 = vld [vmem:[%s9886_s1 + $0x70] sm:$0xff] }
 0x1f8   : > { %6402 = vmatmul.mubr.msk.f32.gmra.mxu0 %vm197_vm0, %v8066_v11  ;;  %v799_v52 = vpop.f32.mrf.mxu1  ;;  %v1236_v53 = vpop.f32.mrf.mxu0 }
 0x1f9   : > { %6308 = vmatmul.mubr.msk.f32.gmra.mxu1 %vm197_vm0, %v8099_v50  ;;  %2944 = vmatprep.mubr.f32.mxu0 %v7185_v4  ;;  %906 = vst [vmem:[%s7863_s4 + $0x150] sm:$0xff] %v799_v52  ;;  %6085 = vst [vmem:[%s7863_s4 + $0x330] sm:$0xff] %v1236_v53 }
 0x1fa   : > { %2506 = vmatprep.mubr.f32.mxu1 %v7185_v4  ;;  %v801_v14 = vpop.f32.mrf.mxu1  ;;  %v1238_v55 = vpop.f32.mrf.mxu0 }
 0x1fb   : > { %907 = vst [vmem:[%s7863_s4 + $0x158] sm:$0xff] %v801_v14  ;;  %6086 = vst [vmem:[%s7863_s4 + $0x338] sm:$0xff] %v1238_v55 }
 0x1fc   : > { %6403 = vmatmul.mubr.msk.f32.gmra.mxu0 %vm197_vm0, %v8084_v23  ;;  %v805_v56 = vpop.f32.mrf.mxu1  ;;  %v1242_v57 = vpop.f32.mrf.mxu0 }
 0x1fd   : > { %6309 = vmatmul.mubr.msk.f32.gmra.mxu1 %vm197_vm0, %v8114_v54  ;;  %2950 = vmatprep.mubr.f32.mxu0 %v7185_v4  ;;  %908 = vst [vmem:[%s7863_s4 + $0x160] sm:$0xff] %v805_v56  ;;  %6087 = vst [vmem:[%s7863_s4 + $0x340] sm:$0xff] %v1242_v57  ;;  %v8249_v56 = vld [vmem:[%s9886_s1 + $0x78] sm:$0xff] }
 0x1fe   : > { %2512 = vmatprep.mubr.f32.mxu1 %v7185_v4  ;;  %v807_v58 = vpop.f32.mrf.mxu1  ;;  %v1244_v59 = vpop.f32.mrf.mxu0 }
 0x1ff   : > { %909 = vst [vmem:[%s7863_s4 + $0x168] sm:$0xff] %v807_v58  ;;  %6088 = vst [vmem:[%s7863_s4 + $0x348] sm:$0xff] %v1244_v59 }
 0x200   : > { %6404 = vmatmul.mubr.msk.f32.gmra.mxu0 %vm197_vm0, %v8099_v50  ;;  %v811_v60 = vpop.f32.mrf.mxu1  ;;  %v1248_v18 = vpop.f32.mrf.mxu0 }
 0x201   : > { %6310 = vmatmul.mubr.msk.f32.gmra.mxu1 %vm197_vm0, %v8129_v16  ;;  %2956 = vmatprep.mubr.f32.mxu0 %v7185_v4  ;;  %910 = vst [vmem:[%s7863_s4 + $0x170] sm:$0xff] %v811_v60  ;;  %6089 = vst [vmem:[%s7863_s4 + $0x350] sm:$0xff] %v1248_v18  ;;  %v8264_v18 = vld [vmem:[%s9886_s1 + $0x80] sm:$0xff] }
 0x202   : > { %2518 = vmatprep.mubr.f32.mxu1 %v7185_v4  ;;  %v813_v62 = vpop.f32.mrf.mxu1  ;;  %v1250_v63 = vpop.f32.mrf.mxu0 }
 0x203   : > { %911 = vst [vmem:[%s7863_s4 + $0x178] sm:$0xff] %v813_v62  ;;  %6090 = vst [vmem:[%s7863_s4 + $0x358] sm:$0xff] %v1250_v63 }
 0x204   : > { %6405 = vmatmul.mubr.msk.f32.gmra.mxu0 %vm197_vm0, %v8114_v54  ;;  %v817_v20 = vpop.f32.mrf.mxu1  ;;  %v1254_v0 = vpop.f32.mrf.mxu0 }
 0x205   : > { %6311 = vmatmul.mubr.msk.f32.gmra.mxu1 %vm197_vm0, %v8144_v61  ;;  %2962 = vmatprep.mubr.f32.mxu0 %v7185_v4  ;;  %912 = vst [vmem:[%s7863_s4 + $0x180] sm:$0xff] %v817_v20  ;;  %6091 = vst [vmem:[%s7863_s4 + $0x360] sm:$0xff] %v1254_v0 }
 0x206   : > { %2524 = vmatprep.mubr.f32.mxu1 %v7185_v4  ;;  %v819_v2 = vpop.f32.mrf.mxu1  ;;  %v1256_v22 = vpop.f32.mrf.mxu0 }
 0x207   : > { %913 = vst [vmem:[%s7863_s4 + $0x188] sm:$0xff] %v819_v2  ;;  %6092 = vst [vmem:[%s7863_s4 + $0x368] sm:$0xff] %v1256_v22  ;;  %v8279_v2 = vld [vmem:[%s9886_s1 + $0x88] sm:$0xff] }
 0x208   : > { %6406 = vmatmul.mubr.msk.f32.gmra.mxu0 %vm197_vm0, %v8129_v16  ;;  %v823_v3 = vpop.f32.mrf.mxu1  ;;  %v1260_v5 = vpop.f32.mrf.mxu0 }
 0x209   : > { %6312 = vmatmul.mubr.msk.f32.gmra.mxu1 %vm197_vm0, %v8159_v1  ;;  %2968 = vmatprep.mubr.f32.mxu0 %v7185_v4  ;;  %914 = vst [vmem:[%s7863_s4 + $0x190] sm:$0xff] %v823_v3  ;;  %6093 = vst [vmem:[%s7863_s4 + $0x370] sm:$0xff] %v1260_v5 }
 0x20a   : > { %2530 = vmatprep.mubr.f32.mxu1 %v7185_v4  ;;  %v825_v24 = vpop.f32.mrf.mxu1  ;;  %v1262_v7 = vpop.f32.mrf.mxu0 }
 0x20b   : > { %915 = vst [vmem:[%s7863_s4 + $0x198] sm:$0xff] %v825_v24  ;;  %6094 = vst [vmem:[%s7863_s4 + $0x378] sm:$0xff] %v1262_v7  ;;  %v8294_v7 = vld [vmem:[%s9886_s1 + $0x90] sm:$0xff] }
 0x20c   : > { %6407 = vmatmul.mubr.msk.f32.gmra.mxu0 %vm197_vm0, %v8144_v61  ;;  %v829_v34 = vpop.f32.mrf.mxu1  ;;  %v1266_v8 = vpop.f32.mrf.mxu0 }
 0x20d   : > { %6313 = vmatmul.mubr.msk.f32.gmra.mxu1 %vm197_vm0, %v8174_v6  ;;  %2974 = vmatprep.mubr.f32.mxu0 %v7185_v4  ;;  %916 = vst [vmem:[%s7863_s4 + $0x1a0] sm:$0xff] %v829_v34  ;;  %6095 = vst [vmem:[%s7863_s4 + $0x380] sm:$0xff] %v1266_v8 }
 0x20e   : > { %2536 = vmatprep.mubr.f32.mxu1 %v7185_v4  ;;  %v831_v19 = vpop.f32.mrf.mxu1  ;;  %v1268_v33 = vpop.f32.mrf.mxu0 }
 0x20f   : > { %917 = vst [vmem:[%s7863_s4 + $0x1a8] sm:$0xff] %v831_v19  ;;  %6096 = vst [vmem:[%s7863_s4 + $0x388] sm:$0xff] %v1268_v33 }
 0x210   : > { %6408 = vmatmul.mubr.msk.f32.gmra.mxu0 %vm197_vm0, %v8159_v1  ;;  %v835_v9 = vpop.f32.mrf.mxu1  ;;  %v1272_v10 = vpop.f32.mrf.mxu0 }
 0x211   : > { %6314 = vmatmul.mubr.msk.f32.gmra.mxu1 %vm197_vm0, %v8189_v17  ;;  %2980 = vmatprep.mubr.f32.mxu0 %v7185_v4  ;;  %918 = vst [vmem:[%s7863_s4 + $0x1b0] sm:$0xff] %v835_v9  ;;  %6097 = vst [vmem:[%s7863_s4 + $0x390] sm:$0xff] %v1272_v10  ;;  %v8309_v9 = vld [vmem:[%s9886_s1 + $0x98] sm:$0xff] }
 0x212   : > { %2542 = vmatprep.mubr.f32.mxu1 %v7185_v4  ;;  %v837_v29 = vpop.f32.mrf.mxu1  ;;  %v1274_v47 = vpop.f32.mrf.mxu0 }
 0x213   : > { %919 = vst [vmem:[%s7863_s4 + $0x1b8] sm:$0xff] %v837_v29  ;;  %6098 = vst [vmem:[%s7863_s4 + $0x398] sm:$0xff] %v1274_v47 }
 0x214   : > { %6409 = vmatmul.mubr.msk.f32.gmra.mxu0 %vm197_vm0, %v8174_v6  ;;  %v841_v25 = vpop.f32.mrf.mxu1  ;;  %v1278_v27 = vpop.f32.mrf.mxu0 }
 0x215   : > { %6315 = vmatmul.mubr.msk.f32.gmra.mxu1 %vm197_vm0, %v8204_v21  ;;  %2986 = vmatprep.mubr.f32.mxu0 %v7185_v4  ;;  %920 = vst [vmem:[%s7863_s4 + $0x1c0] sm:$0xff] %v841_v25  ;;  %6099 = vst [vmem:[%s7863_s4 + $0x3a0] sm:$0xff] %v1278_v27  ;;  %v8324_v27 = vld [vmem:[%s9886_s1 + $0xa0] sm:$0xff] }
 0x216   : > { %2548 = vmatprep.mubr.f32.mxu1 %v7185_v4  ;;  %v843_v48 = vpop.f32.mrf.mxu1  ;;  %v1280_v12 = vpop.f32.mrf.mxu0 }
 0x217   : > { %921 = vst [vmem:[%s7863_s4 + $0x1c8] sm:$0xff] %v843_v48  ;;  %6100 = vst [vmem:[%s7863_s4 + $0x3a8] sm:$0xff] %v1280_v12 }
 0x218   : > { %6410 = vmatmul.mubr.msk.f32.gmra.mxu0 %vm197_vm0, %v8189_v17  ;;  %v847_v49 = vpop.f32.mrf.mxu1  ;;  %v1284_v51 = vpop.f32.mrf.mxu0 }
 0x219   : > { %6316 = vmatmul.mubr.msk.f32.gmra.mxu1 %vm197_vm0, %v8219_v38  ;;  %2992 = vmatprep.mubr.f32.mxu0 %v7185_v4  ;;  %922 = vst [vmem:[%s7863_s4 + $0x1d0] sm:$0xff] %v847_v49  ;;  %6101 = vst [vmem:[%s7863_s4 + $0x3b0] sm:$0xff] %v1284_v51 }
 0x21a   : > { %2554 = vmatprep.mubr.f32.mxu1 %v7185_v4  ;;  %v849_v52 = vpop.f32.mrf.mxu1  ;;  %v1286_v53 = vpop.f32.mrf.mxu0 }
 0x21b   : > { %923 = vst [vmem:[%s7863_s4 + $0x1d8] sm:$0xff] %v849_v52  ;;  %6102 = vst [vmem:[%s7863_s4 + $0x3b8] sm:$0xff] %v1286_v53  ;;  %v8339_v52 = vld [vmem:[%s9886_s1 + $0xa8] sm:$0xff] }
 0x21c   : > { %6411 = vmatmul.mubr.msk.f32.gmra.mxu0 %vm197_vm0, %v8204_v21  ;;  %v853_v14 = vpop.f32.mrf.mxu1  ;;  %v1290_v55 = vpop.f32.mrf.mxu0 }
 0x21d   : > { %6317 = vmatmul.mubr.msk.f32.gmra.mxu1 %vm197_vm0, %v8234_v13  ;;  %2998 = vmatprep.mubr.f32.mxu0 %v7185_v4  ;;  %924 = vst [vmem:[%s7863_s4 + $0x1e0] sm:$0xff] %v853_v14  ;;  %6103 = vst [vmem:[%s7863_s4 + $0x3c0] sm:$0xff] %v1290_v55 }
 0x21e   : > { %2560 = vmatprep.mubr.f32.mxu1 %v7185_v4  ;;  %v855_v57 = vpop.f32.mrf.mxu1  ;;  %v1292_v58 = vpop.f32.mrf.mxu0 }
 0x21f   : > { %925 = vst [vmem:[%s7863_s4 + $0x1e8] sm:$0xff] %v855_v57  ;;  %6104 = vst [vmem:[%s7863_s4 + $0x3c8] sm:$0xff] %v1292_v58  ;;  %v8354_v58 = vld [vmem:[%s9886_s1 + $0xb0] sm:$0xff] }
 0x220   : > { %6412 = vmatmul.mubr.msk.f32.gmra.mxu0 %vm197_vm0, %v8219_v38  ;;  %v859_v59 = vpop.f32.mrf.mxu1  ;;  %v1296_v60 = vpop.f32.mrf.mxu0 }
 0x221   : > { %6318 = vmatmul.mubr.msk.f32.gmra.mxu1 %vm197_vm0, %v8249_v56  ;;  %3004 = vmatprep.mubr.f32.mxu0 %v7185_v4  ;;  %926 = vst [vmem:[%s7863_s4 + $0x1f0] sm:$0xff] %v859_v59  ;;  %6105 = vst [vmem:[%s7863_s4 + $0x3d0] sm:$0xff] %v1296_v60 }
 0x222   : > { %2566 = vmatprep.mubr.f32.mxu1 %v7185_v4  ;;  %v861_v62 = vpop.f32.mrf.mxu1  ;;  %v1298_v63 = vpop.f32.mrf.mxu0 }
 0x223   : > { %927 = vst [vmem:[%s7863_s4 + $0x1f8] sm:$0xff] %v861_v62  ;;  %6106 = vst [vmem:[%s7863_s4 + $0x3d8] sm:$0xff] %v1298_v63 }
 0x224   : > { %6413 = vmatmul.mubr.msk.f32.gmra.mxu0 %vm197_vm0, %v8234_v13  ;;  %v1302_v20 = vpop.f32.mrf.mxu0  ;;  %v1572_v0 = vpop.f32.mrf.mxu1 }
 0x225   : > { %6319 = vmatmul.mubr.msk.f32.gmra.mxu1 %vm197_vm0, %v8264_v18  ;;  %3010 = vmatprep.mubr.f32.mxu0 %v7185_v4  ;;  %6107 = vst [vmem:[%s7863_s4 + $0x3e0] sm:$0xff] %v1302_v20  ;;  %6143 = vst [vmem:[%s7863_s4 + $0x400] sm:$0xff] %v1572_v0  ;;  %v8369_v20 = vld [vmem:[%s9886_s1 + $0xb8] sm:$0xff] }
 0x226   : > { %2572 = vmatprep.mubr.f32.mxu1 %v7185_v4  ;;  %v1304_v22 = vpop.f32.mrf.mxu0  ;;  %v1574_v3 = vpop.f32.mrf.mxu1 }
 0x227   : > { %6108 = vst [vmem:[%s7863_s4 + $0x3e8] sm:$0xff] %v1304_v22  ;;  %6144 = vst [vmem:[%s7863_s4 + $0x408] sm:$0xff] %v1574_v3 }
 0x228   : > { %6414 = vmatmul.mubr.msk.f32.gmra.mxu0 %vm197_vm0, %v8249_v56  ;;  %v1308_v5 = vpop.f32.mrf.mxu0  ;;  %v1578_v24 = vpop.f32.mrf.mxu1 }
 0x229   : > { %6320 = vmatmul.mubr.msk.f32.gmra.mxu1 %vm197_vm0, %v8279_v2  ;;  %3016 = vmatprep.mubr.f32.mxu0 %v7185_v4  ;;  %6109 = vst [vmem:[%s7863_s4 + $0x3f0] sm:$0xff] %v1308_v5  ;;  %6145 = vst [vmem:[%s7863_s4 + $0x410] sm:$0xff] %v1578_v24  ;;  %v8384_v24 = vld [vmem:[%s9886_s1 + $0xc0] sm:$0xff] }
 0x22a   : > { %2578 = vmatprep.mubr.f32.mxu1 %v7185_v4  ;;  %v1310_v34 = vpop.f32.mrf.mxu0  ;;  %v1580_v8 = vpop.f32.mrf.mxu1 }
 0x22b   : > { %6110 = vst [vmem:[%s7863_s4 + $0x3f8] sm:$0xff] %v1310_v34  ;;  %6146 = vst [vmem:[%s7863_s4 + $0x418] sm:$0xff] %v1580_v8 }
 0x22c   : > { %6415 = vmatmul.mubr.msk.f32.gmra.mxu0 %vm197_vm0, %v8264_v18  ;;  %v1584_v19 = vpop.f32.mrf.mxu1  ;;  %v2022_v33 = vpop.f32.mrf.mxu0 }
 0x22d   : > { %6321 = vmatmul.mubr.msk.f32.gmra.mxu1 %vm197_vm0, %v8294_v7  ;;  %3022 = vmatprep.mubr.f32.mxu0 %v7185_v4  ;;  %6147 = vst [vmem:[%s7863_s4 + $0x420] sm:$0xff] %v1584_v19  ;;  %6239 = vst [vmem:[%s7863_s4 + $0x600] sm:$0xff] %v2022_v33 }
 0x22e   : > { %2584 = vmatprep.mubr.f32.mxu1 %v7185_v4  ;;  %v1586_v10 = vpop.f32.mrf.mxu1  ;;  %v2024_v29 = vpop.f32.mrf.mxu0 }
 0x22f   : > { %6148 = vst [vmem:[%s7863_s4 + $0x428] sm:$0xff] %v1586_v10  ;;  %6240 = vst [vmem:[%s7863_s4 + $0x608] sm:$0xff] %v2024_v29  ;;  %v8399_v10 = vld [vmem:[%s9886_s1 + $0xc8] sm:$0xff] }
 0x230   : > { %6416 = vmatmul.mubr.msk.f32.gmra.mxu0 %vm197_vm0, %v8279_v2  ;;  %v1590_v47 = vpop.f32.mrf.mxu1  ;;  %v2028_v25 = vpop.f32.mrf.mxu0 }
 0x231   : > { %6322 = vmatmul.mubr.msk.f32.gmra.mxu1 %vm197_vm0, %v8309_v9  ;;  %3028 = vmatprep.mubr.f32.mxu0 %v7185_v4  ;;  %6149 = vst [vmem:[%s7863_s4 + $0x430] sm:$0xff] %v1590_v47  ;;  %6241 = vst [vmem:[%s7863_s4 + $0x610] sm:$0xff] %v2028_v25 }
 0x232   : > { %2590 = vmatprep.mubr.f32.mxu1 %v7185_v4  ;;  %v1592_v48 = vpop.f32.mrf.mxu1  ;;  %v2030_v12 = vpop.f32.mrf.mxu0 }
 0x233   : > { %6150 = vst [vmem:[%s7863_s4 + $0x438] sm:$0xff] %v1592_v48  ;;  %6242 = vst [vmem:[%s7863_s4 + $0x618] sm:$0xff] %v2030_v12  ;;  %v8414_v12 = vld [vmem:[%s9886_s1 + $0xd0] sm:$0xff] }
 0x234   : > { %6417 = vmatmul.mubr.msk.f32.gmra.mxu0 %vm197_vm0, %v8294_v7  ;;  %v1596_v49 = vpop.f32.mrf.mxu1  ;;  %v2034_v51 = vpop.f32.mrf.mxu0 }
 0x235   : > { %6323 = vmatmul.mubr.msk.f32.gmra.mxu1 %vm197_vm0, %v8324_v27  ;;  %3034 = vmatprep.mubr.f32.mxu0 %v7185_v4  ;;  %6151 = vst [vmem:[%s7863_s4 + $0x440] sm:$0xff] %v1596_v49  ;;  %6243 = vst [vmem:[%s7863_s4 + $0x620] sm:$0xff] %v2034_v51 }
 0x236   : > { %2596 = vmatprep.mubr.f32.mxu1 %v7185_v4  ;;  %v1598_v53 = vpop.f32.mrf.mxu1  ;;  %v2036_v14 = vpop.f32.mrf.mxu0 }
 0x237   : > { %6152 = vst [vmem:[%s7863_s4 + $0x448] sm:$0xff] %v1598_v53  ;;  %6244 = vst [vmem:[%s7863_s4 + $0x628] sm:$0xff] %v2036_v14 }
 0x238   : > { %6418 = vmatmul.mubr.msk.f32.gmra.mxu0 %vm197_vm0, %v8309_v9  ;;  %v1602_v55 = vpop.f32.mrf.mxu1  ;;  %v2040_v57 = vpop.f32.mrf.mxu0 }
 0x239   : > { %6324 = vmatmul.mubr.msk.f32.gmra.mxu1 %vm197_vm0, %v8339_v52  ;;  %3040 = vmatprep.mubr.f32.mxu0 %v7185_v4  ;;  %6153 = vst [vmem:[%s7863_s4 + $0x450] sm:$0xff] %v1602_v55  ;;  %6245 = vst [vmem:[%s7863_s4 + $0x630] sm:$0xff] %v2040_v57  ;;  %v8429_v55 = vld [vmem:[%s9886_s1 + $0xd8] sm:$0xff] }
 0x23a   : > { %2602 = vmatprep.mubr.f32.mxu1 %v7185_v4  ;;  %v1604_v59 = vpop.f32.mrf.mxu1  ;;  %v2042_v60 = vpop.f32.mrf.mxu0 }
 0x23b   : > { %6154 = vst [vmem:[%s7863_s4 + $0x458] sm:$0xff] %v1604_v59  ;;  %6246 = vst [vmem:[%s7863_s4 + $0x638] sm:$0xff] %v2042_v60 }
 0x23c   : > { %6419 = vmatmul.mubr.msk.f32.gmra.mxu0 %vm197_vm0, %v8324_v27  ;;  %v1608_v62 = vpop.f32.mrf.mxu1  ;;  %v2046_v63 = vpop.f32.mrf.mxu0 }
 0x23d   : > { %6325 = vmatmul.mubr.msk.f32.gmra.mxu1 %vm197_vm0, %v8354_v58  ;;  %3046 = vmatprep.mubr.f32.mxu0 %v7185_v4  ;;  %6155 = vst [vmem:[%s7863_s4 + $0x460] sm:$0xff] %v1608_v62  ;;  %6247 = vst [vmem:[%s7863_s4 + $0x640] sm:$0xff] %v2046_v63  ;;  %v8444_v63 = vld [vmem:[%s9886_s1 + $0xe0] sm:$0xff] }
 0x23e   : > { %2608 = vmatprep.mubr.f32.mxu1 %v7185_v4  ;;  %v1610_v0 = vpop.f32.mrf.mxu1  ;;  %v2048_v22 = vpop.f32.mrf.mxu0 }
 0x23f   : > { %6156 = vst [vmem:[%s7863_s4 + $0x468] sm:$0xff] %v1610_v0  ;;  %6248 = vst [vmem:[%s7863_s4 + $0x648] sm:$0xff] %v2048_v22 }
 0x240   : > { %6420 = vmatmul.mubr.msk.f32.gmra.mxu0 %vm197_vm0, %v8339_v52  ;;  %v1614_v3 = vpop.f32.mrf.mxu1  ;;  %v2052_v5 = vpop.f32.mrf.mxu0 }
 0x241   : > { %6326 = vmatmul.mubr.msk.f32.gmra.mxu1 %vm197_vm0, %v8369_v20  ;;  %3052 = vmatprep.mubr.f32.mxu0 %v7185_v4  ;;  %6157 = vst [vmem:[%s7863_s4 + $0x470] sm:$0xff] %v1614_v3  ;;  %6249 = vst [vmem:[%s7863_s4 + $0x650] sm:$0xff] %v2052_v5 }
 0x242   : > { %2614 = vmatprep.mubr.f32.mxu1 %v7185_v4  ;;  %v1616_v34 = vpop.f32.mrf.mxu1  ;;  %v2054_v8 = vpop.f32.mrf.mxu0 }
 0x243   : > { %6158 = vst [vmem:[%s7863_s4 + $0x478] sm:$0xff] %v1616_v34  ;;  %6250 = vst [vmem:[%s7863_s4 + $0x658] sm:$0xff] %v2054_v8  ;;  %v8459_v34 = vld [vmem:[%s9886_s1 + $0xe8] sm:$0xff] }
 0x244   : > { %6421 = vmatmul.mubr.msk.f32.gmra.mxu0 %vm197_vm0, %v8354_v58  ;;  %v1620_v19 = vpop.f32.mrf.mxu1  ;;  %v2058_v33 = vpop.f32.mrf.mxu0 }
 0x245   : > { %6327 = vmatmul.mubr.msk.f32.gmra.mxu1 %vm197_vm0, %v8384_v24  ;;  %3058 = vmatprep.mubr.f32.mxu0 %v7185_v4  ;;  %6159 = vst [vmem:[%s7863_s4 + $0x480] sm:$0xff] %v1620_v19  ;;  %6251 = vst [vmem:[%s7863_s4 + $0x660] sm:$0xff] %v2058_v33 }
 0x246   : > { %2620 = vmatprep.mubr.f32.mxu1 %v7185_v4  ;;  %v1622_v29 = vpop.f32.mrf.mxu1  ;;  %v2060_v47 = vpop.f32.mrf.mxu0 }
 0x247   : > { %6160 = vst [vmem:[%s7863_s4 + $0x488] sm:$0xff] %v1622_v29  ;;  %6252 = vst [vmem:[%s7863_s4 + $0x668] sm:$0xff] %v2060_v47  ;;  %v8474_v47 = vld [vmem:[%s9886_s1 + $0xf0] sm:$0xff] }
 0x248   : > { %6422 = vmatmul.mubr.msk.f32.gmra.mxu0 %vm197_vm0, %v8369_v20  ;;  %v1626_v25 = vpop.f32.mrf.mxu1  ;;  %v2064_v48 = vpop.f32.mrf.mxu0 }
 0x249   : > { %6328 = vmatmul.mubr.msk.f32.gmra.mxu1 %vm197_vm0, %v8399_v10  ;;  %3064 = vmatprep.mubr.f32.mxu0 %v7185_v4  ;;  %6161 = vst [vmem:[%s7863_s4 + $0x490] sm:$0xff] %v1626_v25  ;;  %6253 = vst [vmem:[%s7863_s4 + $0x670] sm:$0xff] %v2064_v48 }
 0x24a   : > { %2626 = vmatprep.mubr.f32.mxu1 %v7185_v4  ;;  %v1628_v49 = vpop.f32.mrf.mxu1  ;;  %v2066_v51 = vpop.f32.mrf.mxu0 }
 0x24b   : > { %6162 = vst [vmem:[%s7863_s4 + $0x498] sm:$0xff] %v1628_v49  ;;  %6254 = vst [vmem:[%s7863_s4 + $0x678] sm:$0xff] %v2066_v51 }
 0x24c   : > { %6423 = vmatmul.mubr.msk.f32.gmra.mxu0 %vm197_vm0, %v8384_v24  ;;  %v1632_v53 = vpop.f32.mrf.mxu1  ;;  %v2070_v14 = vpop.f32.mrf.mxu0 }
 0x24d   : > { %6329 = vmatmul.mubr.msk.f32.gmra.mxu1 %vm197_vm0, %v8414_v12  ;;  %3070 = vmatprep.mubr.f32.mxu0 %v7185_v4  ;;  %6163 = vst [vmem:[%s7863_s4 + $0x4a0] sm:$0xff] %v1632_v53  ;;  %6255 = vst [vmem:[%s7863_s4 + $0x680] sm:$0xff] %v2070_v14  ;;  %v8489_v53 = vld [vmem:[%s9886_s1 + $0xf8] sm:$0xff] }
 0x24e   : > { %2632 = vmatprep.mubr.f32.mxu1 %v7185_v4  ;;  %v1634_v57 = vpop.f32.mrf.mxu1  ;;  %v2072_v59 = vpop.f32.mrf.mxu0 }
 0x24f   : > { %6164 = vst [vmem:[%s7863_s4 + $0x4a8] sm:$0xff] %v1634_v57  ;;  %6256 = vst [vmem:[%s7863_s4 + $0x688] sm:$0xff] %v2072_v59 }
 0x250   : > { %6424 = vmatmul.mubr.msk.f32.gmra.mxu0 %vm197_vm0, %v8399_v10  ;;  %v1638_v60 = vpop.f32.mrf.mxu1  ;;  %v2076_v62 = vpop.f32.mrf.mxu0 }
 0x251   : > { %6330 = vmatmul.mubr.msk.f32.gmra.mxu1 %vm197_vm0, %v8429_v55  ;;  %3076 = vmatprep.mubr.f32.mxu0 %v7185_v4  ;;  %6165 = vst [vmem:[%s7863_s4 + $0x4b0] sm:$0xff] %v1638_v60  ;;  %6257 = vst [vmem:[%s7863_s4 + $0x690] sm:$0xff] %v2076_v62 }
 0x252   : > { %2638 = vmatprep.mubr.f32.mxu1 %v7185_v4  ;;  %v1640_v0 = vpop.f32.mrf.mxu1  ;;  %v2078_v22 = vpop.f32.mrf.mxu0 }
 0x253   : > { %6166 = vst [vmem:[%s7863_s4 + $0x4b8] sm:$0xff] %v1640_v0  ;;  %6258 = vst [vmem:[%s7863_s4 + $0x698] sm:$0xff] %v2078_v22 }
 0x254   : > { %6425 = vmatmul.mubr.msk.f32.gmra.mxu0 %vm197_vm0, %v8414_v12  ;;  %v1644_v3 = vpop.f32.mrf.mxu1  ;;  %v2082_v5 = vpop.f32.mrf.mxu0 }
 0x255   : > { %6331 = vmatmul.mubr.msk.f32.gmra.mxu1 %vm197_vm0, %v8444_v63  ;;  %3082 = vmatprep.mubr.f32.mxu0 %v7185_v4  ;;  %6167 = vst [vmem:[%s7863_s4 + $0x4c0] sm:$0xff] %v1644_v3  ;;  %6259 = vst [vmem:[%s7863_s4 + $0x6a0] sm:$0xff] %v2082_v5 }
 0x256   : > { %2644 = vmatprep.mubr.f32.mxu1 %v7185_v4  ;;  %v1646_v8 = vpop.f32.mrf.mxu1  ;;  %v2084_v19 = vpop.f32.mrf.mxu0 }
 0x257   : > { %6168 = vst [vmem:[%s7863_s4 + $0x4c8] sm:$0xff] %v1646_v8  ;;  %6260 = vst [vmem:[%s7863_s4 + $0x6a8] sm:$0xff] %v2084_v19 }
 0x258   : > { %6426 = vmatmul.mubr.msk.f32.gmra.mxu0 %vm197_vm0, %v8429_v55  ;;  %v1650_v33 = vpop.f32.mrf.mxu1  ;;  %v2088_v29 = vpop.f32.mrf.mxu0 }
 0x259   : > { %6332 = vmatmul.mubr.msk.f32.gmra.mxu1 %vm197_vm0, %v8459_v34  ;;  %3088 = vmatprep.mubr.f32.mxu0 %v7185_v4  ;;  %6169 = vst [vmem:[%s7863_s4 + $0x4d0] sm:$0xff] %v1650_v33  ;;  %6261 = vst [vmem:[%s7863_s4 + $0x6b0] sm:$0xff] %v2088_v29 }
 0x25a   : > { %2650 = vmatprep.mubr.f32.mxu1 %v7185_v4  ;;  %v1652_v25 = vpop.f32.mrf.mxu1  ;;  %v2090_v48 = vpop.f32.mrf.mxu0 }
 0x25b   : > { %6170 = vst [vmem:[%s7863_s4 + $0x4d8] sm:$0xff] %v1652_v25  ;;  %6262 = vst [vmem:[%s7863_s4 + $0x6b8] sm:$0xff] %v2090_v48 }
 0x25c   : > { %6427 = vmatmul.mubr.msk.f32.gmra.mxu0 %vm197_vm0, %v8444_v63  ;;  %v1656_v49 = vpop.f32.mrf.mxu1  ;;  %v2094_v51 = vpop.f32.mrf.mxu0 }
 0x25d   : > { %6333 = vmatmul.mubr.msk.f32.gmra.mxu1 %vm197_vm0, %v8474_v47  ;;  %3094 = vmatprep.mubr.f32.mxu0 %v7185_v4  ;;  %6171 = vst [vmem:[%s7863_s4 + $0x4e0] sm:$0xff] %v1656_v49  ;;  %6263 = vst [vmem:[%s7863_s4 + $0x6c0] sm:$0xff] %v2094_v51 }
 0x25e   : > { %2656 = vmatprep.mubr.f32.mxu1 %v7185_v4  ;;  %v1658_v14 = vpop.f32.mrf.mxu1  ;;  %v2096_v57 = vpop.f32.mrf.mxu0 }
 0x25f   : > { %6172 = vst [vmem:[%s7863_s4 + $0x4e8] sm:$0xff] %v1658_v14  ;;  %6264 = vst [vmem:[%s7863_s4 + $0x6c8] sm:$0xff] %v2096_v57 }
 0x260   : > { %6428 = vmatmul.mubr.msk.f32.gmra.mxu0 %vm197_vm0, %v8459_v34  ;;  %v1662_v59 = vpop.f32.mrf.mxu1  ;;  %v2100_v60 = vpop.f32.mrf.mxu0 }
 0x261   : > { %6334 = vmatmul.mubr.msk.f32.gmra.mxu1 %vm197_vm0, %v8489_v53  ;;  %3100 = vmatprep.mubr.f32.mxu0 %v7185_v4  ;;  %6173 = vst [vmem:[%s7863_s4 + $0x4f0] sm:$0xff] %v1662_v59  ;;  %6265 = vst [vmem:[%s7863_s4 + $0x6d0] sm:$0xff] %v2100_v60 }
 0x262   : > { %3370 = vmatprep.mubr.f32.mxu1 %v7185_v4  ;;  %v1664_v62 = vpop.f32.mrf.mxu1  ;;  %v2102_v0 = vpop.f32.mrf.mxu0 }
 0x263   : > { %6174 = vst [vmem:[%s7863_s4 + $0x4f8] sm:$0xff] %v1664_v62  ;;  %6266 = vst [vmem:[%s7863_s4 + $0x6d8] sm:$0xff] %v2102_v0 }
 0x264   : > { %6429 = vmatmul.mubr.msk.f32.gmra.mxu0 %vm197_vm0, %v8474_v47  ;;  %v1668_v22 = vpop.f32.mrf.mxu1  ;;  %v2106_v3 = vpop.f32.mrf.mxu0 }
 0x265   : > { %6495 = vmatmul.mubr.msk.f32.vlgmr.msra.gmra.mxu1 %vm197_vm0, %v8042_v15  ;;  %3106 = vmatprep.mubr.f32.mxu0 %v7185_v4  ;;  %6175 = vst [vmem:[%s7863_s4 + $0x500] sm:$0xff] %v1668_v22  ;;  %6267 = vst [vmem:[%s7863_s4 + $0x6e0] sm:$0xff] %v2106_v3 }
 0x266   : > { %4235 = vmatpush1.msra.mxu1 %v7743_v32  ;;  %3376 = vmatprep.mubr.f32.mxu1 %v7185_v4  ;;  %v1670_v5 = vpop.f32.mrf.mxu1  ;;  %v2108_v8 = vpop.f32.mrf.mxu0 }
 0x267   : > { %4236 = vmatprep.subr.mxu1 %v7734_v31  ;;  %6176 = vst [vmem:[%s7863_s4 + $0x508] sm:$0xff] %v1670_v5  ;;  %6268 = vst [vmem:[%s7863_s4 + $0x6e8] sm:$0xff] %v2108_v8 }
 0x268   : > { %4237 = vmatpush1.msra.mxu1 %v7724_v30  ;;  %6430 = vmatmul.mubr.msk.f32.gmra.mxu0 %vm197_vm0, %v8489_v53  ;;  %v1674_v19 = vpop.f32.mrf.mxu1  ;;  %v2112_v33 = vpop.f32.mrf.mxu0 }
 0x269   : > { %5134 = vmatprep.subr.mxu1 %v7818_v42  ;;  %6496 = vmatmul.mubr.msk.f32.gmra.mxu1 %vm197_vm0, %v8028_v26  ;;  %6177 = vst [vmem:[%s7863_s4 + $0x510] sm:$0xff] %v1674_v19  ;;  %6269 = vst [vmem:[%s7863_s4 + $0x6f0] sm:$0xff] %v2112_v33 }
 0x26a   : > { %3382 = vmatprep.mubr.f32.mxu1 %v7185_v4  ;;  %3820 = vmatprep.mubr.f32.mxu0 %v7185_v4  ;;  %v1676_v31 = vpop.f32.mrf.mxu1  ;;  %v2114_v30 = vpop.f32.mrf.mxu0 }
 0x26b   : > { %6178 = vst [vmem:[%s7863_s4 + $0x518] sm:$0xff] %v1676_v31  ;;  %6270 = vst [vmem:[%s7863_s4 + $0x6f8] sm:$0xff] %v2114_v30 }
 0x26c   : > { %6591 = vmatmul.mubr.msk.f32.vlgmr.msra.gmra.mxu0 %vm197_vm0, %v8042_v15  ;;  %v1680_v32 = vpop.f32.mrf.mxu1  ;;  %v2118_v42 = vpop.f32.mrf.mxu0 }
 0x26d   : > { %6497 = vmatmul.mubr.msk.f32.gmra.mxu1 %vm197_vm0, %v8050_v28  ;;  %4685 = vmatpush1.msra.mxu0 %v7778_v37  ;;  %6179 = vst [vmem:[%s7863_s4 + $0x520] sm:$0xff] %v1680_v32  ;;  %6271 = vst [vmem:[%s7863_s4 + $0x700] sm:$0xff] %v2118_v42 }
 0x26e   : > { %4686 = vmatprep.subr.mxu0 %v7770_v36  ;;  %3388 = vmatprep.mubr.f32.mxu1 %v7185_v4  ;;  %v1682_v29 = vpop.f32.mrf.mxu1  ;;  %v2120_v25 = vpop.f32.mrf.mxu0 }
 0x26f   : > { %4687 = vmatpush1.msra.mxu0 %v7762_v35  ;;  %3826 = vmatprep.mubr.f32.mxu0 %v7185_v4  ;;  %6180 = vst [vmem:[%s7863_s4 + $0x528] sm:$0xff] %v1682_v29  ;;  %6272 = vst [vmem:[%s7863_s4 + $0x708] sm:$0xff] %v2120_v25 }
 0x270   : > { %5584 = vmatprep.subr.mxu0 %v7853_v46  ;;  %6592 = vmatmul.mubr.msk.f32.gmra.mxu0 %vm197_vm0, %v8028_v26  ;;  %v1686_v37 = vpop.f32.mrf.mxu1  ;;  %v2124_v36 = vpop.f32.mrf.mxu0 }
 0x271   : > { %6498 = vmatmul.mubr.msk.f32.gmra.mxu1 %vm197_vm0, %v8066_v11  ;;  %3832 = vmatprep.mubr.f32.mxu0 %v7185_v4  ;;  %6181 = vst [vmem:[%s7863_s4 + $0x530] sm:$0xff] %v1686_v37  ;;  %6273 = vst [vmem:[%s7863_s4 + $0x710] sm:$0xff] %v2124_v36 }
 0x272   : > { %3394 = vmatprep.mubr.f32.mxu1 %v7185_v4  ;;  %v1688_v35 = vpop.f32.mrf.mxu1  ;;  %v2126_v46 = vpop.f32.mrf.mxu0 }
 0x273   : > { %6182 = vst [vmem:[%s7863_s4 + $0x538] sm:$0xff] %v1688_v35  ;;  %6274 = vst [vmem:[%s7863_s4 + $0x718] sm:$0xff] %v2126_v46 }
 0x274   : > { %6593 = vmatmul.mubr.msk.f32.gmra.mxu0 %vm197_vm0, %v8050_v28  ;;  %v1692_v26 = vpop.f32.mrf.mxu1  ;;  %v2130_v15 = vpop.f32.mrf.mxu0 }
 0x275   : > { %6499 = vmatmul.mubr.msk.f32.gmra.mxu1 %vm197_vm0, %v8084_v23  ;;  %3838 = vmatprep.mubr.f32.mxu0 %v7185_v4  ;;  %6183 = vst [vmem:[%s7863_s4 + $0x540] sm:$0xff] %v1692_v26  ;;  %6275 = vst [vmem:[%s7863_s4 + $0x720] sm:$0xff] %v2130_v15 }
 0x276   : > { %3400 = vmatprep.mubr.f32.mxu1 %v7185_v4  ;;  %v1694_v48 = vpop.f32.mrf.mxu1  ;;  %v2132_v49 = vpop.f32.mrf.mxu0 }
 0x277   : > { %6184 = vst [vmem:[%s7863_s4 + $0x548] sm:$0xff] %v1694_v48  ;;  %6276 = vst [vmem:[%s7863_s4 + $0x728] sm:$0xff] %v2132_v49 }
 0x278   : > { %6594 = vmatmul.mubr.msk.f32.gmra.mxu0 %vm197_vm0, %v8066_v11  ;;  %v1698_v28 = vpop.f32.mrf.mxu1  ;;  %v2136_v51 = vpop.f32.mrf.mxu0 }
 0x279   : > { %6500 = vmatmul.mubr.msk.f32.gmra.mxu1 %vm197_vm0, %v8099_v50  ;;  %3844 = vmatprep.mubr.f32.mxu0 %v7185_v4  ;;  %6185 = vst [vmem:[%s7863_s4 + $0x550] sm:$0xff] %v1698_v28  ;;  %6277 = vst [vmem:[%s7863_s4 + $0x730] sm:$0xff] %v2136_v51 }
 0x27a   : > { %3406 = vmatprep.mubr.f32.mxu1 %v7185_v4  ;;  %v1700_v14 = vpop.f32.mrf.mxu1  ;;  %v2138_v57 = vpop.f32.mrf.mxu0 }
 0x27b   : > { %6186 = vst [vmem:[%s7863_s4 + $0x558] sm:$0xff] %v1700_v14  ;;  %6278 = vst [vmem:[%s7863_s4 + $0x738] sm:$0xff] %v2138_v57 }
 0x27c   : > { %6595 = vmatmul.mubr.msk.f32.gmra.mxu0 %vm197_vm0, %v8084_v23  ;;  %v1704_v11 = vpop.f32.mrf.mxu1  ;;  %v2142_v59 = vpop.f32.mrf.mxu0 }
 0x27d   : > { %6501 = vmatmul.mubr.msk.f32.gmra.mxu1 %vm197_vm0, %v8114_v54  ;;  %3850 = vmatprep.mubr.f32.mxu0 %v7185_v4  ;;  %6187 = vst [vmem:[%s7863_s4 + $0x560] sm:$0xff] %v1704_v11  ;;  %6279 = vst [vmem:[%s7863_s4 + $0x740] sm:$0xff] %v2142_v59 }
 0x27e   : > { %3412 = vmatprep.mubr.f32.mxu1 %v7185_v4  ;;  %v1706_v60 = vpop.f32.mrf.mxu1  ;;  %v2144_v62 = vpop.f32.mrf.mxu0 }
 0x27f   : > { %6188 = vst [vmem:[%s7863_s4 + $0x568] sm:$0xff] %v1706_v60  ;;  %6280 = vst [vmem:[%s7863_s4 + $0x748] sm:$0xff] %v2144_v62 }
 0x280   : > { %6596 = vmatmul.mubr.msk.f32.gmra.mxu0 %vm197_vm0, %v8099_v50  ;;  %v1710_v23 = vpop.f32.mrf.mxu1  ;;  %v2148_v0 = vpop.f32.mrf.mxu0 }
 0x281   : > { %6502 = vmatmul.mubr.msk.f32.gmra.mxu1 %vm197_vm0, %v8129_v16  ;;  %3856 = vmatprep.mubr.f32.mxu0 %v7185_v4  ;;  %6189 = vst [vmem:[%s7863_s4 + $0x570] sm:$0xff] %v1710_v23  ;;  %6281 = vst [vmem:[%s7863_s4 + $0x750] sm:$0xff] %v2148_v0 }
 0x282   : > { %3418 = vmatprep.mubr.f32.mxu1 %v7185_v4  ;;  %v1712_v22 = vpop.f32.mrf.mxu1  ;;  %v2150_v3 = vpop.f32.mrf.mxu0 }
 0x283   : > { %6190 = vst [vmem:[%s7863_s4 + $0x578] sm:$0xff] %v1712_v22  ;;  %6282 = vst [vmem:[%s7863_s4 + $0x758] sm:$0xff] %v2150_v3 }
 0x284   : > { %6597 = vmatmul.mubr.msk.f32.gmra.mxu0 %vm197_vm0, %v8114_v54  ;;  %v1716_v50 = vpop.f32.mrf.mxu1  ;;  %v2154_v5 = vpop.f32.mrf.mxu0 }
 0x285   : > { %6503 = vmatmul.mubr.msk.f32.gmra.mxu1 %vm197_vm0, %v8144_v61  ;;  %3862 = vmatprep.mubr.f32.mxu0 %v7185_v4  ;;  %6191 = vst [vmem:[%s7863_s4 + $0x580] sm:$0xff] %v1716_v50  ;;  %6283 = vst [vmem:[%s7863_s4 + $0x760] sm:$0xff] %v2154_v5 }
 0x286   : > { %3424 = vmatprep.mubr.f32.mxu1 %v7185_v4  ;;  %v1718_v8 = vpop.f32.mrf.mxu1  ;;  %v2156_v19 = vpop.f32.mrf.mxu0 }
 0x287   : > { %6192 = vst [vmem:[%s7863_s4 + $0x588] sm:$0xff] %v1718_v8  ;;  %6284 = vst [vmem:[%s7863_s4 + $0x768] sm:$0xff] %v2156_v19 }
 0x288   : > { %6598 = vmatmul.mubr.msk.f32.gmra.mxu0 %vm197_vm0, %v8129_v16  ;;  %v1722_v54 = vpop.f32.mrf.mxu1  ;;  %v2160_v33 = vpop.f32.mrf.mxu0 }
 0x289   : > { %6504 = vmatmul.mubr.msk.f32.gmra.mxu1 %vm197_vm0, %v8159_v1  ;;  %3868 = vmatprep.mubr.f32.mxu0 %v7185_v4  ;;  %6193 = vst [vmem:[%s7863_s4 + $0x590] sm:$0xff] %v1722_v54  ;;  %6285 = vst [vmem:[%s7863_s4 + $0x770] sm:$0xff] %v2160_v33 }
 0x28a   : > { %3430 = vmatprep.mubr.f32.mxu1 %v7185_v4  ;;  %v1724_v31 = vpop.f32.mrf.mxu1  ;;  %v2162_v30 = vpop.f32.mrf.mxu0 }
 0x28b   : > { %6194 = vst [vmem:[%s7863_s4 + $0x598] sm:$0xff] %v1724_v31  ;;  %6286 = vst [vmem:[%s7863_s4 + $0x778] sm:$0xff] %v2162_v30 }
 0x28c   : > { %6599 = vmatmul.mubr.msk.f32.gmra.mxu0 %vm197_vm0, %v8144_v61  ;;  %v1728_v16 = vpop.f32.mrf.mxu1  ;;  %v2166_v32 = vpop.f32.mrf.mxu0 }
 0x28d   : > { %6505 = vmatmul.mubr.msk.f32.gmra.mxu1 %vm197_vm0, %v8174_v6  ;;  %3874 = vmatprep.mubr.f32.mxu0 %v7185_v4  ;;  %6195 = vst [vmem:[%s7863_s4 + $0x5a0] sm:$0xff] %v1728_v16  ;;  %6287 = vst [vmem:[%s7863_s4 + $0x780] sm:$0xff] %v2166_v32 }
 0x28e   : > { %3436 = vmatprep.mubr.f32.mxu1 %v7185_v4  ;;  %v1730_v42 = vpop.f32.mrf.mxu1  ;;  %v2168_v29 = vpop.f32.mrf.mxu0 }
 0x28f   : > { %6196 = vst [vmem:[%s7863_s4 + $0x5a8] sm:$0xff] %v1730_v42  ;;  %6288 = vst [vmem:[%s7863_s4 + $0x788] sm:$0xff] %v2168_v29 }
 0x290   : > { %6600 = vmatmul.mubr.msk.f32.gmra.mxu0 %vm197_vm0, %v8159_v1  ;;  %v1734_v61 = vpop.f32.mrf.mxu1  ;;  %v2172_v25 = vpop.f32.mrf.mxu0 }
 0x291   : > { %6506 = vmatmul.mubr.msk.f32.gmra.mxu1 %vm197_vm0, %v8189_v17  ;;  %3880 = vmatprep.mubr.f32.mxu0 %v7185_v4  ;;  %6197 = vst [vmem:[%s7863_s4 + $0x5b0] sm:$0xff] %v1734_v61  ;;  %6289 = vst [vmem:[%s7863_s4 + $0x790] sm:$0xff] %v2172_v25 }
 0x292   : > { %3442 = vmatprep.mubr.f32.mxu1 %v7185_v4  ;;  %v1736_v37 = vpop.f32.mrf.mxu1  ;;  %v2174_v36 = vpop.f32.mrf.mxu0 }
 0x293   : > { %6198 = vst [vmem:[%s7863_s4 + $0x5b8] sm:$0xff] %v1736_v37  ;;  %6290 = vst [vmem:[%s7863_s4 + $0x798] sm:$0xff] %v2174_v36 }
 0x294   : > { %6601 = vmatmul.mubr.msk.f32.gmra.mxu0 %vm197_vm0, %v8174_v6  ;;  %v1740_v1 = vpop.f32.mrf.mxu1  ;;  %v2178_v35 = vpop.f32.mrf.mxu0 }
 0x295   : > { %6507 = vmatmul.mubr.msk.f32.gmra.mxu1 %vm197_vm0, %v8204_v21  ;;  %3886 = vmatprep.mubr.f32.mxu0 %v7185_v4  ;;  %6199 = vst [vmem:[%s7863_s4 + $0x5c0] sm:$0xff] %v1740_v1  ;;  %6291 = vst [vmem:[%s7863_s4 + $0x7a0] sm:$0xff] %v2178_v35 }
 0x296   : > { %3448 = vmatprep.mubr.f32.mxu1 %v7185_v4  ;;  %v1742_v46 = vpop.f32.mrf.mxu1  ;;  %v2180_v26 = vpop.f32.mrf.mxu0 }
 0x297   : > { %6200 = vst [vmem:[%s7863_s4 + $0x5c8] sm:$0xff] %v1742_v46  ;;  %6292 = vst [vmem:[%s7863_s4 + $0x7a8] sm:$0xff] %v2180_v26 }
 0x298   : > { %6602 = vmatmul.mubr.msk.f32.gmra.mxu0 %vm197_vm0, %v8189_v17  ;;  %v1746_v6 = vpop.f32.mrf.mxu1  ;;  %v2184_v15 = vpop.f32.mrf.mxu0 }
 0x299   : > { %6508 = vmatmul.mubr.msk.f32.gmra.mxu1 %vm197_vm0, %v8219_v38  ;;  %3892 = vmatprep.mubr.f32.mxu0 %v7185_v4  ;;  %6201 = vst [vmem:[%s7863_s4 + $0x5d0] sm:$0xff] %v1746_v6  ;;  %6293 = vst [vmem:[%s7863_s4 + $0x7b0] sm:$0xff] %v2184_v15 }
 0x29a   : > { %3454 = vmatprep.mubr.f32.mxu1 %v7185_v4  ;;  %v1748_v48 = vpop.f32.mrf.mxu1  ;;  %v2186_v49 = vpop.f32.mrf.mxu0 }
 0x29b   : > { %6202 = vst [vmem:[%s7863_s4 + $0x5d8] sm:$0xff] %v1748_v48  ;;  %6294 = vst [vmem:[%s7863_s4 + $0x7b8] sm:$0xff] %v2186_v49 }
 0x29c   : > { %6603 = vmatmul.mubr.msk.f32.gmra.mxu0 %vm197_vm0, %v8204_v21  ;;  %v1752_v17 = vpop.f32.mrf.mxu1  ;;  %v2190_v28 = vpop.f32.mrf.mxu0 }
 0x29d   : > { %6509 = vmatmul.mubr.msk.f32.gmra.mxu1 %vm197_vm0, %v8234_v13  ;;  %3898 = vmatprep.mubr.f32.mxu0 %v7185_v4  ;;  %6203 = vst [vmem:[%s7863_s4 + $0x5e0] sm:$0xff] %v1752_v17  ;;  %6295 = vst [vmem:[%s7863_s4 + $0x7c0] sm:$0xff] %v2190_v28 }
 0x29e   : > { %3460 = vmatprep.mubr.f32.mxu1 %v7185_v4  ;;  %v1754_v51 = vpop.f32.mrf.mxu1  ;;  %v2192_v14 = vpop.f32.mrf.mxu0 }
 0x29f   : > { %6204 = vst [vmem:[%s7863_s4 + $0x5e8] sm:$0xff] %v1754_v51  ;;  %6296 = vst [vmem:[%s7863_s4 + $0x7c8] sm:$0xff] %v2192_v14 }
 0x2a0   : > { %6604 = vmatmul.mubr.msk.f32.gmra.mxu0 %vm197_vm0, %v8219_v38  ;;  %v1758_v21 = vpop.f32.mrf.mxu1  ;;  %v2196_v57 = vpop.f32.mrf.mxu0 }
 0x2a1   : > { %6510 = vmatmul.mubr.msk.f32.gmra.mxu1 %vm197_vm0, %v8249_v56  ;;  %3904 = vmatprep.mubr.f32.mxu0 %v7185_v4  ;;  %6205 = vst [vmem:[%s7863_s4 + $0x5f0] sm:$0xff] %v1758_v21  ;;  %6297 = vst [vmem:[%s7863_s4 + $0x7d0] sm:$0xff] %v2196_v57 }
 0x2a2   : > { %3466 = vmatprep.mubr.f32.mxu1 %v7185_v4  ;;  %v1760_v11 = vpop.f32.mrf.mxu1  ;;  %v2198_v59 = vpop.f32.mrf.mxu0 }
 0x2a3   : > { %6206 = vst [vmem:[%s7863_s4 + $0x5f8] sm:$0xff] %v1760_v11  ;;  %6298 = vst [vmem:[%s7863_s4 + $0x7d8] sm:$0xff] %v2198_v59 }
 0x2a4   : > { %6605 = vmatmul.mubr.msk.f32.gmra.mxu0 %vm197_vm0, %v8234_v13  ;;  %v2202_v38 = vpop.f32.mrf.mxu0  ;;  %v2472_v60 = vpop.f32.mrf.mxu1 }
 0x2a5   : > { %6511 = vmatmul.mubr.msk.f32.gmra.mxu1 %vm197_vm0, %v8264_v18  ;;  %3910 = vmatprep.mubr.f32.mxu0 %v7185_v4  ;;  %6299 = vst [vmem:[%s7863_s4 + $0x7e0] sm:$0xff] %v2202_v38  ;;  %6335 = vst [vmem:[%s7863_s4 + $0x800] sm:$0xff] %v2472_v60 }
 0x2a6   : > { %3472 = vmatprep.mubr.f32.mxu1 %v7185_v4  ;;  %v2204_v62 = vpop.f32.mrf.mxu0  ;;  %v2474_v23 = vpop.f32.mrf.mxu1 }
 0x2a7   : > { %6300 = vst [vmem:[%s7863_s4 + $0x7e8] sm:$0xff] %v2204_v62  ;;  %6336 = vst [vmem:[%s7863_s4 + $0x808] sm:$0xff] %v2474_v23 }
 0x2a8   : > { %6606 = vmatmul.mubr.msk.f32.gmra.mxu0 %vm197_vm0, %v8249_v56  ;;  %v2208_v13 = vpop.f32.mrf.mxu0 }
 0x2a9   : > { %6512 = vmatmul.mubr.msk.f32.gmra.mxu1 %vm197_vm0, %v8279_v2  ;;  %3916 = vmatprep.mubr.f32.mxu0 %v7185_v4  ;;  %6301 = vst [vmem:[%s7863_s4 + $0x7f0] sm:$0xff] %v2208_v13  ;;  %v2478_v0 = vpop.f32.mrf.mxu1 }
 0x2aa   : > { %3478 = vmatprep.mubr.f32.mxu1 %v7185_v4  ;;  %6337 = vst [vmem:[%s7863_s4 + $0x810] sm:$0xff] %v2478_v0  ;;  %v2210_v22 = vpop.f32.mrf.mxu0 }
 0x2ab   : > { %6302 = vst [vmem:[%s7863_s4 + $0x7f8] sm:$0xff] %v2210_v22  ;;  %v2480_v3 = vpop.f32.mrf.mxu1 }
 0x2ac   : > { %6607 = vmatmul.mubr.msk.f32.gmra.mxu0 %vm197_vm0, %v8264_v18  ;;  %6338 = vst [vmem:[%s7863_s4 + $0x818] sm:$0xff] %v2480_v3  ;;  %v2922_v56 = vpop.f32.mrf.mxu0 }
 0x2ad   : > { %6513 = vmatmul.mubr.msk.f32.gmra.mxu1 %vm197_vm0, %v8294_v7  ;;  %3922 = vmatprep.mubr.f32.mxu0 %v7185_v4  ;;  %v2484_v50 = vpop.f32.mrf.mxu1  ;;  %6431 = vst [vmem:[%s7863_s4 + $0xa00] sm:$0xff] %v2922_v56  ;;  %v4078_v56 = vld [vmem:[%s9886_s1] sm:$0xff] }
 0x2ae   : > { %3484 = vmatprep.mubr.f32.mxu1 %v7185_v4  ;;  %6339 = vst [vmem:[%s7863_s4 + $0x820] sm:$0xff] %v2484_v50  ;;  %v2924_v5 = vpop.f32.mrf.mxu0 }
 0x2af   : > { %v2486_v8 = vpop.f32.mrf.mxu1  ;;  %6432 = vst [vmem:[%s7863_s4 + $0xa08] sm:$0xff] %v2924_v5 }
 0x2b0   : > { %6608 = vmatmul.mubr.msk.f32.gmra.mxu0 %vm197_vm0, %v8279_v2  ;;  %6340 = vst [vmem:[%s7863_s4 + $0x828] sm:$0xff] %v2486_v8  ;;  %v2928_v18 = vpop.f32.mrf.mxu0 }
 0x2b1   : > { %6514 = vmatmul.mubr.msk.f32.gmra.mxu1 %vm197_vm0, %v8309_v9  ;;  %3928 = vmatprep.mubr.f32.mxu0 %v7185_v4  ;;  %v2490_v19 = vpop.f32.mrf.mxu1  ;;  %6433 = vst [vmem:[%s7863_s4 + $0xa10] sm:$0xff] %v2928_v18 }
 0x2b2   : > { %3490 = vmatprep.mubr.f32.mxu1 %v7185_v4  ;;  %6341 = vst [vmem:[%s7863_s4 + $0x830] sm:$0xff] %v2490_v19  ;;  %v2930_v54 = vpop.f32.mrf.mxu0 }
 0x2b3   : > { %v2492_v33 = vpop.f32.mrf.mxu1  ;;  %6434 = vst [vmem:[%s7863_s4 + $0xa18] sm:$0xff] %v2930_v54 }
 0x2b4   : > { %6609 = vmatmul.mubr.msk.f32.gmra.mxu0 %vm197_vm0, %v8294_v7  ;;  %6342 = vst [vmem:[%s7863_s4 + $0x838] sm:$0xff] %v2492_v33  ;;  %v2934_v2 = vpop.f32.mrf.mxu0 }
 0x2b5   : > { %6515 = vmatmul.mubr.msk.f32.gmra.mxu1 %vm197_vm0, %v8324_v27  ;;  %3934 = vmatprep.mubr.f32.mxu0 %v7185_v4  ;;  %v2496_v31 = vpop.f32.mrf.mxu1  ;;  %6435 = vst [vmem:[%s7863_s4 + $0xa20] sm:$0xff] %v2934_v2 }
 0x2b6   : > { %3496 = vmatprep.mubr.f32.mxu1 %v7185_v4  ;;  %6343 = vst [vmem:[%s7863_s4 + $0x840] sm:$0xff] %v2496_v31  ;;  %v2936_v30 = vpop.f32.mrf.mxu0 }
 0x2b7   : > { %v2498_v16 = vpop.f32.mrf.mxu1  ;;  %6436 = vst [vmem:[%s7863_s4 + $0xa28] sm:$0xff] %v2936_v30 }
 0x2b8   : > { %6610 = vmatmul.mubr.msk.f32.gmra.mxu0 %vm197_vm0, %v8309_v9  ;;  %6344 = vst [vmem:[%s7863_s4 + $0x848] sm:$0xff] %v2498_v16  ;;  %v2940_v7 = vpop.f32.mrf.mxu0 }
 0x2b9   : > { %6516 = vmatmul.mubr.msk.f32.gmra.mxu1 %vm197_vm0, %v8339_v52  ;;  %3940 = vmatprep.mubr.f32.mxu0 %v7185_v4  ;;  %v2502_v32 = vpop.f32.mrf.mxu1  ;;  %6437 = vst [vmem:[%s7863_s4 + $0xa30] sm:$0xff] %v2940_v7 }
 0x2ba   : > { %3502 = vmatprep.mubr.f32.mxu1 %v7185_v4  ;;  %6345 = vst [vmem:[%s7863_s4 + $0x850] sm:$0xff] %v2502_v32  ;;  %v2942_v42 = vpop.f32.mrf.mxu0  ;;  %v8895_v32 = vld [vmem:[%s9886_s1 + $0x20] sm:$0xff] }
 0x2bb   : > { %v2504_v29 = vpop.f32.mrf.mxu1  ;;  %6438 = vst [vmem:[%s7863_s4 + $0xa38] sm:$0xff] %v2942_v42 }
 0x2bc   : > { %6611 = vmatmul.mubr.msk.f32.gmra.mxu0 %vm197_vm0, %v8324_v27  ;;  %6346 = vst [vmem:[%s7863_s4 + $0x858] sm:$0xff] %v2504_v29  ;;  %v2946_v9 = vpop.f32.mrf.mxu0 }
 0x2bd   : > { %6517 = vmatmul.mubr.msk.f32.gmra.mxu1 %vm197_vm0, %v8354_v58  ;;  %3946 = vmatprep.mubr.f32.mxu0 %v7185_v4  ;;  %v2508_v61 = vpop.f32.mrf.mxu1  ;;  %6439 = vst [vmem:[%s7863_s4 + $0xa40] sm:$0xff] %v2946_v9 }
 0x2be   : > { %3508 = vmatprep.mubr.f32.mxu1 %v7185_v4  ;;  %6347 = vst [vmem:[%s7863_s4 + $0x860] sm:$0xff] %v2508_v61  ;;  %v2948_v25 = vpop.f32.mrf.mxu0 }
 0x2bf   : > { %v2510_v37 = vpop.f32.mrf.mxu1  ;;  %6440 = vst [vmem:[%s7863_s4 + $0xa48] sm:$0xff] %v2948_v25  ;;  %v8910_v25 = vld [vmem:[%s9886_s1 + $0x28] sm:$0xff] }
 0x2c0   : > { %6612 = vmatmul.mubr.msk.f32.gmra.mxu0 %vm197_vm0, %v8339_v52  ;;  %6348 = vst [vmem:[%s7863_s4 + $0x868] sm:$0xff] %v2510_v37  ;;  %v2952_v27 = vpop.f32.mrf.mxu0 }
 0x2c1   : > { %6518 = vmatmul.mubr.msk.f32.gmra.mxu1 %vm197_vm0, %v8369_v20  ;;  %3952 = vmatprep.mubr.f32.mxu0 %v7185_v4  ;;  %v2514_v36 = vpop.f32.mrf.mxu1  ;;  %6441 = vst [vmem:[%s7863_s4 + $0xa50] sm:$0xff] %v2952_v27 }
 0x2c2   : > { %3514 = vmatprep.mubr.f32.mxu1 %v7185_v4  ;;  %6349 = vst [vmem:[%s7863_s4 + $0x870] sm:$0xff] %v2514_v36  ;;  %v2954_v1 = vpop.f32.mrf.mxu0 }
 0x2c3   : > { %v2516_v35 = vpop.f32.mrf.mxu1  ;;  %6442 = vst [vmem:[%s7863_s4 + $0xa58] sm:$0xff] %v2954_v1 }
 0x2c4   : > { %6613 = vmatmul.mubr.msk.f32.gmra.mxu0 %vm197_vm0, %v8354_v58  ;;  %6350 = vst [vmem:[%s7863_s4 + $0x878] sm:$0xff] %v2516_v35  ;;  %v2958_v52 = vpop.f32.mrf.mxu0  ;;  %v8925_v35 = vld [vmem:[%s9886_s1 + $0x30] sm:$0xff] }
 0x2c5   : > { %6519 = vmatmul.mubr.msk.f32.gmra.mxu1 %vm197_vm0, %v8384_v24  ;;  %3958 = vmatprep.mubr.f32.mxu0 %v7185_v4  ;;  %v2520_v46 = vpop.f32.mrf.mxu1  ;;  %6443 = vst [vmem:[%s7863_s4 + $0xa60] sm:$0xff] %v2958_v52 }
 0x2c6   : > { %3520 = vmatprep.mubr.f32.mxu1 %v7185_v4  ;;  %6351 = vst [vmem:[%s7863_s4 + $0x880] sm:$0xff] %v2520_v46  ;;  %v2960_v26 = vpop.f32.mrf.mxu0 }
 0x2c7   : > { %v2522_v6 = vpop.f32.mrf.mxu1  ;;  %6444 = vst [vmem:[%s7863_s4 + $0xa68] sm:$0xff] %v2960_v26 }
 0x2c8   : > { %6614 = vmatmul.mubr.msk.f32.gmra.mxu0 %vm197_vm0, %v8369_v20  ;;  %6352 = vst [vmem:[%s7863_s4 + $0x888] sm:$0xff] %v2522_v6  ;;  %v2964_v58 = vpop.f32.mrf.mxu0 }
 0x2c9   : > { %6520 = vmatmul.mubr.msk.f32.gmra.mxu1 %vm197_vm0, %v8399_v10  ;;  %3964 = vmatprep.mubr.f32.mxu0 %v7185_v4  ;;  %6445 = vst [vmem:[%s7863_s4 + $0xa70] sm:$0xff] %v2964_v58  ;;  %v2526_v15 = vpop.f32.mrf.mxu1  ;;  %v8940_v58 = vld [vmem:[%s9886_s1 + $0x38] sm:$0xff] }
 0x2ca   : > { %3526 = vmatprep.mubr.f32.mxu1 %v7185_v4  ;;  %v2966_v48 = vpop.f32.mrf.mxu0  ;;  %6353 = vst [vmem:[%s7863_s4 + $0x890] sm:$0xff] %v2526_v15 }
 0x2cb   : > { %6446 = vst [vmem:[%s7863_s4 + $0xa78] sm:$0xff] %v2966_v48  ;;  %v2528_v49 = vpop.f32.mrf.mxu1 }
 0x2cc   : > { %6615 = vmatmul.mubr.msk.f32.gmra.mxu0 %vm197_vm0, %v8384_v24  ;;  %v2970_v20 = vpop.f32.mrf.mxu0  ;;  %6354 = vst [vmem:[%s7863_s4 + $0x898] sm:$0xff] %v2528_v49 }
 0x2cd   : > { %6521 = vmatmul.mubr.msk.f32.gmra.mxu1 %vm197_vm0, %v8414_v12  ;;  %3970 = vmatprep.mubr.f32.mxu0 %v7185_v4  ;;  %6447 = vst [vmem:[%s7863_s4 + $0xa80] sm:$0xff] %v2970_v20  ;;  %v2532_v17 = vpop.f32.mrf.mxu1 }
 0x2ce   : > { %3532 = vmatprep.mubr.f32.mxu1 %v7185_v4  ;;  %v2972_v28 = vpop.f32.mrf.mxu0  ;;  %6355 = vst [vmem:[%s7863_s4 + $0x8a0] sm:$0xff] %v2532_v17  ;;  %v8955_v17 = vld [vmem:[%s9886_s1 + $0x40] sm:$0xff] }
 0x2cf   : > { %6448 = vst [vmem:[%s7863_s4 + $0xa88] sm:$0xff] %v2972_v28  ;;  %v2534_v51 = vpop.f32.mrf.mxu1 }
 0x2d0   : > { %6616 = vmatmul.mubr.msk.f32.gmra.mxu0 %vm197_vm0, %v8399_v10  ;;  %v2976_v24 = vpop.f32.mrf.mxu0  ;;  %6356 = vst [vmem:[%s7863_s4 + $0x8a8] sm:$0xff] %v2534_v51 }
 0x2d1   : > { %6522 = vmatmul.mubr.msk.f32.gmra.mxu1 %vm197_vm0, %v8429_v55  ;;  %3976 = vmatprep.mubr.f32.mxu0 %v7185_v4  ;;  %6449 = vst [vmem:[%s7863_s4 + $0xa90] sm:$0xff] %v2976_v24  ;;  %v2538_v14 = vpop.f32.mrf.mxu1 }
 0x2d2   : > { %3538 = vmatprep.mubr.f32.mxu1 %v7185_v4  ;;  %v2978_v21 = vpop.f32.mrf.mxu0  ;;  %6357 = vst [vmem:[%s7863_s4 + $0x8b0] sm:$0xff] %v2538_v14 }
 0x2d3   : > { %6450 = vst [vmem:[%s7863_s4 + $0xa98] sm:$0xff] %v2978_v21  ;;  %v2540_v57 = vpop.f32.mrf.mxu1  ;;  %v8970_v21 = vld [vmem:[%s9886_s1 + $0x48] sm:$0xff] }
 0x2d4   : > { %6617 = vmatmul.mubr.msk.f32.gmra.mxu0 %vm197_vm0, %v8414_v12  ;;  %v2982_v10 = vpop.f32.mrf.mxu0  ;;  %6358 = vst [vmem:[%s7863_s4 + $0x8b8] sm:$0xff] %v2540_v57 }
 0x2d5   : > { %6523 = vmatmul.mubr.msk.f32.gmra.mxu1 %vm197_vm0, %v8444_v63  ;;  %3982 = vmatprep.mubr.f32.mxu0 %v7185_v4  ;;  %6451 = vst [vmem:[%s7863_s4 + $0xaa0] sm:$0xff] %v2982_v10  ;;  %v2544_v11 = vpop.f32.mrf.mxu1 }
 0x2d6   : > { %3544 = vmatprep.mubr.f32.mxu1 %v7185_v4  ;;  %v2984_v59 = vpop.f32.mrf.mxu0  ;;  %6359 = vst [vmem:[%s7863_s4 + $0x8c0] sm:$0xff] %v2544_v11 }
 0x2d7   : > { %6452 = vst [vmem:[%s7863_s4 + $0xaa8] sm:$0xff] %v2984_v59  ;;  %v2546_v38 = vpop.f32.mrf.mxu1 }
 0x2d8   : > { %6618 = vmatmul.mubr.msk.f32.gmra.mxu0 %vm197_vm0, %v8429_v55  ;;  %v2988_v12 = vpop.f32.mrf.mxu0  ;;  %6360 = vst [vmem:[%s7863_s4 + $0x8c8] sm:$0xff] %v2546_v38  ;;  %v8985_v38 = vld [vmem:[%s9886_s1 + $0x50] sm:$0xff] }
 0x2d9   : > { %6524 = vmatmul.mubr.msk.f32.gmra.mxu1 %vm197_vm0, %v8459_v34  ;;  %3988 = vmatprep.mubr.f32.mxu0 %v7185_v4  ;;  %6453 = vst [vmem:[%s7863_s4 + $0xab0] sm:$0xff] %v2988_v12  ;;  %v2550_v60 = vpop.f32.mrf.mxu1 }
 0x2da   : > { %3550 = vmatprep.mubr.f32.mxu1 %v7185_v4  ;;  %v2990_v62 = vpop.f32.mrf.mxu0  ;;  %6361 = vst [vmem:[%s7863_s4 + $0x8d0] sm:$0xff] %v2550_v60 }
 0x2db   : > { %6454 = vst [vmem:[%s7863_s4 + $0xab8] sm:$0xff] %v2990_v62  ;;  %v2552_v23 = vpop.f32.mrf.mxu1 }
 0x2dc   : > { %6619 = vmatmul.mubr.msk.f32.gmra.mxu0 %vm197_vm0, %v8444_v63  ;;  %v2994_v55 = vpop.f32.mrf.mxu0  ;;  %6362 = vst [vmem:[%s7863_s4 + $0x8d8] sm:$0xff] %v2552_v23 }
 0x2dd   : > { %6525 = vmatmul.mubr.msk.f32.gmra.mxu1 %vm197_vm0, %v8474_v47  ;;  %3994 = vmatprep.mubr.f32.mxu0 %v7185_v4  ;;  %6455 = vst [vmem:[%s7863_s4 + $0xac0] sm:$0xff] %v2994_v55  ;;  %v2556_v13 = vpop.f32.mrf.mxu1  ;;  %v9000_v55 = vld [vmem:[%s9886_s1 + $0x58] sm:$0xff] }
 0x2de   : > { %3556 = vmatprep.mubr.f32.mxu1 %v7185_v4  ;;  %v2996_v0 = vpop.f32.mrf.mxu0  ;;  %6363 = vst [vmem:[%s7863_s4 + $0x8e0] sm:$0xff] %v2556_v13 }
 0x2df   : > { %6456 = vst [vmem:[%s7863_s4 + $0xac8] sm:$0xff] %v2996_v0  ;;  %v2558_v22 = vpop.f32.mrf.mxu1 }
 0x2e0   : > { %6620 = vmatmul.mubr.msk.f32.gmra.mxu0 %vm197_vm0, %v8459_v34  ;;  %v3000_v63 = vpop.f32.mrf.mxu0  ;;  %6364 = vst [vmem:[%s7863_s4 + $0x8e8] sm:$0xff] %v2558_v22 }
 0x2e1   : > { %6526 = vmatmul.mubr.msk.f32.gmra.mxu1 %vm197_vm0, %v8489_v53  ;;  %4000 = vmatprep.mubr.f32.mxu0 %v7185_v4  ;;  %6457 = vst [vmem:[%s7863_s4 + $0xad0] sm:$0xff] %v3000_v63  ;;  %v2562_v3 = vpop.f32.mrf.mxu1 }
 0x2e2   : > { %4270 = vmatprep.mubr.f32.mxu1 %v7185_v4  ;;  %v3002_v50 = vpop.f32.mrf.mxu0  ;;  %6365 = vst [vmem:[%s7863_s4 + $0x8f0] sm:$0xff] %v2562_v3  ;;  %v9015_v3 = vld [vmem:[%s9886_s1 + $0x60] sm:$0xff] }
 0x2e3   : > { %6458 = vst [vmem:[%s7863_s4 + $0xad8] sm:$0xff] %v3002_v50  ;;  %v2564_v34 = vpop.f32.mrf.mxu1 }
 0x2e4   : > { %6621 = vmatmul.mubr.msk.f32.gmra.mxu0 %vm197_vm0, %v8474_v47  ;;  %v3006_v5 = vpop.f32.mrf.mxu0  ;;  %6366 = vst [vmem:[%s7863_s4 + $0x8f8] sm:$0xff] %v2564_v34  ;;  %v8845_v47 = vld [vmem:[%s9886_s1 + $0x8] sm:$0xff] }
 0x2e5   : > { %6687 = vmatmul.mubr.msk.f32.vlgmr.msra.gmra.mxu1 %vm197_vm0, %v4078_v56  ;;  %4006 = vmatprep.mubr.f32.mxu0 %v7185_v4  ;;  %6459 = vst [vmem:[%s7863_s4 + $0xae0] sm:$0xff] %v3006_v5  ;;  %v2568_v8 = vpop.f32.mrf.mxu1 }
 0x2e6   : > { %5135 = vmatpush1.msra.mxu1 %v7810_v41  ;;  %v3008_v18 = vpop.f32.mrf.mxu0  ;;  %6367 = vst [vmem:[%s7863_s4 + $0x900] sm:$0xff] %v2568_v8  ;;  %4276 = vmatprep.mubr.f32.mxu1 %v7185_v4  ;;  %v9030_v8 = vld [vmem:[%s9886_s1 + $0x68] sm:$0xff] }
 0x2e7   : > { %5136 = vmatprep.subr.mxu1 %v7802_v40  ;;  %6460 = vst [vmem:[%s7863_s4 + $0xae8] sm:$0xff] %v3008_v18  ;;  %v2570_v19 = vpop.f32.mrf.mxu1 }
 0x2e8   : > { %5137 = vmatpush1.msra.mxu1 %v7794_v39  ;;  %6622 = vmatmul.mubr.msk.f32.gmra.mxu0 %vm197_vm0, %v8489_v53  ;;  %v3012_v41 = vpop.f32.mrf.mxu0  ;;  %6368 = vst [vmem:[%s7863_s4 + $0x908] sm:$0xff] %v2570_v19  ;;  %v8863_v53 = vld [vmem:[%s9886_s1 + $0x10] sm:$0xff] }
 0x2e9   : > { %4720 = vmatprep.mubr.f32.mxu0 %v7185_v4  ;;  %6461 = vst [vmem:[%s7863_s4 + $0xaf0] sm:$0xff] %v3012_v41  ;;  %v2574_v54 = vpop.f32.mrf.mxu1  ;;  %6688 = vmatmul.mubr.msk.f32.gmra.mxu1 %vm197_vm0, %v8845_v47 }
 0x2ea   : > { %v3014_v40 = vpop.f32.mrf.mxu0  ;;  %6369 = vst [vmem:[%s7863_s4 + $0x910] sm:$0xff] %v2574_v54  ;;  %4282 = vmatprep.mubr.f32.mxu1 %v7185_v4 }
 0x2eb   : > { %6462 = vst [vmem:[%s7863_s4 + $0xaf8] sm:$0xff] %v3014_v40  ;;  %v2576_v39 = vpop.f32.mrf.mxu1  ;;  %v9045_v40 = vld [vmem:[%s9886_s1 + $0x70] sm:$0xff] }
 0x2ec   : > { %6783 = vmatmul.mubr.msk.f32.vlgmr.msra.gmra.mxu0 %vm197_vm0, %v4078_v56  ;;  %v3018_v33 = vpop.f32.mrf.mxu0  ;;  %6370 = vst [vmem:[%s7863_s4 + $0x918] sm:$0xff] %v2576_v39 }
 0x2ed   : > { %5585 = vmatpush1.msra.mxu0 %v7843_v45  ;;  %6463 = vst [vmem:[%s7863_s4 + $0xb00] sm:$0xff] %v3018_v33  ;;  %4726 = vmatprep.mubr.f32.mxu0 %v7185_v4  ;;  %v2580_v2 = vpop.f32.mrf.mxu1  ;;  %v8880_v45 = vld [vmem:[%s9886_s1 + $0x18] sm:$0xff] }
 0x2ee   : > { %5586 = vmatprep.subr.mxu0 %v7834_v44  ;;  %v3020_v31 = vpop.f32.mrf.mxu0  ;;  %6371 = vst [vmem:[%s7863_s4 + $0x920] sm:$0xff] %v2580_v2  ;;  %6689 = vmatmul.mubr.msk.f32.gmra.mxu1 %vm197_vm0, %v8863_v53 }
 0x2ef   : > { %5587 = vmatpush1.msra.mxu0 %v7826_v43  ;;  %6464 = vst [vmem:[%s7863_s4 + $0xb08] sm:$0xff] %v3020_v31  ;;  %v2582_v30 = vpop.f32.mrf.mxu1  ;;  %4288 = vmatprep.mubr.f32.mxu1 %v7185_v4 }
 0x2f0   : > { %v3024_v44 = vpop.f32.mrf.mxu0  ;;  %6784 = vmatmul.mubr.msk.f32.gmra.mxu0 %vm197_vm0, %v8845_v47  ;;  %6372 = vst [vmem:[%s7863_s4 + $0x928] sm:$0xff] %v2582_v30  ;;  %v9060_v30 = vld [vmem:[%s9886_s1 + $0x78] sm:$0xff] }
 0x2f1   : > { %6465 = vst [vmem:[%s7863_s4 + $0xb10] sm:$0xff] %v3024_v44  ;;  %4732 = vmatprep.mubr.f32.mxu0 %v7185_v4  ;;  %v2586_v43 = vpop.f32.mrf.mxu1 }
 0x2f2   : > { %v3026_v16 = vpop.f32.mrf.mxu0  ;;  %6373 = vst [vmem:[%s7863_s4 + $0x930] sm:$0xff] %v2586_v43  ;;  %6690 = vmatmul.mubr.msk.f32.gmra.mxu1 %vm197_vm0, %v8880_v45 }
 0x2f3   : > { %6466 = vst [vmem:[%s7863_s4 + $0xb18] sm:$0xff] %v3026_v16  ;;  %v2588_v7 = vpop.f32.mrf.mxu1  ;;  %4294 = vmatprep.mubr.f32.mxu1 %v7185_v4 }
 0x2f4   : > { %v3030_v42 = vpop.f32.mrf.mxu0  ;;  %6785 = vmatmul.mubr.msk.f32.gmra.mxu0 %vm197_vm0, %v8863_v53  ;;  %6374 = vst [vmem:[%s7863_s4 + $0x938] sm:$0xff] %v2588_v7 }
 0x2f5   : > { %6467 = vst [vmem:[%s7863_s4 + $0xb20] sm:$0xff] %v3030_v42  ;;  %4738 = vmatprep.mubr.f32.mxu0 %v7185_v4  ;;  %v2592_v29 = vpop.f32.mrf.mxu1  ;;  %v9075_v42 = vld [vmem:[%s9886_s1 + $0x80] sm:$0xff] }
 0x2f6   : > { %v3032_v9 = vpop.f32.mrf.mxu0  ;;  %6375 = vst [vmem:[%s7863_s4 + $0x940] sm:$0xff] %v2592_v29  ;;  %6691 = vmatmul.mubr.msk.f32.gmra.mxu1 %vm197_vm0, %v8895_v32 }
 0x2f7   : > { %6468 = vst [vmem:[%s7863_s4 + $0xb28] sm:$0xff] %v3032_v9  ;;  %v2594_v61 = vpop.f32.mrf.mxu1  ;;  %4300 = vmatprep.mubr.f32.mxu1 %v7185_v4 }
 0x2f8   : > { %v3036_v37 = vpop.f32.mrf.mxu0  ;;  %6786 = vmatmul.mubr.msk.f32.gmra.mxu0 %vm197_vm0, %v8880_v45  ;;  %6376 = vst [vmem:[%s7863_s4 + $0x948] sm:$0xff] %v2594_v61 }
 0x2f9   : > { %6469 = vst [vmem:[%s7863_s4 + $0xb30] sm:$0xff] %v3036_v37  ;;  %4744 = vmatprep.mubr.f32.mxu0 %v7185_v4  ;;  %v2598_v27 = vpop.f32.mrf.mxu1 }
 0x2fa   : > { %v3038_v36 = vpop.f32.mrf.mxu0  ;;  %6377 = vst [vmem:[%s7863_s4 + $0x950] sm:$0xff] %v2598_v27  ;;  %6692 = vmatmul.mubr.msk.f32.gmra.mxu1 %vm197_vm0, %v8910_v25  ;;  %v9090_v27 = vld [vmem:[%s9886_s1 + $0x88] sm:$0xff] }
 0x2fb   : > { %6470 = vst [vmem:[%s7863_s4 + $0xb38] sm:$0xff] %v3038_v36  ;;  %v2600_v1 = vpop.f32.mrf.mxu1  ;;  %4306 = vmatprep.mubr.f32.mxu1 %v7185_v4 }
 0x2fc   : > { %v3042_v52 = vpop.f32.mrf.mxu0  ;;  %6787 = vmatmul.mubr.msk.f32.gmra.mxu0 %vm197_vm0, %v8895_v32  ;;  %6378 = vst [vmem:[%s7863_s4 + $0x958] sm:$0xff] %v2600_v1 }
 0x2fd   : > { %6471 = vst [vmem:[%s7863_s4 + $0xb40] sm:$0xff] %v3042_v52  ;;  %4750 = vmatprep.mubr.f32.mxu0 %v7185_v4  ;;  %v2604_v46 = vpop.f32.mrf.mxu1 }
 0x2fe   : > { %v3044_v26 = vpop.f32.mrf.mxu0  ;;  %6379 = vst [vmem:[%s7863_s4 + $0x960] sm:$0xff] %v2604_v46  ;;  %6693 = vmatmul.mubr.msk.f32.gmra.mxu1 %vm197_vm0, %v8925_v35 }
 0x2ff   : > { %6472 = vst [vmem:[%s7863_s4 + $0xb48] sm:$0xff] %v3044_v26  ;;  %v2606_v6 = vpop.f32.mrf.mxu1  ;;  %4312 = vmatprep.mubr.f32.mxu1 %v7185_v4  ;;  %v9105_v26 = vld [vmem:[%s9886_s1 + $0x90] sm:$0xff] }
 0x300   : > { %v3048_v15 = vpop.f32.mrf.mxu0  ;;  %6788 = vmatmul.mubr.msk.f32.gmra.mxu0 %vm197_vm0, %v8910_v25  ;;  %6380 = vst [vmem:[%s7863_s4 + $0x968] sm:$0xff] %v2606_v6 }
 0x301   : > { %6473 = vst [vmem:[%s7863_s4 + $0xb50] sm:$0xff] %v3048_v15  ;;  %4756 = vmatprep.mubr.f32.mxu0 %v7185_v4  ;;  %v2610_v48 = vpop.f32.mrf.mxu1 }
 0x302   : > { %v3050_v49 = vpop.f32.mrf.mxu0  ;;  %6381 = vst [vmem:[%s7863_s4 + $0x970] sm:$0xff] %v2610_v48  ;;  %6694 = vmatmul.mubr.msk.f32.gmra.mxu1 %vm197_vm0, %v8940_v58 }
 0x303   : > { %6474 = vst [vmem:[%s7863_s4 + $0xb58] sm:$0xff] %v3050_v49  ;;  %v2612_v20 = vpop.f32.mrf.mxu1  ;;  %4318 = vmatprep.mubr.f32.mxu1 %v7185_v4 }
 0x304   : > { %v3054_v28 = vpop.f32.mrf.mxu0  ;;  %6789 = vmatmul.mubr.msk.f32.gmra.mxu0 %vm197_vm0, %v8925_v35  ;;  %6382 = vst [vmem:[%s7863_s4 + $0x978] sm:$0xff] %v2612_v20  ;;  %v9120_v20 = vld [vmem:[%s9886_s1 + $0x98] sm:$0xff] }
 0x305   : > { %6475 = vst [vmem:[%s7863_s4 + $0xb60] sm:$0xff] %v3054_v28  ;;  %4762 = vmatprep.mubr.f32.mxu0 %v7185_v4  ;;  %v2616_v51 = vpop.f32.mrf.mxu1 }
 0x306   : > { %v3056_v24 = vpop.f32.mrf.mxu0  ;;  %6383 = vst [vmem:[%s7863_s4 + $0x980] sm:$0xff] %v2616_v51  ;;  %6695 = vmatmul.mubr.msk.f32.gmra.mxu1 %vm197_vm0, %v8955_v17 }
 0x307   : > { %6476 = vst [vmem:[%s7863_s4 + $0xb68] sm:$0xff] %v3056_v24  ;;  %v2618_v14 = vpop.f32.mrf.mxu1  ;;  %4324 = vmatprep.mubr.f32.mxu1 %v7185_v4 }
 0x308   : > { %v3060_v57 = vpop.f32.mrf.mxu0  ;;  %6790 = vmatmul.mubr.msk.f32.gmra.mxu0 %vm197_vm0, %v8940_v58  ;;  %6384 = vst [vmem:[%s7863_s4 + $0x988] sm:$0xff] %v2618_v14 }
 0x309   : > { %6477 = vst [vmem:[%s7863_s4 + $0xb70] sm:$0xff] %v3060_v57  ;;  %4768 = vmatprep.mubr.f32.mxu0 %v7185_v4  ;;  %v2622_v10 = vpop.f32.mrf.mxu1  ;;  %v9135_v57 = vld [vmem:[%s9886_s1 + $0xa0] sm:$0xff] }
 0x30a   : > { %v3062_v11 = vpop.f32.mrf.mxu0  ;;  %6385 = vst [vmem:[%s7863_s4 + $0x990] sm:$0xff] %v2622_v10  ;;  %6696 = vmatmul.mubr.msk.f32.gmra.mxu1 %vm197_vm0, %v8970_v21 }
 0x30b   : > { %6478 = vst [vmem:[%s7863_s4 + $0xb78] sm:$0xff] %v3062_v11  ;;  %v2624_v59 = vpop.f32.mrf.mxu1  ;;  %4330 = vmatprep.mubr.f32.mxu1 %v7185_v4 }
 0x30c   : > { %v3066_v12 = vpop.f32.mrf.mxu0  ;;  %6791 = vmatmul.mubr.msk.f32.gmra.mxu0 %vm197_vm0, %v8955_v17  ;;  %6386 = vst [vmem:[%s7863_s4 + $0x998] sm:$0xff] %v2624_v59 }
 0x30d   : > { %6479 = vst [vmem:[%s7863_s4 + $0xb80] sm:$0xff] %v3066_v12  ;;  %4774 = vmatprep.mubr.f32.mxu0 %v7185_v4  ;;  %v2628_v60 = vpop.f32.mrf.mxu1 }
 0x30e   : > { %v3068_v62 = vpop.f32.mrf.mxu0  ;;  %6387 = vst [vmem:[%s7863_s4 + $0x9a0] sm:$0xff] %v2628_v60  ;;  %6697 = vmatmul.mubr.msk.f32.gmra.mxu1 %vm197_vm0, %v8985_v38  ;;  %v9150_v60 = vld [vmem:[%s9886_s1 + $0xa8] sm:$0xff] }
 0x30f   : > { %6480 = vst [vmem:[%s7863_s4 + $0xb88] sm:$0xff] %v3068_v62  ;;  %v2630_v23 = vpop.f32.mrf.mxu1  ;;  %4336 = vmatprep.mubr.f32.mxu1 %v7185_v4 }
 0x310   : > { %v3072_v13 = vpop.f32.mrf.mxu0  ;;  %6792 = vmatmul.mubr.msk.f32.gmra.mxu0 %vm197_vm0, %v8970_v21  ;;  %6388 = vst [vmem:[%s7863_s4 + $0x9a8] sm:$0xff] %v2630_v23 }
 0x311   : > { %6481 = vst [vmem:[%s7863_s4 + $0xb90] sm:$0xff] %v3072_v13  ;;  %4780 = vmatprep.mubr.f32.mxu0 %v7185_v4  ;;  %v2634_v0 = vpop.f32.mrf.mxu1 }
 0x312   : > { %v3074_v22 = vpop.f32.mrf.mxu0  ;;  %6389 = vst [vmem:[%s7863_s4 + $0x9b0] sm:$0xff] %v2634_v0  ;;  %6698 = vmatmul.mubr.msk.f32.gmra.mxu1 %vm197_vm0, %v9000_v55 }
 0x313   : > { %6482 = vst [vmem:[%s7863_s4 + $0xb98] sm:$0xff] %v3074_v22  ;;  %v2636_v63 = vpop.f32.mrf.mxu1  ;;  %4342 = vmatprep.mubr.f32.mxu1 %v7185_v4  ;;  %v9165_v22 = vld [vmem:[%s9886_s1 + $0xb0] sm:$0xff] }
 0x314   : > { %v3078_v56 = vpop.f32.mrf.mxu0  ;;  %6793 = vmatmul.mubr.msk.f32.gmra.mxu0 %vm197_vm0, %v8985_v38  ;;  %6390 = vst [vmem:[%s7863_s4 + $0x9b8] sm:$0xff] %v2636_v63 }
 0x315   : > { %6483 = vst [vmem:[%s7863_s4 + $0xba0] sm:$0xff] %v3078_v56  ;;  %4786 = vmatprep.mubr.f32.mxu0 %v7185_v4  ;;  %v2640_v50 = vpop.f32.mrf.mxu1 }
 0x316   : > { %v3080_v34 = vpop.f32.mrf.mxu0  ;;  %6391 = vst [vmem:[%s7863_s4 + $0x9c0] sm:$0xff] %v2640_v50  ;;  %6699 = vmatmul.mubr.msk.f32.gmra.mxu1 %vm197_vm0, %v9015_v3 }
 0x317   : > { %6484 = vst [vmem:[%s7863_s4 + $0xba8] sm:$0xff] %v3080_v34  ;;  %v2642_v5 = vpop.f32.mrf.mxu1  ;;  %4348 = vmatprep.mubr.f32.mxu1 %v7185_v4 }
 0x318   : > { %v3084_v18 = vpop.f32.mrf.mxu0  ;;  %6794 = vmatmul.mubr.msk.f32.gmra.mxu0 %vm197_vm0, %v9000_v55  ;;  %6392 = vst [vmem:[%s7863_s4 + $0x9c8] sm:$0xff] %v2642_v5  ;;  %v9180_v5 = vld [vmem:[%s9886_s1 + $0xb8] sm:$0xff] }
 0x319   : > { %6485 = vst [vmem:[%s7863_s4 + $0xbb0] sm:$0xff] %v3084_v18  ;;  %4792 = vmatprep.mubr.f32.mxu0 %v7185_v4  ;;  %v2646_v19 = vpop.f32.mrf.mxu1 }
 0x31a   : > { %v3086_v41 = vpop.f32.mrf.mxu0  ;;  %6393 = vst [vmem:[%s7863_s4 + $0x9d0] sm:$0xff] %v2646_v19  ;;  %6700 = vmatmul.mubr.msk.f32.gmra.mxu1 %vm197_vm0, %v9030_v8 }
 0x31b   : > { %6486 = vst [vmem:[%s7863_s4 + $0xbb8] sm:$0xff] %v3086_v41  ;;  %v2648_v54 = vpop.f32.mrf.mxu1  ;;  %4354 = vmatprep.mubr.f32.mxu1 %v7185_v4 }
 0x31c   : > { %v3090_v39 = vpop.f32.mrf.mxu0  ;;  %6795 = vmatmul.mubr.msk.f32.gmra.mxu0 %vm197_vm0, %v9015_v3  ;;  %6394 = vst [vmem:[%s7863_s4 + $0x9d8] sm:$0xff] %v2648_v54 }
 0x31d   : > { %6487 = vst [vmem:[%s7863_s4 + $0xbc0] sm:$0xff] %v3090_v39  ;;  %4798 = vmatprep.mubr.f32.mxu0 %v7185_v4  ;;  %v2652_v33 = vpop.f32.mrf.mxu1  ;;  %v9195_v39 = vld [vmem:[%s9886_s1 + $0xc0] sm:$0xff] }
 0x31e   : > { %v3092_v2 = vpop.f32.mrf.mxu0  ;;  %6395 = vst [vmem:[%s7863_s4 + $0x9e0] sm:$0xff] %v2652_v33  ;;  %6701 = vmatmul.mubr.msk.f32.gmra.mxu1 %vm197_vm0, %v9045_v40 }
 0x31f   : > { %6488 = vst [vmem:[%s7863_s4 + $0xbc8] sm:$0xff] %v3092_v2  ;;  %v2654_v31 = vpop.f32.mrf.mxu1  ;;  %4360 = vmatprep.mubr.f32.mxu1 %v7185_v4 }
 0x320   : > { %v3096_v44 = vpop.f32.mrf.mxu0  ;;  %6796 = vmatmul.mubr.msk.f32.gmra.mxu0 %vm197_vm0, %v9030_v8  ;;  %6396 = vst [vmem:[%s7863_s4 + $0x9e8] sm:$0xff] %v2654_v31 }
 0x321   : > { %6489 = vst [vmem:[%s7863_s4 + $0xbd0] sm:$0xff] %v3096_v44  ;;  %4804 = vmatprep.mubr.f32.mxu0 %v7185_v4  ;;  %v2658_v43 = vpop.f32.mrf.mxu1 }
 0x322   : > { %v3098_v16 = vpop.f32.mrf.mxu0  ;;  %6397 = vst [vmem:[%s7863_s4 + $0x9f0] sm:$0xff] %v2658_v43  ;;  %6702 = vmatmul.mubr.msk.f32.gmra.mxu1 %vm197_vm0, %v9060_v30  ;;  %v9210_v43 = vld [vmem:[%s9886_s1 + $0xc8] sm:$0xff] }
 0x323   : > { %6490 = vst [vmem:[%s7863_s4 + $0xbd8] sm:$0xff] %v3098_v16  ;;  %v2660_v7 = vpop.f32.mrf.mxu1  ;;  %4366 = vmatprep.mubr.f32.mxu1 %v7185_v4 }
 0x324   : > { %v3102_v29 = vpop.f32.mrf.mxu0  ;;  %6797 = vmatmul.mubr.msk.f32.gmra.mxu0 %vm197_vm0, %v9045_v40  ;;  %6398 = vst [vmem:[%s7863_s4 + $0x9f8] sm:$0xff] %v2660_v7 }
 0x325   : > { %6491 = vst [vmem:[%s7863_s4 + $0xbe0] sm:$0xff] %v3102_v29  ;;  %4810 = vmatprep.mubr.f32.mxu0 %v7185_v4  ;;  %v3372_v9 = vpop.f32.mrf.mxu1 }
 0x326   : > { %v3104_v61 = vpop.f32.mrf.mxu0  ;;  %6527 = vst [vmem:[%s7863_s4 + $0xc00] sm:$0xff] %v3372_v9  ;;  %6703 = vmatmul.mubr.msk.f32.gmra.mxu1 %vm197_vm0, %v9075_v42 }
 0x327   : > { %6492 = vst [vmem:[%s7863_s4 + $0xbe8] sm:$0xff] %v3104_v61  ;;  %v3374_v37 = vpop.f32.mrf.mxu1  ;;  %4372 = vmatprep.mubr.f32.mxu1 %v7185_v4  ;;  %v9225_v61 = vld [vmem:[%s9886_s1 + $0xd0] sm:$0xff] }
 0x328   : > { %v3108_v36 = vpop.f32.mrf.mxu0  ;;  %6798 = vmatmul.mubr.msk.f32.gmra.mxu0 %vm197_vm0, %v9060_v30  ;;  %6528 = vst [vmem:[%s7863_s4 + $0xc08] sm:$0xff] %v3374_v37 }
 0x329   : > { %6493 = vst [vmem:[%s7863_s4 + $0xbf0] sm:$0xff] %v3108_v36  ;;  %4816 = vmatprep.mubr.f32.mxu0 %v7185_v4  ;;  %v3378_v1 = vpop.f32.mrf.mxu1 }
 0x32a   : > { %v3110_v52 = vpop.f32.mrf.mxu0  ;;  %6529 = vst [vmem:[%s7863_s4 + $0xc10] sm:$0xff] %v3378_v1  ;;  %6704 = vmatmul.mubr.msk.f32.gmra.mxu1 %vm197_vm0, %v9090_v27 }
 0x32b   : > { %6494 = vst [vmem:[%s7863_s4 + $0xbf8] sm:$0xff] %v3110_v52  ;;  %v3380_v46 = vpop.f32.mrf.mxu1  ;;  %4378 = vmatprep.mubr.f32.mxu1 %v7185_v4 }
 0x32c   : > { %v3822_v6 = vpop.f32.mrf.mxu0  ;;  %6799 = vmatmul.mubr.msk.f32.gmra.mxu0 %vm197_vm0, %v9075_v42  ;;  %6530 = vst [vmem:[%s7863_s4 + $0xc18] sm:$0xff] %v3380_v46  ;;  %v9240_v46 = vld [vmem:[%s9886_s1 + $0xd8] sm:$0xff] }
 0x32d   : > { %6623 = vst [vmem:[%s7863_s4 + $0xe00] sm:$0xff] %v3822_v6  ;;  %4822 = vmatprep.mubr.f32.mxu0 %v7185_v4  ;;  %v3384_v15 = vpop.f32.mrf.mxu1 }
 0x32e   : > { %v3824_v48 = vpop.f32.mrf.mxu0  ;;  %6531 = vst [vmem:[%s7863_s4 + $0xc20] sm:$0xff] %v3384_v15  ;;  %6705 = vmatmul.mubr.msk.f32.gmra.mxu1 %vm197_vm0, %v9105_v26 }
 0x32f   : > { %6624 = vst [vmem:[%s7863_s4 + $0xe08] sm:$0xff] %v3824_v48  ;;  %v3386_v49 = vpop.f32.mrf.mxu1  ;;  %4384 = vmatprep.mubr.f32.mxu1 %v7185_v4 }
 0x330   : > { %v3828_v28 = vpop.f32.mrf.mxu0  ;;  %6800 = vmatmul.mubr.msk.f32.gmra.mxu0 %vm197_vm0, %v9090_v27  ;;  %6532 = vst [vmem:[%s7863_s4 + $0xc28] sm:$0xff] %v3386_v49 }
 0x331   : > { %6625 = vst [vmem:[%s7863_s4 + $0xe10] sm:$0xff] %v3828_v28  ;;  %4828 = vmatprep.mubr.f32.mxu0 %v7185_v4  ;;  %v3390_v51 = vpop.f32.mrf.mxu1  ;;  %v9255_v28 = vld [vmem:[%s9886_s1 + $0xe0] sm:$0xff] }
 0x332   : > { %v3830_v24 = vpop.f32.mrf.mxu0  ;;  %6533 = vst [vmem:[%s7863_s4 + $0xc30] sm:$0xff] %v3390_v51  ;;  %6706 = vmatmul.mubr.msk.f32.gmra.mxu1 %vm197_vm0, %v9120_v20 }
 0x333   : > { %6626 = vst [vmem:[%s7863_s4 + $0xe18] sm:$0xff] %v3830_v24  ;;  %v3392_v14 = vpop.f32.mrf.mxu1  ;;  %4390 = vmatprep.mubr.f32.mxu1 %v7185_v4 }
 0x334   : > { %v3834_v10 = vpop.f32.mrf.mxu0  ;;  %6801 = vmatmul.mubr.msk.f32.gmra.mxu0 %vm197_vm0, %v9105_v26  ;;  %6534 = vst [vmem:[%s7863_s4 + $0xc38] sm:$0xff] %v3392_v14 }
 0x335   : > { %6627 = vst [vmem:[%s7863_s4 + $0xe20] sm:$0xff] %v3834_v10  ;;  %4834 = vmatprep.mubr.f32.mxu0 %v7185_v4  ;;  %v3396_v11 = vpop.f32.mrf.mxu1 }
 0x336   : > { %v3836_v59 = vpop.f32.mrf.mxu0  ;;  %6535 = vst [vmem:[%s7863_s4 + $0xc40] sm:$0xff] %v3396_v11  ;;  %6707 = vmatmul.mubr.msk.f32.gmra.mxu1 %vm197_vm0, %v9135_v57  ;;  %v9270_v11 = vld [vmem:[%s9886_s1 + $0xe8] sm:$0xff] }
 0x337   : > { %6628 = vst [vmem:[%s7863_s4 + $0xe28] sm:$0xff] %v3836_v59  ;;  %v3398_v12 = vpop.f32.mrf.mxu1  ;;  %4396 = vmatprep.mubr.f32.mxu1 %v7185_v4 }
 0x338   : > { %v3840_v62 = vpop.f32.mrf.mxu0  ;;  %6802 = vmatmul.mubr.msk.f32.gmra.mxu0 %vm197_vm0, %v9120_v20  ;;  %6536 = vst [vmem:[%s7863_s4 + $0xc48] sm:$0xff] %v3398_v12 }
 0x339   : > { %6629 = vst [vmem:[%s7863_s4 + $0xe30] sm:$0xff] %v3840_v62  ;;  %4840 = vmatprep.mubr.f32.mxu0 %v7185_v4  ;;  %v3402_v23 = vpop.f32.mrf.mxu1 }
 0x33a   : > { %v3842_v13 = vpop.f32.mrf.mxu0  ;;  %6537 = vst [vmem:[%s7863_s4 + $0xc50] sm:$0xff] %v3402_v23  ;;  %6708 = vmatmul.mubr.msk.f32.gmra.mxu1 %vm197_vm0, %v9150_v60 }
 0x33b   : > { %6630 = vst [vmem:[%s7863_s4 + $0xe38] sm:$0xff] %v3842_v13  ;;  %v3404_v0 = vpop.f32.mrf.mxu1  ;;  %4402 = vmatprep.mubr.f32.mxu1 %v7185_v4  ;;  %v9285_v13 = vld [vmem:[%s9886_s1 + $0xf0] sm:$0xff] }
 0x33c   : > { %v3846_v63 = vpop.f32.mrf.mxu0  ;;  %6803 = vmatmul.mubr.msk.f32.gmra.mxu0 %vm197_vm0, %v9135_v57  ;;  %6538 = vst [vmem:[%s7863_s4 + $0xc58] sm:$0xff] %v3404_v0 }
 0x33d   : > { %6631 = vst [vmem:[%s7863_s4 + $0xe40] sm:$0xff] %v3846_v63  ;;  %4846 = vmatprep.mubr.f32.mxu0 %v7185_v4  ;;  %v3408_v56 = vpop.f32.mrf.mxu1 }
 0x33e   : > { %v3848_v50 = vpop.f32.mrf.mxu0  ;;  %6539 = vst [vmem:[%s7863_s4 + $0xc60] sm:$0xff] %v3408_v56  ;;  %6709 = vmatmul.mubr.msk.f32.gmra.mxu1 %vm197_vm0, %v9165_v22 }
 0x33f   : > { %6632 = vst [vmem:[%s7863_s4 + $0xe48] sm:$0xff] %v3848_v50  ;;  %v3410_v34 = vpop.f32.mrf.mxu1  ;;  %4408 = vmatprep.mubr.f32.mxu1 %v7185_v4 }
 0x340   : > { %v3852_v18 = vpop.f32.mrf.mxu0  ;;  %6804 = vmatmul.mubr.msk.f32.gmra.mxu0 %vm197_vm0, %v9150_v60  ;;  %6540 = vst [vmem:[%s7863_s4 + $0xc68] sm:$0xff] %v3410_v34  ;;  %v9300_v34 = vld [vmem:[%s9886_s1 + $0xf8] sm:$0xff] }
 0x341   : > { %6633 = vst [vmem:[%s7863_s4 + $0xe50] sm:$0xff] %v3852_v18  ;;  %4852 = vmatprep.mubr.f32.mxu0 %v7185_v4  ;;  %v3414_v19 = vpop.f32.mrf.mxu1 }
 0x342   : > { %v3854_v41 = vpop.f32.mrf.mxu0  ;;  %6541 = vst [vmem:[%s7863_s4 + $0xc70] sm:$0xff] %v3414_v19  ;;  %6710 = vmatmul.mubr.msk.f32.gmra.mxu1 %vm197_vm0, %v9180_v5 }
 0x343   : > { %6634 = vst [vmem:[%s7863_s4 + $0xe58] sm:$0xff] %v3854_v41  ;;  %v3416_v54 = vpop.f32.mrf.mxu1  ;;  %4414 = vmatprep.mubr.f32.mxu1 %v7185_v4 }
 0x344   : > { %v3858_v33 = vpop.f32.mrf.mxu0  ;;  %6805 = vmatmul.mubr.msk.f32.gmra.mxu0 %vm197_vm0, %v9165_v22  ;;  %6542 = vst [vmem:[%s7863_s4 + $0xc78] sm:$0xff] %v3416_v54 }
 0x345   : > { %6635 = vst [vmem:[%s7863_s4 + $0xe60] sm:$0xff] %v3858_v33  ;;  %4858 = vmatprep.mubr.f32.mxu0 %v7185_v4  ;;  %v3420_v2 = vpop.f32.mrf.mxu1  ;;  %v4978_v33 = vld [vmem:[%s9886_s1] sm:$0xff] }
 0x346   : > { %v3860_v31 = vpop.f32.mrf.mxu0  ;;  %6543 = vst [vmem:[%s7863_s4 + $0xc80] sm:$0xff] %v3420_v2  ;;  %6711 = vmatmul.mubr.msk.f32.gmra.mxu1 %vm197_vm0, %v9195_v39 }
 0x347   : > { %6636 = vst [vmem:[%s7863_s4 + $0xe68] sm:$0xff] %v3860_v31  ;;  %v3422_v44 = vpop.f32.mrf.mxu1  ;;  %4420 = vmatprep.mubr.f32.mxu1 %v7185_v4 }
 0x348   : > { %v3864_v16 = vpop.f32.mrf.mxu0  ;;  %6806 = vmatmul.mubr.msk.f32.gmra.mxu0 %vm197_vm0, %v9180_v5  ;;  %6544 = vst [vmem:[%s7863_s4 + $0xc88] sm:$0xff] %v3422_v44 }
 0x349   : > { %6637 = vst [vmem:[%s7863_s4 + $0xe70] sm:$0xff] %v3864_v16  ;;  %4864 = vmatprep.mubr.f32.mxu0 %v7185_v4  ;;  %v3426_v7 = vpop.f32.mrf.mxu1 }
 0x34a   : > { %v3866_v29 = vpop.f32.mrf.mxu0  ;;  %6545 = vst [vmem:[%s7863_s4 + $0xc90] sm:$0xff] %v3426_v7  ;;  %6712 = vmatmul.mubr.msk.f32.gmra.mxu1 %vm197_vm0, %v9210_v43 }
 0x34b   : > { %6638 = vst [vmem:[%s7863_s4 + $0xe78] sm:$0xff] %v3866_v29  ;;  %v3428_v9 = vpop.f32.mrf.mxu1  ;;  %4426 = vmatprep.mubr.f32.mxu1 %v7185_v4 }
 0x34c   : > { %v3870_v37 = vpop.f32.mrf.mxu0  ;;  %6807 = vmatmul.mubr.msk.f32.gmra.mxu0 %vm197_vm0, %v9195_v39  ;;  %6546 = vst [vmem:[%s7863_s4 + $0xc98] sm:$0xff] %v3428_v9 }
 0x34d   : > { %6639 = vst [vmem:[%s7863_s4 + $0xe80] sm:$0xff] %v3870_v37  ;;  %4870 = vmatprep.mubr.f32.mxu0 %v7185_v4  ;;  %v3432_v36 = vpop.f32.mrf.mxu1 }
 0x34e   : > { %v3872_v1 = vpop.f32.mrf.mxu0  ;;  %6547 = vst [vmem:[%s7863_s4 + $0xca0] sm:$0xff] %v3432_v36  ;;  %6713 = vmatmul.mubr.msk.f32.gmra.mxu1 %vm197_vm0, %v9225_v61 }
 0x34f   : > { %6640 = vst [vmem:[%s7863_s4 + $0xe88] sm:$0xff] %v3872_v1  ;;  %v3434_v52 = vpop.f32.mrf.mxu1  ;;  %4432 = vmatprep.mubr.f32.mxu1 %v7185_v4 }
 0x350   : > { %v3876_v6 = vpop.f32.mrf.mxu0  ;;  %6808 = vmatmul.mubr.msk.f32.gmra.mxu0 %vm197_vm0, %v9210_v43  ;;  %6548 = vst [vmem:[%s7863_s4 + $0xca8] sm:$0xff] %v3434_v52 }
 0x351   : > { %6641 = vst [vmem:[%s7863_s4 + $0xe90] sm:$0xff] %v3876_v6  ;;  %4876 = vmatprep.mubr.f32.mxu0 %v7185_v4  ;;  %v3438_v15 = vpop.f32.mrf.mxu1 }
 0x352   : > { %v3878_v48 = vpop.f32.mrf.mxu0  ;;  %6549 = vst [vmem:[%s7863_s4 + $0xcb0] sm:$0xff] %v3438_v15  ;;  %6714 = vmatmul.mubr.msk.f32.gmra.mxu1 %vm197_vm0, %v9240_v46 }
 0x353   : > { %6642 = vst [vmem:[%s7863_s4 + $0xe98] sm:$0xff] %v3878_v48  ;;  %v3440_v49 = vpop.f32.mrf.mxu1  ;;  %4438 = vmatprep.mubr.f32.mxu1 %v7185_v4 }
 0x354   : > { %v3882_v51 = vpop.f32.mrf.mxu0  ;;  %6809 = vmatmul.mubr.msk.f32.gmra.mxu0 %vm197_vm0, %v9225_v61  ;;  %6550 = vst [vmem:[%s7863_s4 + $0xcb8] sm:$0xff] %v3440_v49 }
 0x355   : > { %6643 = vst [vmem:[%s7863_s4 + $0xea0] sm:$0xff] %v3882_v51  ;;  %4882 = vmatprep.mubr.f32.mxu0 %v7185_v4  ;;  %v3444_v24 = vpop.f32.mrf.mxu1 }
 0x356   : > { %v3884_v14 = vpop.f32.mrf.mxu0  ;;  %6551 = vst [vmem:[%s7863_s4 + $0xcc0] sm:$0xff] %v3444_v24  ;;  %6715 = vmatmul.mubr.msk.f32.gmra.mxu1 %vm197_vm0, %v9255_v28 }
 0x357   : > { %6644 = vst [vmem:[%s7863_s4 + $0xea8] sm:$0xff] %v3884_v14  ;;  %v3446_v10 = vpop.f32.mrf.mxu1  ;;  %4444 = vmatprep.mubr.f32.mxu1 %v7185_v4 }
 0x358   : > { %v3888_v59 = vpop.f32.mrf.mxu0  ;;  %6810 = vmatmul.mubr.msk.f32.gmra.mxu0 %vm197_vm0, %v9240_v46  ;;  %6552 = vst [vmem:[%s7863_s4 + $0xcc8] sm:$0xff] %v3446_v10 }
 0x359   : > { %6645 = vst [vmem:[%s7863_s4 + $0xeb0] sm:$0xff] %v3888_v59  ;;  %4888 = vmatprep.mubr.f32.mxu0 %v7185_v4  ;;  %v3450_v12 = vpop.f32.mrf.mxu1 }
 0x35a   : > { %v3890_v62 = vpop.f32.mrf.mxu0  ;;  %6553 = vst [vmem:[%s7863_s4 + $0xcd0] sm:$0xff] %v3450_v12  ;;  %6716 = vmatmul.mubr.msk.f32.gmra.mxu1 %vm197_vm0, %v9270_v11 }
 0x35b   : > { %6646 = vst [vmem:[%s7863_s4 + $0xeb8] sm:$0xff] %v3890_v62  ;;  %v3452_v23 = vpop.f32.mrf.mxu1  ;;  %4450 = vmatprep.mubr.f32.mxu1 %v7185_v4 }
 0x35c   : > { %v3894_v0 = vpop.f32.mrf.mxu0  ;;  %6811 = vmatmul.mubr.msk.f32.gmra.mxu0 %vm197_vm0, %v9255_v28  ;;  %6554 = vst [vmem:[%s7863_s4 + $0xcd8] sm:$0xff] %v3452_v23 }
 0x35d   : > { %6647 = vst [vmem:[%s7863_s4 + $0xec0] sm:$0xff] %v3894_v0  ;;  %4894 = vmatprep.mubr.f32.mxu0 %v7185_v4  ;;  %v3456_v63 = vpop.f32.mrf.mxu1 }
 0x35e   : > { %v3896_v56 = vpop.f32.mrf.mxu0  ;;  %6555 = vst [vmem:[%s7863_s4 + $0xce0] sm:$0xff] %v3456_v63  ;;  %6717 = vmatmul.mubr.msk.f32.gmra.mxu1 %vm197_vm0, %v9285_v13 }
 0x35f   : > { %6648 = vst [vmem:[%s7863_s4 + $0xec8] sm:$0xff] %v3896_v56  ;;  %v3458_v50 = vpop.f32.mrf.mxu1  ;;  %4456 = vmatprep.mubr.f32.mxu1 %v7185_v4 }
 0x360   : > { %v3900_v18 = vpop.f32.mrf.mxu0  ;;  %6812 = vmatmul.mubr.msk.f32.gmra.mxu0 %vm197_vm0, %v9270_v11  ;;  %6556 = vst [vmem:[%s7863_s4 + $0xce8] sm:$0xff] %v3458_v50 }
 0x361   : > { %6649 = vst [vmem:[%s7863_s4 + $0xed0] sm:$0xff] %v3900_v18  ;;  %4900 = vmatprep.mubr.f32.mxu0 %v7185_v4  ;;  %v3462_v19 = vpop.f32.mrf.mxu1 }
 0x362   : > { %v3902_v41 = vpop.f32.mrf.mxu0  ;;  %6557 = vst [vmem:[%s7863_s4 + $0xcf0] sm:$0xff] %v3462_v19  ;;  %6718 = vmatmul.mubr.msk.f32.gmra.mxu1 %vm197_vm0, %v9300_v34 }
 0x363   : > { %6650 = vst [vmem:[%s7863_s4 + $0xed8] sm:$0xff] %v3902_v41  ;;  %v3464_v54 = vpop.f32.mrf.mxu1  ;;  %5170 = vmatprep.mubr.f32.mxu1 %v7185_v4 }
 0x364   : > { %v3906_v2 = vpop.f32.mrf.mxu0  ;;  %6813 = vmatmul.mubr.msk.f32.gmra.mxu0 %vm197_vm0, %v9285_v13  ;;  %6558 = vst [vmem:[%s7863_s4 + $0xcf8] sm:$0xff] %v3464_v54 }
 0x365   : > { %6651 = vst [vmem:[%s7863_s4 + $0xee0] sm:$0xff] %v3906_v2  ;;  %4906 = vmatprep.mubr.f32.mxu0 %v7185_v4  ;;  %v3468_v31 = vpop.f32.mrf.mxu1 }
 0x366   : > { %v3908_v44 = vpop.f32.mrf.mxu0  ;;  %6559 = vst [vmem:[%s7863_s4 + $0xd00] sm:$0xff] %v3468_v31  ;;  %6879 = vmatmul.mubr.msk.f32.vlgmr.msra.gmra.mxu1 %vm197_vm0, %v4978_v33 }
 0x367   : > { %6652 = vst [vmem:[%s7863_s4 + $0xee8] sm:$0xff] %v3908_v44  ;;  %v3470_v16 = vpop.f32.mrf.mxu1  ;;  %5176 = vmatprep.mubr.f32.mxu1 %v7185_v4 }
 0x368   : > { %v3912_v7 = vpop.f32.mrf.mxu0  ;;  %6814 = vmatmul.mubr.msk.f32.gmra.mxu0 %vm197_vm0, %v9300_v34  ;;  %6560 = vst [vmem:[%s7863_s4 + $0xd08] sm:$0xff] %v3470_v16 }
 0x369   : > { %6653 = vst [vmem:[%s7863_s4 + $0xef0] sm:$0xff] %v3912_v7  ;;  %5620 = vmatprep.mubr.f32.mxu0 %v7185_v4  ;;  %v3474_v29 = vpop.f32.mrf.mxu1 }
 0x36a   : > { %v3914_v9 = vpop.f32.mrf.mxu0  ;;  %6561 = vst [vmem:[%s7863_s4 + $0xd10] sm:$0xff] %v3474_v29  ;;  %6880 = vmatmul.mubr.msk.f32.gmra.mxu1 %vm197_vm0, %v8845_v47 }
 0x36b   : > { %6654 = vst [vmem:[%s7863_s4 + $0xef8] sm:$0xff] %v3914_v9  ;;  %v3476_v37 = vpop.f32.mrf.mxu1  ;;  %5182 = vmatprep.mubr.f32.mxu1 %v7185_v4 }
 0x36c   : > { %v3918_v36 = vpop.f32.mrf.mxu0  ;;  %6975 = vmatmul.mubr.msk.f32.vlgmr.msra.gmra.mxu0 %vm197_vm0, %v4978_v33  ;;  %6562 = vst [vmem:[%s7863_s4 + $0xd18] sm:$0xff] %v3476_v37 }
 0x36d   : > { %6655 = vst [vmem:[%s7863_s4 + $0xf00] sm:$0xff] %v3918_v36  ;;  %5626 = vmatprep.mubr.f32.mxu0 %v7185_v4  ;;  %v3480_v1 = vpop.f32.mrf.mxu1 }
 0x36e   : > { %v3920_v52 = vpop.f32.mrf.mxu0  ;;  %6563 = vst [vmem:[%s7863_s4 + $0xd20] sm:$0xff] %v3480_v1  ;;  %6881 = vmatmul.mubr.msk.f32.gmra.mxu1 %vm197_vm0, %v8863_v53 }
 0x36f   : > { %6656 = vst [vmem:[%s7863_s4 + $0xf08] sm:$0xff] %v3920_v52  ;;  %v3482_v6 = vpop.f32.mrf.mxu1  ;;  %5188 = vmatprep.mubr.f32.mxu1 %v7185_v4 }
 0x370   : > { %v3924_v15 = vpop.f32.mrf.mxu0  ;;  %6976 = vmatmul.mubr.msk.f32.gmra.mxu0 %vm197_vm0, %v8845_v47  ;;  %6564 = vst [vmem:[%s7863_s4 + $0xd28] sm:$0xff] %v3482_v6 }
 0x371   : > { %6657 = vst [vmem:[%s7863_s4 + $0xf10] sm:$0xff] %v3924_v15  ;;  %5632 = vmatprep.mubr.f32.mxu0 %v7185_v4  ;;  %v3486_v48 = vpop.f32.mrf.mxu1 }
 0x372   : > { %v3926_v49 = vpop.f32.mrf.mxu0  ;;  %6565 = vst [vmem:[%s7863_s4 + $0xd30] sm:$0xff] %v3486_v48  ;;  %6882 = vmatmul.mubr.msk.f32.gmra.mxu1 %vm197_vm0, %v8880_v45 }
 0x373   : > { %6658 = vst [vmem:[%s7863_s4 + $0xf18] sm:$0xff] %v3926_v49  ;;  %v3488_v51 = vpop.f32.mrf.mxu1  ;;  %5194 = vmatprep.mubr.f32.mxu1 %v7185_v4 }
 0x374   : > { %v3930_v24 = vpop.f32.mrf.mxu0  ;;  %6977 = vmatmul.mubr.msk.f32.gmra.mxu0 %vm197_vm0, %v8863_v53  ;;  %6566 = vst [vmem:[%s7863_s4 + $0xd38] sm:$0xff] %v3488_v51 }
 0x375   : > { %6659 = vst [vmem:[%s7863_s4 + $0xf20] sm:$0xff] %v3930_v24  ;;  %5638 = vmatprep.mubr.f32.mxu0 %v7185_v4  ;;  %v3492_v47 = vpop.f32.mrf.mxu1 }
 0x376   : > { %v3932_v14 = vpop.f32.mrf.mxu0  ;;  %6567 = vst [vmem:[%s7863_s4 + $0xd40] sm:$0xff] %v3492_v47  ;;  %6883 = vmatmul.mubr.msk.f32.gmra.mxu1 %vm197_vm0, %v8895_v32 }
 0x377   : > { %6660 = vst [vmem:[%s7863_s4 + $0xf28] sm:$0xff] %v3932_v14  ;;  %v3494_v10 = vpop.f32.mrf.mxu1  ;;  %5200 = vmatprep.mubr.f32.mxu1 %v7185_v4 }
 0x378   : > { %v3936_v59 = vpop.f32.mrf.mxu0  ;;  %6978 = vmatmul.mubr.msk.f32.gmra.mxu0 %vm197_vm0, %v8880_v45  ;;  %6568 = vst [vmem:[%s7863_s4 + $0xd48] sm:$0xff] %v3494_v10 }
 0x379   : > { %6661 = vst [vmem:[%s7863_s4 + $0xf30] sm:$0xff] %v3936_v59  ;;  %5644 = vmatprep.mubr.f32.mxu0 %v7185_v4  ;;  %v3498_v53 = vpop.f32.mrf.mxu1 }
 0x37a   : > { %v3938_v12 = vpop.f32.mrf.mxu0  ;;  %6569 = vst [vmem:[%s7863_s4 + $0xd50] sm:$0xff] %v3498_v53  ;;  %6884 = vmatmul.mubr.msk.f32.gmra.mxu1 %vm197_vm0, %v8910_v25 }
 0x37b   : > { %6662 = vst [vmem:[%s7863_s4 + $0xf38] sm:$0xff] %v3938_v12  ;;  %v3500_v62 = vpop.f32.mrf.mxu1  ;;  %5206 = vmatprep.mubr.f32.mxu1 %v7185_v4 }
 0x37c   : > { %v3942_v23 = vpop.f32.mrf.mxu0  ;;  %6979 = vmatmul.mubr.msk.f32.gmra.mxu0 %vm197_vm0, %v8895_v32  ;;  %6570 = vst [vmem:[%s7863_s4 + $0xd58] sm:$0xff] %v3500_v62 }
 0x37d   : > { %6663 = vst [vmem:[%s7863_s4 + $0xf40] sm:$0xff] %v3942_v23  ;;  %5650 = vmatprep.mubr.f32.mxu0 %v7185_v4  ;;  %v3504_v45 = vpop.f32.mrf.mxu1 }
 0x37e   : > { %v3944_v0 = vpop.f32.mrf.mxu0  ;;  %6571 = vst [vmem:[%s7863_s4 + $0xd60] sm:$0xff] %v3504_v45  ;;  %6885 = vmatmul.mubr.msk.f32.gmra.mxu1 %vm197_vm0, %v8925_v35 }
 0x37f   : > { %6664 = vst [vmem:[%s7863_s4 + $0xf48] sm:$0xff] %v3944_v0  ;;  %v3506_v63 = vpop.f32.mrf.mxu1  ;;  %5212 = vmatprep.mubr.f32.mxu1 %v7185_v4 }
 0x380   : > { %v3948_v56 = vpop.f32.mrf.mxu0  ;;  %6980 = vmatmul.mubr.msk.f32.gmra.mxu0 %vm197_vm0, %v8910_v25  ;;  %6572 = vst [vmem:[%s7863_s4 + $0xd68] sm:$0xff] %v3506_v63 }
 0x381   : > { %6665 = vst [vmem:[%s7863_s4 + $0xf50] sm:$0xff] %v3948_v56  ;;  %5656 = vmatprep.mubr.f32.mxu0 %v7185_v4  ;;  %v3510_v32 = vpop.f32.mrf.mxu1 }
 0x382   : > { %v3950_v50 = vpop.f32.mrf.mxu0  ;;  %6573 = vst [vmem:[%s7863_s4 + $0xd70] sm:$0xff] %v3510_v32  ;;  %6886 = vmatmul.mubr.msk.f32.gmra.mxu1 %vm197_vm0, %v8940_v58 }
 0x383   : > { %6666 = vst [vmem:[%s7863_s4 + $0xf58] sm:$0xff] %v3950_v50  ;;  %v3512_v18 = vpop.f32.mrf.mxu1  ;;  %5218 = vmatprep.mubr.f32.mxu1 %v7185_v4 }
 0x384   : > { %v3954_v19 = vpop.f32.mrf.mxu0  ;;  %6981 = vmatmul.mubr.msk.f32.gmra.mxu0 %vm197_vm0, %v8925_v35  ;;  %6574 = vst [vmem:[%s7863_s4 + $0xd78] sm:$0xff] %v3512_v18 }
 0x385   : > { %6667 = vst [vmem:[%s7863_s4 + $0xf60] sm:$0xff] %v3954_v19  ;;  %5662 = vmatprep.mubr.f32.mxu0 %v7185_v4  ;;  %v3516_v25 = vpop.f32.mrf.mxu1 }
 0x386   : > { %v3956_v41 = vpop.f32.mrf.mxu0  ;;  %6575 = vst [vmem:[%s7863_s4 + $0xd80] sm:$0xff] %v3516_v25  ;;  %6887 = vmatmul.mubr.msk.f32.gmra.mxu1 %vm197_vm0, %v8955_v17 }
 0x387   : > { %6668 = vst [vmem:[%s7863_s4 + $0xf68] sm:$0xff] %v3956_v41  ;;  %v3518_v54 = vpop.f32.mrf.mxu1  ;;  %5224 = vmatprep.mubr.f32.mxu1 %v7185_v4 }
 0x388   : > { %v3960_v33 = vpop.f32.mrf.mxu0  ;;  %6982 = vmatmul.mubr.msk.f32.gmra.mxu0 %vm197_vm0, %v8940_v58  ;;  %6576 = vst [vmem:[%s7863_s4 + $0xd88] sm:$0xff] %v3518_v54 }
 0x389   : > { %6669 = vst [vmem:[%s7863_s4 + $0xf70] sm:$0xff] %v3960_v33  ;;  %5668 = vmatprep.mubr.f32.mxu0 %v7185_v4  ;;  %v3522_v35 = vpop.f32.mrf.mxu1 }
 0x38a   : > { %v3962_v2 = vpop.f32.mrf.mxu0  ;;  %6577 = vst [vmem:[%s7863_s4 + $0xd90] sm:$0xff] %v3522_v35  ;;  %6888 = vmatmul.mubr.msk.f32.gmra.mxu1 %vm197_vm0, %v8970_v21 }
 0x38b   : > { %6670 = vst [vmem:[%s7863_s4 + $0xf78] sm:$0xff] %v3962_v2  ;;  %v3524_v31 = vpop.f32.mrf.mxu1  ;;  %5230 = vmatprep.mubr.f32.mxu1 %v7185_v4 }
 0x38c   : > { %v3966_v44 = vpop.f32.mrf.mxu0  ;;  %6983 = vmatmul.mubr.msk.f32.gmra.mxu0 %vm197_vm0, %v8955_v17  ;;  %6578 = vst [vmem:[%s7863_s4 + $0xd98] sm:$0xff] %v3524_v31 }
 0x38d   : > { %6671 = vst [vmem:[%s7863_s4 + $0xf80] sm:$0xff] %v3966_v44  ;;  %5674 = vmatprep.mubr.f32.mxu0 %v7185_v4  ;;  %v3528_v58 = vpop.f32.mrf.mxu1 }
 0x38e   : > { %v3968_v16 = vpop.f32.mrf.mxu0  ;;  %6579 = vst [vmem:[%s7863_s4 + $0xda0] sm:$0xff] %v3528_v58  ;;  %6889 = vmatmul.mubr.msk.f32.gmra.mxu1 %vm197_vm0, %v8985_v38 }
 0x38f   : > { %6672 = vst [vmem:[%s7863_s4 + $0xf88] sm:$0xff] %v3968_v16  ;;  %v3530_v7 = vpop.f32.mrf.mxu1  ;;  %5236 = vmatprep.mubr.f32.mxu1 %v7185_v4 }
 0x390   : > { %v3972_v29 = vpop.f32.mrf.mxu0  ;;  %6984 = vmatmul.mubr.msk.f32.gmra.mxu0 %vm197_vm0, %v8970_v21  ;;  %6580 = vst [vmem:[%s7863_s4 + $0xda8] sm:$0xff] %v3530_v7 }
 0x391   : > { %6673 = vst [vmem:[%s7863_s4 + $0xf90] sm:$0xff] %v3972_v29  ;;  %5680 = vmatprep.mubr.f32.mxu0 %v7185_v4  ;;  %v3534_v17 = vpop.f32.mrf.mxu1 }
 0x392   : > { %v3974_v9 = vpop.f32.mrf.mxu0  ;;  %6581 = vst [vmem:[%s7863_s4 + $0xdb0] sm:$0xff] %v3534_v17  ;;  %6890 = vmatmul.mubr.msk.f32.gmra.mxu1 %vm197_vm0, %v9000_v55 }
 0x393   : > { %6674 = vst [vmem:[%s7863_s4 + $0xf98] sm:$0xff] %v3974_v9  ;;  %v3536_v37 = vpop.f32.mrf.mxu1  ;;  %5242 = vmatprep.mubr.f32.mxu1 %v7185_v4 }
 0x394   : > { %v3978_v36 = vpop.f32.mrf.mxu0  ;;  %6985 = vmatmul.mubr.msk.f32.gmra.mxu0 %vm197_vm0, %v8985_v38  ;;  %6582 = vst [vmem:[%s7863_s4 + $0xdb8] sm:$0xff] %v3536_v37 }
 0x395   : > { %6675 = vst [vmem:[%s7863_s4 + $0xfa0] sm:$0xff] %v3978_v36  ;;  %5686 = vmatprep.mubr.f32.mxu0 %v7185_v4  ;;  %v3540_v21 = vpop.f32.mrf.mxu1 }
 0x396   : > { %v3980_v1 = vpop.f32.mrf.mxu0  ;;  %6583 = vst [vmem:[%s7863_s4 + $0xdc0] sm:$0xff] %v3540_v21  ;;  %6891 = vmatmul.mubr.msk.f32.gmra.mxu1 %vm197_vm0, %v9015_v3 }
 0x397   : > { %6676 = vst [vmem:[%s7863_s4 + $0xfa8] sm:$0xff] %v3980_v1  ;;  %v3542_v52 = vpop.f32.mrf.mxu1  ;;  %5248 = vmatprep.mubr.f32.mxu1 %v7185_v4 }
 0x398   : > { %v3984_v6 = vpop.f32.mrf.mxu0  ;;  %6986 = vmatmul.mubr.msk.f32.gmra.mxu0 %vm197_vm0, %v9000_v55  ;;  %6584 = vst [vmem:[%s7863_s4 + $0xdc8] sm:$0xff] %v3542_v52 }
 0x399   : > { %6677 = vst [vmem:[%s7863_s4 + $0xfb0] sm:$0xff] %v3984_v6  ;;  %5692 = vmatprep.mubr.f32.mxu0 %v7185_v4  ;;  %v3546_v38 = vpop.f32.mrf.mxu1 }
 0x39a   : > { %v3986_v15 = vpop.f32.mrf.mxu0  ;;  %6585 = vst [vmem:[%s7863_s4 + $0xdd0] sm:$0xff] %v3546_v38  ;;  %6892 = vmatmul.mubr.msk.f32.gmra.mxu1 %vm197_vm0, %v9030_v8 }
 0x39b   : > { %6678 = vst [vmem:[%s7863_s4 + $0xfb8] sm:$0xff] %v3986_v15  ;;  %v3548_v48 = vpop.f32.mrf.mxu1  ;;  %5254 = vmatprep.mubr.f32.mxu1 %v7185_v4 }
 0x39c   : > { %v3990_v49 = vpop.f32.mrf.mxu0  ;;  %6987 = vmatmul.mubr.msk.f32.gmra.mxu0 %vm197_vm0, %v9015_v3  ;;  %6586 = vst [vmem:[%s7863_s4 + $0xdd8] sm:$0xff] %v3548_v48 }
 0x39d   : > { %6679 = vst [vmem:[%s7863_s4 + $0xfc0] sm:$0xff] %v3990_v49  ;;  %5698 = vmatprep.mubr.f32.mxu0 %v7185_v4  ;;  %v3552_v55 = vpop.f32.mrf.mxu1 }
 0x39e   : > { %v3992_v51 = vpop.f32.mrf.mxu0  ;;  %6587 = vst [vmem:[%s7863_s4 + $0xde0] sm:$0xff] %v3552_v55  ;;  %6893 = vmatmul.mubr.msk.f32.gmra.mxu1 %vm197_vm0, %v9045_v40 }
 0x39f   : > { %6680 = vst [vmem:[%s7863_s4 + $0xfc8] sm:$0xff] %v3992_v51  ;;  %v3554_v24 = vpop.f32.mrf.mxu1  ;;  %5260 = vmatprep.mubr.f32.mxu1 %v7185_v4 }
 0x3a0   : > { %v3996_v47 = vpop.f32.mrf.mxu0  ;;  %6988 = vmatmul.mubr.msk.f32.gmra.mxu0 %vm197_vm0, %v9030_v8  ;;  %6588 = vst [vmem:[%s7863_s4 + $0xde8] sm:$0xff] %v3554_v24 }
 0x3a1   : > { %6681 = vst [vmem:[%s7863_s4 + $0xfd0] sm:$0xff] %v3996_v47  ;;  %5704 = vmatprep.mubr.f32.mxu0 %v7185_v4  ;;  %v3558_v3 = vpop.f32.mrf.mxu1 }
 0x3a2   : > { %v3998_v14 = vpop.f32.mrf.mxu0  ;;  %6589 = vst [vmem:[%s7863_s4 + $0xdf0] sm:$0xff] %v3558_v3  ;;  %6894 = vmatmul.mubr.msk.f32.gmra.mxu1 %vm197_vm0, %v9060_v30 }
 0x3a3   : > { %6682 = vst [vmem:[%s7863_s4 + $0xfd8] sm:$0xff] %v3998_v14  ;;  %v3560_v10 = vpop.f32.mrf.mxu1  ;;  %5266 = vmatprep.mubr.f32.mxu1 %v7185_v4 }
 0x3a4   : > { %v4002_v59 = vpop.f32.mrf.mxu0  ;;  %6989 = vmatmul.mubr.msk.f32.gmra.mxu0 %vm197_vm0, %v9045_v40  ;;  %6590 = vst [vmem:[%s7863_s4 + $0xdf8] sm:$0xff] %v3560_v10 }
 0x3a5   : > { %6683 = vst [vmem:[%s7863_s4 + $0xfe0] sm:$0xff] %v4002_v59  ;;  %5710 = vmatprep.mubr.f32.mxu0 %v7185_v4  ;;  %v4272_v8 = vpop.f32.mrf.mxu1 }
 0x3a6   : > { %v4004_v53 = vpop.f32.mrf.mxu0  ;;  %6719 = vst [vmem:[%s7863_s4 + $0x1000] sm:$0xff] %v4272_v8  ;;  %6895 = vmatmul.mubr.msk.f32.gmra.mxu1 %vm197_vm0, %v9075_v42 }
 0x3a7   : > { %6684 = vst [vmem:[%s7863_s4 + $0xfe8] sm:$0xff] %v4004_v53  ;;  %v4274_v12 = vpop.f32.mrf.mxu1  ;;  %5272 = vmatprep.mubr.f32.mxu1 %v7185_v4 }
 0x3a8   : > { %v4008_v62 = vpop.f32.mrf.mxu0  ;;  %6990 = vmatmul.mubr.msk.f32.gmra.mxu0 %vm197_vm0, %v9060_v30  ;;  %6720 = vst [vmem:[%s7863_s4 + $0x1008] sm:$0xff] %v4274_v12 }
 0x3a9   : > { %6685 = vst [vmem:[%s7863_s4 + $0xff0] sm:$0xff] %v4008_v62  ;;  %5716 = vmatprep.mubr.f32.mxu0 %v7185_v4  ;;  %v4278_v40 = vpop.f32.mrf.mxu1 }
 0x3aa   : > { %v4010_v23 = vpop.f32.mrf.mxu0  ;;  %6721 = vst [vmem:[%s7863_s4 + $0x1010] sm:$0xff] %v4278_v40  ;;  %6896 = vmatmul.mubr.msk.f32.gmra.mxu1 %vm197_vm0, %v9090_v27 }
 0x3ab   : > { %6686 = vst [vmem:[%s7863_s4 + $0xff8] sm:$0xff] %v4010_v23  ;;  %v4280_v45 = vpop.f32.mrf.mxu1  ;;  %5278 = vmatprep.mubr.f32.mxu1 %v7185_v4 }
 0x3ac   : > { %v4722_v0 = vpop.f32.mrf.mxu0  ;;  %6991 = vmatmul.mubr.msk.f32.gmra.mxu0 %vm197_vm0, %v9075_v42  ;;  %6722 = vst [vmem:[%s7863_s4 + $0x1018] sm:$0xff] %v4280_v45 }
 0x3ad   : > { %6815 = vst [vmem:[%s7863_s4 + $0x1200] sm:$0xff] %v4722_v0  ;;  %5722 = vmatprep.mubr.f32.mxu0 %v7185_v4 }
 0x3ae   : > { %v4724_v30 = vpop.f32.mrf.mxu0  ;;  %v4284_v63 = vpop.f32.mrf.mxu1  ;;  %6897 = vmatmul.mubr.msk.f32.gmra.mxu1 %vm197_vm0, %v9105_v26 }
 0x3af   : > { %6816 = vst [vmem:[%s7863_s4 + $0x1208] sm:$0xff] %v4724_v30  ;;  %6723 = vst [vmem:[%s7863_s4 + $0x1020] sm:$0xff] %v4284_v63  ;;  %5284 = vmatprep.mubr.f32.mxu1 %v7185_v4 }
 0x3b0   : > { %v4728_v56 = vpop.f32.mrf.mxu0  ;;  %6992 = vmatmul.mubr.msk.f32.gmra.mxu0 %vm197_vm0, %v9090_v27  ;;  %v4286_v42 = vpop.f32.mrf.mxu1 }
 0x3b1   : > { %6817 = vst [vmem:[%s7863_s4 + $0x1210] sm:$0xff] %v4728_v56  ;;  %5728 = vmatprep.mubr.f32.mxu0 %v7185_v4  ;;  %6724 = vst [vmem:[%s7863_s4 + $0x1028] sm:$0xff] %v4286_v42 }
 0x3b2   : > { %v4730_v32 = vpop.f32.mrf.mxu0  ;;  %v4290_v50 = vpop.f32.mrf.mxu1  ;;  %6898 = vmatmul.mubr.msk.f32.gmra.mxu1 %vm197_vm0, %v9120_v20 }
 0x3b3   : > { %6818 = vst [vmem:[%s7863_s4 + $0x1218] sm:$0xff] %v4730_v32  ;;  %6725 = vst [vmem:[%s7863_s4 + $0x1030] sm:$0xff] %v4290_v50  ;;  %5290 = vmatprep.mubr.f32.mxu1 %v7185_v4 }
 0x3b4   : > { %v4734_v18 = vpop.f32.mrf.mxu0  ;;  %6993 = vmatmul.mubr.msk.f32.gmra.mxu0 %vm197_vm0, %v9105_v26  ;;  %v4292_v27 = vpop.f32.mrf.mxu1 }
 0x3b5   : > { %6819 = vst [vmem:[%s7863_s4 + $0x1220] sm:$0xff] %v4734_v18  ;;  %5734 = vmatprep.mubr.f32.mxu0 %v7185_v4  ;;  %6726 = vst [vmem:[%s7863_s4 + $0x1038] sm:$0xff] %v4292_v27 }
 0x3b6   : > { %v4736_v19 = vpop.f32.mrf.mxu0  ;;  %v4296_v25 = vpop.f32.mrf.mxu1  ;;  %6899 = vmatmul.mubr.msk.f32.gmra.mxu1 %vm197_vm0, %v9135_v57 }
 0x3b7   : > { %6820 = vst [vmem:[%s7863_s4 + $0x1228] sm:$0xff] %v4736_v19  ;;  %6727 = vst [vmem:[%s7863_s4 + $0x1040] sm:$0xff] %v4296_v25  ;;  %5296 = vmatprep.mubr.f32.mxu1 %v7185_v4 }
 0x3b8   : > { %v4740_v41 = vpop.f32.mrf.mxu0  ;;  %6994 = vmatmul.mubr.msk.f32.gmra.mxu0 %vm197_vm0, %v9120_v20  ;;  %v4298_v26 = vpop.f32.mrf.mxu1 }
 0x3b9   : > { %6821 = vst [vmem:[%s7863_s4 + $0x1230] sm:$0xff] %v4740_v41  ;;  %5740 = vmatprep.mubr.f32.mxu0 %v7185_v4  ;;  %6728 = vst [vmem:[%s7863_s4 + $0x1048] sm:$0xff] %v4298_v26 }
 0x3ba   : > { %v4742_v54 = vpop.f32.mrf.mxu0  ;;  %v4302_v33 = vpop.f32.mrf.mxu1  ;;  %6900 = vmatmul.mubr.msk.f32.gmra.mxu1 %vm197_vm0, %v9150_v60 }
 0x3bb   : > { %6822 = vst [vmem:[%s7863_s4 + $0x1238] sm:$0xff] %v4742_v54  ;;  %6729 = vst [vmem:[%s7863_s4 + $0x1050] sm:$0xff] %v4302_v33  ;;  %5302 = vmatprep.mubr.f32.mxu1 %v7185_v4 }
 0x3bc   : > { %v4746_v35 = vpop.f32.mrf.mxu0  ;;  %6995 = vmatmul.mubr.msk.f32.gmra.mxu0 %vm197_vm0, %v9135_v57  ;;  %v4304_v20 = vpop.f32.mrf.mxu1 }
 0x3bd   : > { %6823 = vst [vmem:[%s7863_s4 + $0x1240] sm:$0xff] %v4746_v35  ;;  %5746 = vmatprep.mubr.f32.mxu0 %v7185_v4  ;;  %6730 = vst [vmem:[%s7863_s4 + $0x1058] sm:$0xff] %v4304_v20 }
 0x3be   : > { %v4748_v2 = vpop.f32.mrf.mxu0  ;;  %v4308_v31 = vpop.f32.mrf.mxu1  ;;  %6901 = vmatmul.mubr.msk.f32.gmra.mxu1 %vm197_vm0, %v9165_v22 }
 0x3bf   : > { %6824 = vst [vmem:[%s7863_s4 + $0x1248] sm:$0xff] %v4748_v2  ;;  %6731 = vst [vmem:[%s7863_s4 + $0x1060] sm:$0xff] %v4308_v31  ;;  %5308 = vmatprep.mubr.f32.mxu1 %v7185_v4 }
 0x3c0   : > { %v4752_v44 = vpop.f32.mrf.mxu0  ;;  %6996 = vmatmul.mubr.msk.f32.gmra.mxu0 %vm197_vm0, %v9150_v60  ;;  %v4310_v57 = vpop.f32.mrf.mxu1 }
 0x3c1   : > { %6825 = vst [vmem:[%s7863_s4 + $0x1250] sm:$0xff] %v4752_v44  ;;  %5752 = vmatprep.mubr.f32.mxu0 %v7185_v4  ;;  %6732 = vst [vmem:[%s7863_s4 + $0x1068] sm:$0xff] %v4310_v57 }
 0x3c2   : > { %v4754_v58 = vpop.f32.mrf.mxu0  ;;  %v4314_v16 = vpop.f32.mrf.mxu1  ;;  %6902 = vmatmul.mubr.msk.f32.gmra.mxu1 %vm197_vm0, %v9180_v5 }
 0x3c3   : > { %6826 = vst [vmem:[%s7863_s4 + $0x1258] sm:$0xff] %v4754_v58  ;;  %6733 = vst [vmem:[%s7863_s4 + $0x1070] sm:$0xff] %v4314_v16  ;;  %5314 = vmatprep.mubr.f32.mxu1 %v7185_v4 }
 0x3c4   : > { %v4758_v7 = vpop.f32.mrf.mxu0  ;;  %6997 = vmatmul.mubr.msk.f32.gmra.mxu0 %vm197_vm0, %v9165_v22  ;;  %v4316_v60 = vpop.f32.mrf.mxu1 }
 0x3c5   : > { %6827 = vst [vmem:[%s7863_s4 + $0x1260] sm:$0xff] %v4758_v7  ;;  %5758 = vmatprep.mubr.f32.mxu0 %v7185_v4  ;;  %6734 = vst [vmem:[%s7863_s4 + $0x1078] sm:$0xff] %v4316_v60 }
 0x3c6   : > { %v4760_v29 = vpop.f32.mrf.mxu0  ;;  %v4320_v17 = vpop.f32.mrf.mxu1  ;;  %6903 = vmatmul.mubr.msk.f32.gmra.mxu1 %vm197_vm0, %v9195_v39 }
 0x3c7   : > { %6828 = vst [vmem:[%s7863_s4 + $0x1268] sm:$0xff] %v4760_v29  ;;  %6735 = vst [vmem:[%s7863_s4 + $0x1080] sm:$0xff] %v4320_v17  ;;  %5320 = vmatprep.mubr.f32.mxu1 %v7185_v4 }
 0x3c8   : > { %v4764_v9 = vpop.f32.mrf.mxu0  ;;  %6998 = vmatmul.mubr.msk.f32.gmra.mxu0 %vm197_vm0, %v9180_v5  ;;  %v4322_v22 = vpop.f32.mrf.mxu1 }
 0x3c9   : > { %6829 = vst [vmem:[%s7863_s4 + $0x1270] sm:$0xff] %v4764_v9  ;;  %5764 = vmatprep.mubr.f32.mxu0 %v7185_v4  ;;  %6736 = vst [vmem:[%s7863_s4 + $0x1088] sm:$0xff] %v4322_v22 }
 0x3ca   : > { %v4766_v37 = vpop.f32.mrf.mxu0  ;;  %v4326_v36 = vpop.f32.mrf.mxu1  ;;  %6904 = vmatmul.mubr.msk.f32.gmra.mxu1 %vm197_vm0, %v9210_v43 }
 0x3cb   : > { %6830 = vst [vmem:[%s7863_s4 + $0x1278] sm:$0xff] %v4766_v37  ;;  %6737 = vst [vmem:[%s7863_s4 + $0x1090] sm:$0xff] %v4326_v36  ;;  %5326 = vmatprep.mubr.f32.mxu1 %v7185_v4 }
 0x3cc   : > { %v4770_v21 = vpop.f32.mrf.mxu0  ;;  %6999 = vmatmul.mubr.msk.f32.gmra.mxu0 %vm197_vm0, %v9195_v39  ;;  %v4328_v5 = vpop.f32.mrf.mxu1 }
 0x3cd   : > { %6831 = vst [vmem:[%s7863_s4 + $0x1280] sm:$0xff] %v4770_v21  ;;  %5770 = vmatprep.mubr.f32.mxu0 %v7185_v4  ;;  %6738 = vst [vmem:[%s7863_s4 + $0x1098] sm:$0xff] %v4328_v5 }
 0x3ce   : > { %v4772_v1 = vpop.f32.mrf.mxu0  ;;  %v4332_v52 = vpop.f32.mrf.mxu1  ;;  %6905 = vmatmul.mubr.msk.f32.gmra.mxu1 %vm197_vm0, %v9225_v61 }
 0x3cf   : > { %6832 = vst [vmem:[%s7863_s4 + $0x1288] sm:$0xff] %v4772_v1  ;;  %6739 = vst [vmem:[%s7863_s4 + $0x10a0] sm:$0xff] %v4332_v52  ;;  %5332 = vmatprep.mubr.f32.mxu1 %v7185_v4 }
 0x3d0   : > { %v4776_v6 = vpop.f32.mrf.mxu0  ;;  %7000 = vmatmul.mubr.msk.f32.gmra.mxu0 %vm197_vm0, %v9210_v43  ;;  %v4334_v39 = vpop.f32.mrf.mxu1 }
 0x3d1   : > { %6833 = vst [vmem:[%s7863_s4 + $0x1290] sm:$0xff] %v4776_v6  ;;  %5776 = vmatprep.mubr.f32.mxu0 %v7185_v4  ;;  %6740 = vst [vmem:[%s7863_s4 + $0x10a8] sm:$0xff] %v4334_v39 }
 0x3d2   : > { %v4778_v38 = vpop.f32.mrf.mxu0  ;;  %v4338_v15 = vpop.f32.mrf.mxu1  ;;  %6906 = vmatmul.mubr.msk.f32.gmra.mxu1 %vm197_vm0, %v9240_v46 }
 0x3d3   : > { %6834 = vst [vmem:[%s7863_s4 + $0x1298] sm:$0xff] %v4778_v38  ;;  %6741 = vst [vmem:[%s7863_s4 + $0x10b0] sm:$0xff] %v4338_v15  ;;  %5338 = vmatprep.mubr.f32.mxu1 %v7185_v4 }
 0x3d4   : > { %v4782_v48 = vpop.f32.mrf.mxu0  ;;  %7001 = vmatmul.mubr.msk.f32.gmra.mxu0 %vm197_vm0, %v9225_v61  ;;  %v4340_v43 = vpop.f32.mrf.mxu1 }
 0x3d5   : > { %6835 = vst [vmem:[%s7863_s4 + $0x12a0] sm:$0xff] %v4782_v48  ;;  %5782 = vmatprep.mubr.f32.mxu0 %v7185_v4  ;;  %6742 = vst [vmem:[%s7863_s4 + $0x10b8] sm:$0xff] %v4340_v43 }
 0x3d6   : > { %v4784_v49 = vpop.f32.mrf.mxu0  ;;  %v4344_v55 = vpop.f32.mrf.mxu1  ;;  %6907 = vmatmul.mubr.msk.f32.gmra.mxu1 %vm197_vm0, %v9255_v28 }
 0x3d7   : > { %6836 = vst [vmem:[%s7863_s4 + $0x12a8] sm:$0xff] %v4784_v49  ;;  %6743 = vst [vmem:[%s7863_s4 + $0x10c0] sm:$0xff] %v4344_v55  ;;  %5344 = vmatprep.mubr.f32.mxu1 %v7185_v4 }
 0x3d8   : > { %v4788_v51 = vpop.f32.mrf.mxu0  ;;  %7002 = vmatmul.mubr.msk.f32.gmra.mxu0 %vm197_vm0, %v9240_v46  ;;  %v4346_v61 = vpop.f32.mrf.mxu1 }
 0x3d9   : > { %6837 = vst [vmem:[%s7863_s4 + $0x12b0] sm:$0xff] %v4788_v51  ;;  %5788 = vmatprep.mubr.f32.mxu0 %v7185_v4  ;;  %6744 = vst [vmem:[%s7863_s4 + $0x10c8] sm:$0xff] %v4346_v61 }
 0x3da   : > { %v4790_v24 = vpop.f32.mrf.mxu0  ;;  %v4350_v47 = vpop.f32.mrf.mxu1  ;;  %6908 = vmatmul.mubr.msk.f32.gmra.mxu1 %vm197_vm0, %v9270_v11 }
 0x3db   : > { %6838 = vst [vmem:[%s7863_s4 + $0x12b8] sm:$0xff] %v4790_v24  ;;  %6745 = vst [vmem:[%s7863_s4 + $0x10d0] sm:$0xff] %v4350_v47  ;;  %5350 = vmatprep.mubr.f32.mxu1 %v7185_v4 }
 0x3dc   : > { %v4794_v3 = vpop.f32.mrf.mxu0  ;;  %7003 = vmatmul.mubr.msk.f32.gmra.mxu0 %vm197_vm0, %v9255_v28  ;;  %v4352_v46 = vpop.f32.mrf.mxu1 }
 0x3dd   : > { %6839 = vst [vmem:[%s7863_s4 + $0x12c0] sm:$0xff] %v4794_v3  ;;  %5794 = vmatprep.mubr.f32.mxu0 %v7185_v4  ;;  %6746 = vst [vmem:[%s7863_s4 + $0x10d8] sm:$0xff] %v4352_v46 }
 0x3de   : > { %v4796_v14 = vpop.f32.mrf.mxu0  ;;  %v4356_v10 = vpop.f32.mrf.mxu1  ;;  %6909 = vmatmul.mubr.msk.f32.gmra.mxu1 %vm197_vm0, %v9285_v13 }
 0x3df   : > { %6840 = vst [vmem:[%s7863_s4 + $0x12c8] sm:$0xff] %v4796_v14  ;;  %6747 = vst [vmem:[%s7863_s4 + $0x10e0] sm:$0xff] %v4356_v10  ;;  %5356 = vmatprep.mubr.f32.mxu1 %v7185_v4 }
 0x3e0   : > { %v4800_v59 = vpop.f32.mrf.mxu0  ;;  %7004 = vmatmul.mubr.msk.f32.gmra.mxu0 %vm197_vm0, %v9270_v11  ;;  %v4358_v28 = vpop.f32.mrf.mxu1 }
 0x3e1   : > { %6841 = vst [vmem:[%s7863_s4 + $0x12d0] sm:$0xff] %v4800_v59  ;;  %5800 = vmatprep.mubr.f32.mxu0 %v7185_v4  ;;  %6748 = vst [vmem:[%s7863_s4 + $0x10e8] sm:$0xff] %v4358_v28 }
 0x3e2   : > { %v4802_v8 = vpop.f32.mrf.mxu0  ;;  %v4362_v53 = vpop.f32.mrf.mxu1  ;;  %6910 = vmatmul.mubr.msk.f32.gmra.mxu1 %vm197_vm0, %v9300_v34 }
 0x3e3   : > { %6842 = vst [vmem:[%s7863_s4 + $0x12d8] sm:$0xff] %v4802_v8  ;;  %6749 = vst [vmem:[%s7863_s4 + $0x10f0] sm:$0xff] %v4362_v53 }
 0x3e4   : > { %v4806_v12 = vpop.f32.mrf.mxu0  ;;  %7005 = vmatmul.mubr.msk.f32.gmra.mxu0 %vm197_vm0, %v9285_v13  ;;  %v4364_v11 = vpop.f32.mrf.mxu1 }
 0x3e5   : > { %6843 = vst [vmem:[%s7863_s4 + $0x12e0] sm:$0xff] %v4806_v12  ;;  %5806 = vmatprep.mubr.f32.mxu0 %v7185_v4  ;;  %6750 = vst [vmem:[%s7863_s4 + $0x10f8] sm:$0xff] %v4364_v11 }
 0x3e6   : > { %v4808_v62 = vpop.f32.mrf.mxu0  ;;  %v4368_v40 = vpop.f32.mrf.mxu1 }
 0x3e7   : > { %6844 = vst [vmem:[%s7863_s4 + $0x12e8] sm:$0xff] %v4808_v62  ;;  %6751 = vst [vmem:[%s7863_s4 + $0x1100] sm:$0xff] %v4368_v40 }
 0x3e8   : > { %v4812_v23 = vpop.f32.mrf.mxu0  ;;  %7006 = vmatmul.mubr.msk.f32.gmra.mxu0 %vm197_vm0, %v9300_v34  ;;  %v4370_v13 = vpop.f32.mrf.mxu1 }
 0x3e9   : > { %6845 = vst [vmem:[%s7863_s4 + $0x12f0] sm:$0xff] %v4812_v23  ;;  %6752 = vst [vmem:[%s7863_s4 + $0x1108] sm:$0xff] %v4370_v13 }
 0x3ea   : > { %v4814_v45 = vpop.f32.mrf.mxu0  ;;  %v4374_v4 = vpop.f32.mrf.mxu1 }
 0x3eb   : > { %6846 = vst [vmem:[%s7863_s4 + $0x12f8] sm:$0xff] %v4814_v45  ;;  %6753 = vst [vmem:[%s7863_s4 + $0x1110] sm:$0xff] %v4374_v4 }
 0x3ec   : > { %v4818_v0 = vpop.f32.mrf.mxu0  ;;  %v4376_v30 = vpop.f32.mrf.mxu1 }
 0x3ed   : > { %6847 = vst [vmem:[%s7863_s4 + $0x1300] sm:$0xff] %v4818_v0  ;;  %6754 = vst [vmem:[%s7863_s4 + $0x1118] sm:$0xff] %v4376_v30 }
 0x3ee   : > { %v4820_v63 = vpop.f32.mrf.mxu0  ;;  %v4380_v56 = vpop.f32.mrf.mxu1 }
 0x3ef   : > { %6848 = vst [vmem:[%s7863_s4 + $0x1308] sm:$0xff] %v4820_v63  ;;  %6755 = vst [vmem:[%s7863_s4 + $0x1120] sm:$0xff] %v4380_v56 }
 0x3f0   : > { %v4824_v34 = vpop.f32.mrf.mxu0  ;;  %v4382_v42 = vpop.f32.mrf.mxu1 }
 0x3f1   : > { %6849 = vst [vmem:[%s7863_s4 + $0x1310] sm:$0xff] %v4824_v34  ;;  %6756 = vst [vmem:[%s7863_s4 + $0x1128] sm:$0xff] %v4382_v42 }
 0x3f2   : > { %v4826_v32 = vpop.f32.mrf.mxu0  ;;  %v4386_v50 = vpop.f32.mrf.mxu1 }
 0x3f3   : > { %6850 = vst [vmem:[%s7863_s4 + $0x1318] sm:$0xff] %v4826_v32  ;;  %6757 = vst [vmem:[%s7863_s4 + $0x1130] sm:$0xff] %v4386_v50 }
 0x3f4   : > { %v4830_v18 = vpop.f32.mrf.mxu0  ;;  %v4388_v27 = vpop.f32.mrf.mxu1 }
 0x3f5   : > { %6851 = vst [vmem:[%s7863_s4 + $0x1320] sm:$0xff] %v4830_v18  ;;  %6758 = vst [vmem:[%s7863_s4 + $0x1138] sm:$0xff] %v4388_v27 }
 0x3f6   : > { %v4832_v19 = vpop.f32.mrf.mxu0  ;;  %v4392_v25 = vpop.f32.mrf.mxu1 }
 0x3f7   : > { %6852 = vst [vmem:[%s7863_s4 + $0x1328] sm:$0xff] %v4832_v19  ;;  %6759 = vst [vmem:[%s7863_s4 + $0x1140] sm:$0xff] %v4392_v25 }
 0x3f8   : > { %v4836_v41 = vpop.f32.mrf.mxu0  ;;  %v4394_v26 = vpop.f32.mrf.mxu1 }
 0x3f9   : > { %6853 = vst [vmem:[%s7863_s4 + $0x1330] sm:$0xff] %v4836_v41  ;;  %6760 = vst [vmem:[%s7863_s4 + $0x1148] sm:$0xff] %v4394_v26 }
 0x3fa   : > { %v4838_v54 = vpop.f32.mrf.mxu0  ;;  %v4398_v33 = vpop.f32.mrf.mxu1 }
 0x3fb   : > { %6854 = vst [vmem:[%s7863_s4 + $0x1338] sm:$0xff] %v4838_v54  ;;  %6761 = vst [vmem:[%s7863_s4 + $0x1150] sm:$0xff] %v4398_v33 }
 0x3fc   : > { %v4842_v35 = vpop.f32.mrf.mxu0  ;;  %v4400_v20 = vpop.f32.mrf.mxu1 }
 0x3fd   : > { %6855 = vst [vmem:[%s7863_s4 + $0x1340] sm:$0xff] %v4842_v35  ;;  %6762 = vst [vmem:[%s7863_s4 + $0x1158] sm:$0xff] %v4400_v20 }
 0x3fe   : > { %v4844_v2 = vpop.f32.mrf.mxu0  ;;  %v4404_v31 = vpop.f32.mrf.mxu1 }
 0x3ff   : > { %6856 = vst [vmem:[%s7863_s4 + $0x1348] sm:$0xff] %v4844_v2  ;;  %6763 = vst [vmem:[%s7863_s4 + $0x1160] sm:$0xff] %v4404_v31 }
 0x400   : > { %v4848_v44 = vpop.f32.mrf.mxu0  ;;  %v4406_v57 = vpop.f32.mrf.mxu1 }
 0x401   : > { %6857 = vst [vmem:[%s7863_s4 + $0x1350] sm:$0xff] %v4848_v44  ;;  %6764 = vst [vmem:[%s7863_s4 + $0x1168] sm:$0xff] %v4406_v57 }
 0x402   : > { %v4850_v58 = vpop.f32.mrf.mxu0  ;;  %v4410_v16 = vpop.f32.mrf.mxu1 }
 0x403   : > { %6858 = vst [vmem:[%s7863_s4 + $0x1358] sm:$0xff] %v4850_v58  ;;  %6765 = vst [vmem:[%s7863_s4 + $0x1170] sm:$0xff] %v4410_v16 }
 0x404   : > { %v4854_v7 = vpop.f32.mrf.mxu0  ;;  %v4412_v60 = vpop.f32.mrf.mxu1 }
 0x405   : > { %6859 = vst [vmem:[%s7863_s4 + $0x1360] sm:$0xff] %v4854_v7  ;;  %6766 = vst [vmem:[%s7863_s4 + $0x1178] sm:$0xff] %v4412_v60 }
 0x406   : > { %v4856_v29 = vpop.f32.mrf.mxu0  ;;  %v4416_v17 = vpop.f32.mrf.mxu1 }
 0x407   : > { %6860 = vst [vmem:[%s7863_s4 + $0x1368] sm:$0xff] %v4856_v29  ;;  %6767 = vst [vmem:[%s7863_s4 + $0x1180] sm:$0xff] %v4416_v17 }
 0x408   : > { %v4860_v9 = vpop.f32.mrf.mxu0  ;;  %v4418_v22 = vpop.f32.mrf.mxu1 }
 0x409   : > { %6861 = vst [vmem:[%s7863_s4 + $0x1370] sm:$0xff] %v4860_v9  ;;  %6768 = vst [vmem:[%s7863_s4 + $0x1188] sm:$0xff] %v4418_v22 }
 0x40a   : > { %v4862_v37 = vpop.f32.mrf.mxu0  ;;  %v4422_v36 = vpop.f32.mrf.mxu1 }
 0x40b   : > { %6862 = vst [vmem:[%s7863_s4 + $0x1378] sm:$0xff] %v4862_v37  ;;  %6769 = vst [vmem:[%s7863_s4 + $0x1190] sm:$0xff] %v4422_v36 }
 0x40c   : > { %v4866_v21 = vpop.f32.mrf.mxu0  ;;  %v4424_v5 = vpop.f32.mrf.mxu1 }
 0x40d   : > { %6863 = vst [vmem:[%s7863_s4 + $0x1380] sm:$0xff] %v4866_v21  ;;  %6770 = vst [vmem:[%s7863_s4 + $0x1198] sm:$0xff] %v4424_v5 }
 0x40e   : > { %v4868_v1 = vpop.f32.mrf.mxu0  ;;  %v4428_v52 = vpop.f32.mrf.mxu1 }
 0x40f   : > { %6864 = vst [vmem:[%s7863_s4 + $0x1388] sm:$0xff] %v4868_v1  ;;  %6771 = vst [vmem:[%s7863_s4 + $0x11a0] sm:$0xff] %v4428_v52 }
 0x410   : > { %v4872_v6 = vpop.f32.mrf.mxu0  ;;  %v4430_v39 = vpop.f32.mrf.mxu1 }
 0x411   : > { %6865 = vst [vmem:[%s7863_s4 + $0x1390] sm:$0xff] %v4872_v6  ;;  %6772 = vst [vmem:[%s7863_s4 + $0x11a8] sm:$0xff] %v4430_v39 }
 0x412   : > { %v4874_v38 = vpop.f32.mrf.mxu0  ;;  %v4434_v15 = vpop.f32.mrf.mxu1 }
 0x413   : > { %6866 = vst [vmem:[%s7863_s4 + $0x1398] sm:$0xff] %v4874_v38  ;;  %6773 = vst [vmem:[%s7863_s4 + $0x11b0] sm:$0xff] %v4434_v15 }
 0x414   : > { %v4878_v48 = vpop.f32.mrf.mxu0  ;;  %v4436_v43 = vpop.f32.mrf.mxu1 }
 0x415   : > { %6867 = vst [vmem:[%s7863_s4 + $0x13a0] sm:$0xff] %v4878_v48  ;;  %6774 = vst [vmem:[%s7863_s4 + $0x11b8] sm:$0xff] %v4436_v43 }
 0x416   : > { %v4880_v49 = vpop.f32.mrf.mxu0  ;;  %v4440_v55 = vpop.f32.mrf.mxu1 }
 0x417   : > { %6868 = vst [vmem:[%s7863_s4 + $0x13a8] sm:$0xff] %v4880_v49  ;;  %6775 = vst [vmem:[%s7863_s4 + $0x11c0] sm:$0xff] %v4440_v55 }
 0x418   : > { %v4884_v51 = vpop.f32.mrf.mxu0  ;;  %v4442_v61 = vpop.f32.mrf.mxu1 }
 0x419   : > { %6869 = vst [vmem:[%s7863_s4 + $0x13b0] sm:$0xff] %v4884_v51  ;;  %6776 = vst [vmem:[%s7863_s4 + $0x11c8] sm:$0xff] %v4442_v61 }
 0x41a   : > { %v4886_v24 = vpop.f32.mrf.mxu0  ;;  %v4446_v47 = vpop.f32.mrf.mxu1 }
 0x41b   : > { %6870 = vst [vmem:[%s7863_s4 + $0x13b8] sm:$0xff] %v4886_v24  ;;  %6777 = vst [vmem:[%s7863_s4 + $0x11d0] sm:$0xff] %v4446_v47 }
 0x41c   : > { %v4890_v3 = vpop.f32.mrf.mxu0  ;;  %v4448_v46 = vpop.f32.mrf.mxu1 }
 0x41d   : > { %6871 = vst [vmem:[%s7863_s4 + $0x13c0] sm:$0xff] %v4890_v3  ;;  %6778 = vst [vmem:[%s7863_s4 + $0x11d8] sm:$0xff] %v4448_v46 }
 0x41e   : > { %v4892_v14 = vpop.f32.mrf.mxu0  ;;  %v4452_v10 = vpop.f32.mrf.mxu1 }
 0x41f   : > { %6872 = vst [vmem:[%s7863_s4 + $0x13c8] sm:$0xff] %v4892_v14  ;;  %6779 = vst [vmem:[%s7863_s4 + $0x11e0] sm:$0xff] %v4452_v10 }
 0x420   : > { %v4896_v59 = vpop.f32.mrf.mxu0  ;;  %v4454_v28 = vpop.f32.mrf.mxu1 }
 0x421   : > { %6873 = vst [vmem:[%s7863_s4 + $0x13d0] sm:$0xff] %v4896_v59  ;;  %6780 = vst [vmem:[%s7863_s4 + $0x11e8] sm:$0xff] %v4454_v28 }
 0x422   : > { %v4898_v8 = vpop.f32.mrf.mxu0  ;;  %v4458_v53 = vpop.f32.mrf.mxu1 }
 0x423   : > { %6874 = vst [vmem:[%s7863_s4 + $0x13d8] sm:$0xff] %v4898_v8  ;;  %6781 = vst [vmem:[%s7863_s4 + $0x11f0] sm:$0xff] %v4458_v53 }
 0x424   : > { %v4902_v12 = vpop.f32.mrf.mxu0  ;;  %v4460_v11 = vpop.f32.mrf.mxu1 }
 0x425   : > { %6875 = vst [vmem:[%s7863_s4 + $0x13e0] sm:$0xff] %v4902_v12  ;;  %6782 = vst [vmem:[%s7863_s4 + $0x11f8] sm:$0xff] %v4460_v11 }
 0x426   : > { %v4904_v62 = vpop.f32.mrf.mxu0  ;;  %v5172_v40 = vpop.f32.mrf.mxu1 }
 0x427   : > { %6876 = vst [vmem:[%s7863_s4 + $0x13e8] sm:$0xff] %v4904_v62  ;;  %6911 = vst [vmem:[%s7863_s4 + $0x1400] sm:$0xff] %v5172_v40 }
 0x428   : > { %v4908_v23 = vpop.f32.mrf.mxu0  ;;  %v5174_v13 = vpop.f32.mrf.mxu1 }
 0x429   : > { %6877 = vst [vmem:[%s7863_s4 + $0x13f0] sm:$0xff] %v4908_v23  ;;  %6912 = vst [vmem:[%s7863_s4 + $0x1408] sm:$0xff] %v5174_v13 }
 0x42a   : > { %v4910_v45 = vpop.f32.mrf.mxu0  ;;  %v5178_v4 = vpop.f32.mrf.mxu1 }
 0x42b   : > { %6878 = vst [vmem:[%s7863_s4 + $0x13f8] sm:$0xff] %v4910_v45  ;;  %6913 = vst [vmem:[%s7863_s4 + $0x1410] sm:$0xff] %v5178_v4 }
 0x42c   : > { %v5622_v0 = vpop.f32.mrf.mxu0  ;;  %v5180_v30 = vpop.f32.mrf.mxu1 }
 0x42d   : > { %7007 = vst [vmem:[%s7863_s4 + $0x1600] sm:$0xff] %v5622_v0  ;;  %6914 = vst [vmem:[%s7863_s4 + $0x1418] sm:$0xff] %v5180_v30 }
 0x42e   : > { %v5624_v63 = vpop.f32.mrf.mxu0  ;;  %v5184_v56 = vpop.f32.mrf.mxu1 }
 0x42f   : > { %7008 = vst [vmem:[%s7863_s4 + $0x1608] sm:$0xff] %v5624_v63  ;;  %6915 = vst [vmem:[%s7863_s4 + $0x1420] sm:$0xff] %v5184_v56 }
 0x430   : > { %v5628_v34 = vpop.f32.mrf.mxu0  ;;  %v5186_v42 = vpop.f32.mrf.mxu1 }
 0x431   : > { %7009 = vst [vmem:[%s7863_s4 + $0x1610] sm:$0xff] %v5628_v34  ;;  %6916 = vst [vmem:[%s7863_s4 + $0x1428] sm:$0xff] %v5186_v42 }
 0x432   : > { %v5630_v32 = vpop.f32.mrf.mxu0  ;;  %v5190_v50 = vpop.f32.mrf.mxu1 }
 0x433   : > { %7010 = vst [vmem:[%s7863_s4 + $0x1618] sm:$0xff] %v5630_v32  ;;  %6917 = vst [vmem:[%s7863_s4 + $0x1430] sm:$0xff] %v5190_v50 }
 0x434   : > { %v5634_v18 = vpop.f32.mrf.mxu0  ;;  %v5192_v27 = vpop.f32.mrf.mxu1 }
 0x435   : > { %7011 = vst [vmem:[%s7863_s4 + $0x1620] sm:$0xff] %v5634_v18  ;;  %6918 = vst [vmem:[%s7863_s4 + $0x1438] sm:$0xff] %v5192_v27 }
 0x436   : > { %v5636_v19 = vpop.f32.mrf.mxu0  ;;  %v5196_v25 = vpop.f32.mrf.mxu1 }
 0x437   : > { %7012 = vst [vmem:[%s7863_s4 + $0x1628] sm:$0xff] %v5636_v19  ;;  %6919 = vst [vmem:[%s7863_s4 + $0x1440] sm:$0xff] %v5196_v25 }
 0x438   : > { %v5640_v41 = vpop.f32.mrf.mxu0  ;;  %v5198_v26 = vpop.f32.mrf.mxu1 }
 0x439   : > { %7013 = vst [vmem:[%s7863_s4 + $0x1630] sm:$0xff] %v5640_v41  ;;  %6920 = vst [vmem:[%s7863_s4 + $0x1448] sm:$0xff] %v5198_v26 }
 0x43a   : > { %v5642_v54 = vpop.f32.mrf.mxu0  ;;  %v5202_v33 = vpop.f32.mrf.mxu1 }
 0x43b   : > { %7014 = vst [vmem:[%s7863_s4 + $0x1638] sm:$0xff] %v5642_v54  ;;  %6921 = vst [vmem:[%s7863_s4 + $0x1450] sm:$0xff] %v5202_v33 }
 0x43c   : > { %v5646_v35 = vpop.f32.mrf.mxu0  ;;  %v5204_v20 = vpop.f32.mrf.mxu1 }
 0x43d   : > { %7015 = vst [vmem:[%s7863_s4 + $0x1640] sm:$0xff] %v5646_v35  ;;  %6922 = vst [vmem:[%s7863_s4 + $0x1458] sm:$0xff] %v5204_v20 }
 0x43e   : > { %v5648_v2 = vpop.f32.mrf.mxu0  ;;  %v5208_v31 = vpop.f32.mrf.mxu1 }
 0x43f   : > { %7016 = vst [vmem:[%s7863_s4 + $0x1648] sm:$0xff] %v5648_v2  ;;  %6923 = vst [vmem:[%s7863_s4 + $0x1460] sm:$0xff] %v5208_v31 }
 0x440   : > { %v5652_v44 = vpop.f32.mrf.mxu0  ;;  %v5210_v57 = vpop.f32.mrf.mxu1 }
 0x441   : > { %7017 = vst [vmem:[%s7863_s4 + $0x1650] sm:$0xff] %v5652_v44  ;;  %6924 = vst [vmem:[%s7863_s4 + $0x1468] sm:$0xff] %v5210_v57 }
 0x442   : > { %v5654_v58 = vpop.f32.mrf.mxu0  ;;  %v5214_v16 = vpop.f32.mrf.mxu1 }
 0x443   : > { %7018 = vst [vmem:[%s7863_s4 + $0x1658] sm:$0xff] %v5654_v58  ;;  %6925 = vst [vmem:[%s7863_s4 + $0x1470] sm:$0xff] %v5214_v16 }
 0x444   : > { %v5658_v7 = vpop.f32.mrf.mxu0  ;;  %v5216_v60 = vpop.f32.mrf.mxu1 }
 0x445   : > { %7019 = vst [vmem:[%s7863_s4 + $0x1660] sm:$0xff] %v5658_v7  ;;  %6926 = vst [vmem:[%s7863_s4 + $0x1478] sm:$0xff] %v5216_v60 }
 0x446   : > { %v5660_v29 = vpop.f32.mrf.mxu0  ;;  %v5220_v17 = vpop.f32.mrf.mxu1 }
 0x447   : > { %7020 = vst [vmem:[%s7863_s4 + $0x1668] sm:$0xff] %v5660_v29  ;;  %6927 = vst [vmem:[%s7863_s4 + $0x1480] sm:$0xff] %v5220_v17 }
 0x448   : > { %v5664_v9 = vpop.f32.mrf.mxu0  ;;  %v5222_v22 = vpop.f32.mrf.mxu1 }
 0x449   : > { %7021 = vst [vmem:[%s7863_s4 + $0x1670] sm:$0xff] %v5664_v9  ;;  %6928 = vst [vmem:[%s7863_s4 + $0x1488] sm:$0xff] %v5222_v22 }
 0x44a   : > { %v5666_v37 = vpop.f32.mrf.mxu0  ;;  %v5226_v36 = vpop.f32.mrf.mxu1 }
 0x44b   : > { %7022 = vst [vmem:[%s7863_s4 + $0x1678] sm:$0xff] %v5666_v37  ;;  %6929 = vst [vmem:[%s7863_s4 + $0x1490] sm:$0xff] %v5226_v36 }
 0x44c   : > { %v5670_v21 = vpop.f32.mrf.mxu0  ;;  %v5228_v5 = vpop.f32.mrf.mxu1 }
 0x44d   : > { %7023 = vst [vmem:[%s7863_s4 + $0x1680] sm:$0xff] %v5670_v21  ;;  %6930 = vst [vmem:[%s7863_s4 + $0x1498] sm:$0xff] %v5228_v5 }
 0x44e   : > { %v5672_v1 = vpop.f32.mrf.mxu0  ;;  %v5232_v52 = vpop.f32.mrf.mxu1 }
 0x44f   : > { %7024 = vst [vmem:[%s7863_s4 + $0x1688] sm:$0xff] %v5672_v1  ;;  %6931 = vst [vmem:[%s7863_s4 + $0x14a0] sm:$0xff] %v5232_v52 }
 0x450   : > { %v5676_v6 = vpop.f32.mrf.mxu0  ;;  %v5234_v39 = vpop.f32.mrf.mxu1 }
 0x451   : > { %7025 = vst [vmem:[%s7863_s4 + $0x1690] sm:$0xff] %v5676_v6  ;;  %6932 = vst [vmem:[%s7863_s4 + $0x14a8] sm:$0xff] %v5234_v39 }
 0x452   : > { %v5678_v38 = vpop.f32.mrf.mxu0  ;;  %v5238_v15 = vpop.f32.mrf.mxu1 }
 0x453   : > { %7026 = vst [vmem:[%s7863_s4 + $0x1698] sm:$0xff] %v5678_v38  ;;  %6933 = vst [vmem:[%s7863_s4 + $0x14b0] sm:$0xff] %v5238_v15 }
 0x454   : > { %v5682_v48 = vpop.f32.mrf.mxu0  ;;  %v5240_v43 = vpop.f32.mrf.mxu1 }
 0x455   : > { %7027 = vst [vmem:[%s7863_s4 + $0x16a0] sm:$0xff] %v5682_v48  ;;  %6934 = vst [vmem:[%s7863_s4 + $0x14b8] sm:$0xff] %v5240_v43 }
 0x456   : > { %v5684_v49 = vpop.f32.mrf.mxu0  ;;  %v5244_v55 = vpop.f32.mrf.mxu1 }
 0x457   : > { %7028 = vst [vmem:[%s7863_s4 + $0x16a8] sm:$0xff] %v5684_v49  ;;  %6935 = vst [vmem:[%s7863_s4 + $0x14c0] sm:$0xff] %v5244_v55 }
 0x458   : > { %v5688_v51 = vpop.f32.mrf.mxu0  ;;  %v5246_v61 = vpop.f32.mrf.mxu1 }
 0x459   : > { %7029 = vst [vmem:[%s7863_s4 + $0x16b0] sm:$0xff] %v5688_v51  ;;  %6936 = vst [vmem:[%s7863_s4 + $0x14c8] sm:$0xff] %v5246_v61 }
 0x45a   : > { %v5690_v24 = vpop.f32.mrf.mxu0  ;;  %v5250_v47 = vpop.f32.mrf.mxu1 }
 0x45b   : > { %7030 = vst [vmem:[%s7863_s4 + $0x16b8] sm:$0xff] %v5690_v24  ;;  %6937 = vst [vmem:[%s7863_s4 + $0x14d0] sm:$0xff] %v5250_v47 }
 0x45c   : > { %v5694_v3 = vpop.f32.mrf.mxu0  ;;  %v5252_v46 = vpop.f32.mrf.mxu1 }
 0x45d   : > { %7031 = vst [vmem:[%s7863_s4 + $0x16c0] sm:$0xff] %v5694_v3  ;;  %6938 = vst [vmem:[%s7863_s4 + $0x14d8] sm:$0xff] %v5252_v46 }
 0x45e   : > { %v5696_v14 = vpop.f32.mrf.mxu0  ;;  %v5256_v10 = vpop.f32.mrf.mxu1 }
 0x45f   : > { %7032 = vst [vmem:[%s7863_s4 + $0x16c8] sm:$0xff] %v5696_v14  ;;  %6939 = vst [vmem:[%s7863_s4 + $0x14e0] sm:$0xff] %v5256_v10 }
 0x460   : > { %v5700_v59 = vpop.f32.mrf.mxu0  ;;  %v5258_v28 = vpop.f32.mrf.mxu1 }
 0x461   : > { %7033 = vst [vmem:[%s7863_s4 + $0x16d0] sm:$0xff] %v5700_v59  ;;  %6940 = vst [vmem:[%s7863_s4 + $0x14e8] sm:$0xff] %v5258_v28 }
 0x462   : > { %v5702_v8 = vpop.f32.mrf.mxu0  ;;  %v5262_v53 = vpop.f32.mrf.mxu1 }
 0x463   : > { %7034 = vst [vmem:[%s7863_s4 + $0x16d8] sm:$0xff] %v5702_v8  ;;  %6941 = vst [vmem:[%s7863_s4 + $0x14f0] sm:$0xff] %v5262_v53 }
 0x464   : > { %v5706_v12 = vpop.f32.mrf.mxu0  ;;  %v5264_v11 = vpop.f32.mrf.mxu1 }
 0x465   : > { %7035 = vst [vmem:[%s7863_s4 + $0x16e0] sm:$0xff] %v5706_v12  ;;  %6942 = vst [vmem:[%s7863_s4 + $0x14f8] sm:$0xff] %v5264_v11 }
 0x466   : > { %v5708_v62 = vpop.f32.mrf.mxu0  ;;  %v5268_v40 = vpop.f32.mrf.mxu1 }
 0x467   : > { %7036 = vst [vmem:[%s7863_s4 + $0x16e8] sm:$0xff] %v5708_v62  ;;  %6943 = vst [vmem:[%s7863_s4 + $0x1500] sm:$0xff] %v5268_v40 }
 0x468   : > { %v5712_v23 = vpop.f32.mrf.mxu0  ;;  %v5270_v13 = vpop.f32.mrf.mxu1 }
 0x469   : > { %7037 = vst [vmem:[%s7863_s4 + $0x16f0] sm:$0xff] %v5712_v23  ;;  %6944 = vst [vmem:[%s7863_s4 + $0x1508] sm:$0xff] %v5270_v13 }
 0x46a   : > { %v5714_v45 = vpop.f32.mrf.mxu0  ;;  %v5274_v4 = vpop.f32.mrf.mxu1 }
 0x46b   : > { %7038 = vst [vmem:[%s7863_s4 + $0x16f8] sm:$0xff] %v5714_v45  ;;  %6945 = vst [vmem:[%s7863_s4 + $0x1510] sm:$0xff] %v5274_v4 }
 0x46c   : > { %v5718_v0 = vpop.f32.mrf.mxu0  ;;  %v5276_v30 = vpop.f32.mrf.mxu1 }
 0x46d   : > { %7039 = vst [vmem:[%s7863_s4 + $0x1700] sm:$0xff] %v5718_v0  ;;  %6946 = vst [vmem:[%s7863_s4 + $0x1518] sm:$0xff] %v5276_v30 }
 0x46e   : > { %v5720_v63 = vpop.f32.mrf.mxu0  ;;  %v5280_v56 = vpop.f32.mrf.mxu1 }
 0x46f   : > { %7040 = vst [vmem:[%s7863_s4 + $0x1708] sm:$0xff] %v5720_v63  ;;  %6947 = vst [vmem:[%s7863_s4 + $0x1520] sm:$0xff] %v5280_v56 }
 0x470   : > { %v5724_v34 = vpop.f32.mrf.mxu0  ;;  %v5282_v42 = vpop.f32.mrf.mxu1 }
 0x471   : > { %7041 = vst [vmem:[%s7863_s4 + $0x1710] sm:$0xff] %v5724_v34  ;;  %6948 = vst [vmem:[%s7863_s4 + $0x1528] sm:$0xff] %v5282_v42 }
 0x472   : > { %v5726_v32 = vpop.f32.mrf.mxu0  ;;  %v5286_v50 = vpop.f32.mrf.mxu1 }
 0x473   : > { %7042 = vst [vmem:[%s7863_s4 + $0x1718] sm:$0xff] %v5726_v32  ;;  %6949 = vst [vmem:[%s7863_s4 + $0x1530] sm:$0xff] %v5286_v50 }
 0x474   : > { %v5730_v18 = vpop.f32.mrf.mxu0  ;;  %v5288_v27 = vpop.f32.mrf.mxu1 }
 0x475   : > { %7043 = vst [vmem:[%s7863_s4 + $0x1720] sm:$0xff] %v5730_v18  ;;  %6950 = vst [vmem:[%s7863_s4 + $0x1538] sm:$0xff] %v5288_v27 }
 0x476   : > { %v5732_v19 = vpop.f32.mrf.mxu0  ;;  %v5292_v25 = vpop.f32.mrf.mxu1 }
 0x477   : > { %7044 = vst [vmem:[%s7863_s4 + $0x1728] sm:$0xff] %v5732_v19  ;;  %6951 = vst [vmem:[%s7863_s4 + $0x1540] sm:$0xff] %v5292_v25 }
 0x478   : > { %v5736_v41 = vpop.f32.mrf.mxu0  ;;  %v5294_v26 = vpop.f32.mrf.mxu1 }
 0x479   : > { %7045 = vst [vmem:[%s7863_s4 + $0x1730] sm:$0xff] %v5736_v41  ;;  %6952 = vst [vmem:[%s7863_s4 + $0x1548] sm:$0xff] %v5294_v26 }
 0x47a   : > { %v5738_v54 = vpop.f32.mrf.mxu0  ;;  %v5298_v33 = vpop.f32.mrf.mxu1 }
 0x47b   : > { %7046 = vst [vmem:[%s7863_s4 + $0x1738] sm:$0xff] %v5738_v54  ;;  %6953 = vst [vmem:[%s7863_s4 + $0x1550] sm:$0xff] %v5298_v33 }
 0x47c   : > { %v5742_v35 = vpop.f32.mrf.mxu0  ;;  %v5300_v20 = vpop.f32.mrf.mxu1 }
 0x47d   : > { %7047 = vst [vmem:[%s7863_s4 + $0x1740] sm:$0xff] %v5742_v35  ;;  %6954 = vst [vmem:[%s7863_s4 + $0x1558] sm:$0xff] %v5300_v20 }
 0x47e   : > { %v5744_v2 = vpop.f32.mrf.mxu0  ;;  %v5304_v31 = vpop.f32.mrf.mxu1 }
 0x47f   : > { %7048 = vst [vmem:[%s7863_s4 + $0x1748] sm:$0xff] %v5744_v2  ;;  %6955 = vst [vmem:[%s7863_s4 + $0x1560] sm:$0xff] %v5304_v31 }
 0x480   : > { %v5748_v44 = vpop.f32.mrf.mxu0  ;;  %v5306_v57 = vpop.f32.mrf.mxu1 }
 0x481   : > { %7049 = vst [vmem:[%s7863_s4 + $0x1750] sm:$0xff] %v5748_v44  ;;  %6956 = vst [vmem:[%s7863_s4 + $0x1568] sm:$0xff] %v5306_v57 }
 0x482   : > { %v5750_v58 = vpop.f32.mrf.mxu0  ;;  %v5310_v16 = vpop.f32.mrf.mxu1 }
 0x483   : > { %7050 = vst [vmem:[%s7863_s4 + $0x1758] sm:$0xff] %v5750_v58  ;;  %6957 = vst [vmem:[%s7863_s4 + $0x1570] sm:$0xff] %v5310_v16 }
 0x484   : > { %v5754_v7 = vpop.f32.mrf.mxu0  ;;  %v5312_v60 = vpop.f32.mrf.mxu1 }
 0x485   : > { %7051 = vst [vmem:[%s7863_s4 + $0x1760] sm:$0xff] %v5754_v7  ;;  %6958 = vst [vmem:[%s7863_s4 + $0x1578] sm:$0xff] %v5312_v60 }
 0x486   : > { %v5756_v29 = vpop.f32.mrf.mxu0  ;;  %v5316_v17 = vpop.f32.mrf.mxu1 }
 0x487   : > { %7052 = vst [vmem:[%s7863_s4 + $0x1768] sm:$0xff] %v5756_v29  ;;  %6959 = vst [vmem:[%s7863_s4 + $0x1580] sm:$0xff] %v5316_v17 }
 0x488   : > { %v5760_v9 = vpop.f32.mrf.mxu0  ;;  %v5318_v22 = vpop.f32.mrf.mxu1 }
 0x489   : > { %7053 = vst [vmem:[%s7863_s4 + $0x1770] sm:$0xff] %v5760_v9  ;;  %6960 = vst [vmem:[%s7863_s4 + $0x1588] sm:$0xff] %v5318_v22 }
 0x48a   : > { %v5762_v37 = vpop.f32.mrf.mxu0  ;;  %v5322_v36 = vpop.f32.mrf.mxu1 }
 0x48b   : > { %7054 = vst [vmem:[%s7863_s4 + $0x1778] sm:$0xff] %v5762_v37  ;;  %6961 = vst [vmem:[%s7863_s4 + $0x1590] sm:$0xff] %v5322_v36 }
 0x48c   : > { %v5766_v21 = vpop.f32.mrf.mxu0  ;;  %v5324_v5 = vpop.f32.mrf.mxu1 }
 0x48d   : > { %7055 = vst [vmem:[%s7863_s4 + $0x1780] sm:$0xff] %v5766_v21  ;;  %6962 = vst [vmem:[%s7863_s4 + $0x1598] sm:$0xff] %v5324_v5 }
 0x48e   : > { %v5768_v1 = vpop.f32.mrf.mxu0  ;;  %v5328_v52 = vpop.f32.mrf.mxu1 }
 0x48f   : > { %7056 = vst [vmem:[%s7863_s4 + $0x1788] sm:$0xff] %v5768_v1  ;;  %6963 = vst [vmem:[%s7863_s4 + $0x15a0] sm:$0xff] %v5328_v52 }
 0x490   : > { %v5772_v6 = vpop.f32.mrf.mxu0  ;;  %v5330_v39 = vpop.f32.mrf.mxu1 }
 0x491   : > { %7057 = vst [vmem:[%s7863_s4 + $0x1790] sm:$0xff] %v5772_v6  ;;  %6964 = vst [vmem:[%s7863_s4 + $0x15a8] sm:$0xff] %v5330_v39 }
 0x492   : > { %v5774_v38 = vpop.f32.mrf.mxu0  ;;  %v5334_v15 = vpop.f32.mrf.mxu1 }
 0x493   : > { %7058 = vst [vmem:[%s7863_s4 + $0x1798] sm:$0xff] %v5774_v38  ;;  %6965 = vst [vmem:[%s7863_s4 + $0x15b0] sm:$0xff] %v5334_v15 }
 0x494   : > { %v5778_v48 = vpop.f32.mrf.mxu0  ;;  %v5336_v43 = vpop.f32.mrf.mxu1 }
 0x495   : > { %7059 = vst [vmem:[%s7863_s4 + $0x17a0] sm:$0xff] %v5778_v48  ;;  %6966 = vst [vmem:[%s7863_s4 + $0x15b8] sm:$0xff] %v5336_v43 }
 0x496   : > { %v5780_v49 = vpop.f32.mrf.mxu0  ;;  %v5340_v55 = vpop.f32.mrf.mxu1 }
 0x497   : > { %7060 = vst [vmem:[%s7863_s4 + $0x17a8] sm:$0xff] %v5780_v49  ;;  %6967 = vst [vmem:[%s7863_s4 + $0x15c0] sm:$0xff] %v5340_v55 }
 0x498   : > { %v5784_v51 = vpop.f32.mrf.mxu0  ;;  %v5342_v61 = vpop.f32.mrf.mxu1 }
 0x499   : > { %7061 = vst [vmem:[%s7863_s4 + $0x17b0] sm:$0xff] %v5784_v51  ;;  %6968 = vst [vmem:[%s7863_s4 + $0x15c8] sm:$0xff] %v5342_v61 }
 0x49a   : > { %v5786_v24 = vpop.f32.mrf.mxu0  ;;  %v5346_v47 = vpop.f32.mrf.mxu1 }
 0x49b   : > { %7062 = vst [vmem:[%s7863_s4 + $0x17b8] sm:$0xff] %v5786_v24  ;;  %6969 = vst [vmem:[%s7863_s4 + $0x15d0] sm:$0xff] %v5346_v47 }
 0x49c   : > { %v5790_v3 = vpop.f32.mrf.mxu0  ;;  %v5348_v46 = vpop.f32.mrf.mxu1 }
 0x49d   : > { %7063 = vst [vmem:[%s7863_s4 + $0x17c0] sm:$0xff] %v5790_v3  ;;  %6970 = vst [vmem:[%s7863_s4 + $0x15d8] sm:$0xff] %v5348_v46 }
 0x49e   : > { %v5792_v14 = vpop.f32.mrf.mxu0  ;;  %v5352_v10 = vpop.f32.mrf.mxu1 }
 0x49f   : > { %7064 = vst [vmem:[%s7863_s4 + $0x17c8] sm:$0xff] %v5792_v14  ;;  %6971 = vst [vmem:[%s7863_s4 + $0x15e0] sm:$0xff] %v5352_v10 }
 0x4a0   : > { %v5796_v59 = vpop.f32.mrf.mxu0  ;;  %v5354_v28 = vpop.f32.mrf.mxu1 }
 0x4a1   : > { %7065 = vst [vmem:[%s7863_s4 + $0x17d0] sm:$0xff] %v5796_v59  ;;  %6972 = vst [vmem:[%s7863_s4 + $0x15e8] sm:$0xff] %v5354_v28 }
 0x4a2   : > { %v5798_v8 = vpop.f32.mrf.mxu0  ;;  %v5358_v53 = vpop.f32.mrf.mxu1 }
 0x4a3   : > { %7066 = vst [vmem:[%s7863_s4 + $0x17d8] sm:$0xff] %v5798_v8  ;;  %6973 = vst [vmem:[%s7863_s4 + $0x15f0] sm:$0xff] %v5358_v53 }
 0x4a4   : > { %v5802_v12 = vpop.f32.mrf.mxu0  ;;  %v5360_v11 = vpop.f32.mrf.mxu1 }
 0x4a5   : > { %7067 = vst [vmem:[%s7863_s4 + $0x17e0] sm:$0xff] %v5802_v12  ;;  %6974 = vst [vmem:[%s7863_s4 + $0x15f8] sm:$0xff] %v5360_v11 }
 0x4a6   : > { %v5804_v62 = vpop.f32.mrf.mxu0 }
 0x4a7   : > { %7068 = vst [vmem:[%s7863_s4 + $0x17e8] sm:$0xff] %v5804_v62 }
 0x4a8   : > { %v5808_v40 = vpop.f32.mrf.mxu0 }
 0x4a9   : > { %7069 = vst [vmem:[%s7863_s4 + $0x17f0] sm:$0xff] %v5808_v40 }
 0x4aa   : > { %v5810_v23 = vpop.f32.mrf.mxu0 }
 0x4ab   : > { %7070 = vst [vmem:[%s7863_s4 + $0x17f8] sm:$0xff] %v5810_v23 }
 0x4ac   : > { %7136 = shalt.err (!%p7133_p3)
}
 0x4ad   : > { %s7137_s29 = scalar_lea.hbm %s9837_s11, 98304  ;;  %s7141_s26 = scalar_lea.hbm %s9888_s3, 196608 }
 0x4ae   : > { %p7138_p4 = scmp.ne.s32.totalorder %s9837_s11, %s7137_s29  ;;  %p7142_p9 = scmp.lt.s32.totalorder %s9837_s11, %s9888_s3 }
 0x4af   : > { %p7143_p10 = scmp.lt.s32.totalorder %s7141_s26, %s7137_s29 }
 0x4b0   : > { %p7139_p7 = pnand %p7138_p4, %p7247_p5 }
 0x4b1   : > { %p7144_p11 = por %p7143_p10, %p7142_p9 }
 0x4b2   : > { %p7140_p8 = pneg %p7139_p7 }
 0x4b4   : > { %p7145_p12 = pnand %p7144_p11, %p7140_p8 }
 0x4b6   : > { %7148 = shalt.err (!%p7145_p12)
}
 0x4b7   : > { %s7187_s30 = smov 256   ;;  %s7188_s5 = smov 16  }
 0x4b8   : > { %7081 = dma.vmem_to_hbm [thread:$0]  (%p7247_p5), %s9840_s8, 98304, %s9837_s11, %s9845_s16, %s7187_s30, %s7187_s30, %s7188_s5  }
 0x4b9 PF: > { %p7087_p13 = scmp.ge.s32.totalorder %s7183_s15, 2  ;;  %s5907_s6 = sand.u32 1, %s7171_s12  }
 0x4ba   : > { %s5908_s7 = scalar_lea.sflag [#allocation3], %s5907_s6 }
 0x4bb   : > { %p7084_p0 = pnand %p7087_p13, %p7251_p6 }
 0x4bd   : > { %p7085_p1 = pneg %p7084_p0 }
 0x4bf   : > { %7166 = dma.done.wait (%p7085_p1), %s5908_s7, 98304  }
 0x4c0   : > { %7168 = vsyncadd (%p7085_p1), %s5908_s7, 4294868992  ;;  %p13_p2 = scmp.ge.s32.totalorder %s7234_s18, 4   ;;  %s9891_s12 = smov %s7175_s13 }
 0x4c1   : > { %s9892_s13 = smov %s7179_s14  ;;  %s9893_s14 = smov %s7245_s21 }
 0x4c2   : > { %s9894_s15 = smov %s7234_s18  ;;  %15 = sbr.rel (!%p13_p2) target bundleno = 3 (0x3), region = 78 }
 0x4c7   :  { %5913 = vsyncpa [#allocation3], 1 }
 0x4c8   :  { %5915 = vsyncpa [#allocation3 + $0x1], 1 }

</bundles_post_ra>
